<compile_context>
chip_gen: v6e
topology: v6e:2x2x1
jax: 0.10.0
libtpu: 0.0.40
codegen_flags: <defaults>
</compile_context>

<pallas_src>
import math
import functools

import jax
import jax.numpy as jnp
from jax.experimental import pallas as pl
from jax.experimental.pallas import tpu as pltpu


# VMEM budget for tile selection (double-buffered operands + output + scratch).
# Kept <= 32 MiB so the same tiling fits v5e/v6e (128 MiB) and v7x (64 MiB).
_TILE_VMEM_BUDGET = 32 * 1024 * 1024
_VMEM_LIMIT_BYTES = 48 * 1024 * 1024


# ---------------------------------------------------------------------------
# Padding / tiling helpers
# ---------------------------------------------------------------------------

def _pad_to(x, m):
    return ((x + m - 1) // m) * m


def _pick_tile(dim, candidates):
    """Largest candidate tile that evenly divides the (already padded) dim."""
    for c in candidates:
        if c <= dim and dim % c == 0:
            return c
    return dim


def _select_tiles(M, K, N, out_bytes):
    """Pick (tm, tn, tk).

    Node dim is 512-padded and feature dims 128-padded by the wrapper, so 512-row
    tiles are always selectable. tk is pushed as far as the VMEM budget allows,
    up to full K: that cuts f32-accumulator RMW traffic and makes the `support`
    operand of the A@support call effectively resident (DMA'd once per column block).
    """
    tm = _pick_tile(M, (512, 256, 128))
    tn = _pick_tile(N, (512, 256, 128))
    tk_cands = sorted({c for c in (K, 4096, 2048, 1024, 512, 256, 128)
                       if c <= K and K % c == 0}, reverse=True)
    for tk in tk_cands:
        fp = 2 * tm * tk * 2            # A tile (bf16), double-buffered
        fp += 2 * tk * tn * 2           # B tile (bf16), double-buffered
        fp += 2 * tm * tn * out_bytes   # output tile, double-buffered
        if out_bytes == 2:
            fp += tm * tn * 4           # f32 scratch accumulator (bf16 output only)
        if fp <= _TILE_VMEM_BUDGET:
            return tm, tn, tk
    return tm, tn, tk_cands[-1]


# ---------------------------------------------------------------------------
# Generic tiled matmul (+ optional bias / ReLU epilogue) kernel
# ---------------------------------------------------------------------------

def _mm_kernel(*refs, apply_relu, has_bias, use_scratch):
    if use_scratch:
        if has_bias:
            a_ref, b_ref, bias_ref, o_ref, acc_ref = refs
        else:
            a_ref, b_ref, o_ref, acc_ref = refs
            bias_ref = None
    else:
        if has_bias:
            a_ref, b_ref, bias_ref, o_ref = refs
        else:
            a_ref, b_ref, o_ref = refs
            bias_ref = None
        acc_ref = o_ref  # f32 output: accumulate directly into the output block

    k = pl.program_id(2)

    @pl.when(k == 0)
    def _():
        acc_ref[...] = jnp.zeros_like(acc_ref)

    acc_ref[...] += jnp.dot(a_ref[...], b_ref[...],
                            preferred_element_type=jnp.float32)

    if has_bias or apply_relu or use_scratch:
        @pl.when(k == pl.num_programs(2) - 1)
        def _():
            out = acc_ref[...]
            if has_bias:
                out = out + bias_ref[...]       # bias broadcast over rows
            if apply_relu:
                out = jnp.maximum(out, 0.0)
            o_ref[...] = out.astype(o_ref.dtype)


def tiled_matmul(a, b, bias=None, *, apply_relu=False, out_dtype=jnp.float32):
    """out = a @ b (+ bias) (+ ReLU).  a:(M,K) bf16, b:(K,N) bf16, bias:(1,N) f32.

    All dims must already be padded to multiples of 128 (node dim to 512)."""
    M, K = a.shape
    K2, N = b.shape
    assert K == K2

    out_bytes = jnp.dtype(out_dtype).itemsize
    use_scratch = out_dtype != jnp.float32
    tm, tn, tk = _select_tiles(M, K, N, out_bytes)
    grid = (M // tm, N // tn, K // tk)

    in_specs = [
        pl.BlockSpec((tm, tk), lambda i, j, k: (i, k)),
        pl.BlockSpec((tk, tn), lambda i, j, k: (k, j)),
    ]
    inputs = [a, b]
    if bias is not None:
        in_specs.append(pl.BlockSpec((1, tn), lambda i, j, k: (0, j)))
        inputs.append(bias)

    scratch = [pltpu.VMEM((tm, tn), jnp.float32)] if use_scratch else []

    kernel = functools.partial(_mm_kernel, apply_relu=apply_relu,
                               has_bias=bias is not None,
                               use_scratch=use_scratch)

    return pl.pallas_call(
        kernel,
        out_shape=jax.ShapeDtypeStruct((M, N), out_dtype),
        grid_spec=pltpu.PrefetchScalarGridSpec(
            num_scalar_prefetch=0,
            grid=grid,
            in_specs=in_specs,
            out_specs=pl.BlockSpec((tm, tn), lambda i, j, k: (i, j)),
            scratch_shapes=scratch,
        ),
        compiler_params=pltpu.CompilerParams(
            dimension_semantics=("parallel", "parallel", "arbitrary"),
            vmem_limit_bytes=_VMEM_LIMIT_BYTES,
        ),
    )(*inputs)


# ---------------------------------------------------------------------------
# GCN layer / network
# ---------------------------------------------------------------------------

def gcn_layer(x_bf16, adj_bf16, w_bf16, b_f32, *, apply_relu):
    """One GraphConvolution layer: relu_if( A @ (X @ W) + b )."""
    # X@W hoisted: computed once; bf16 output feeds the adjacency reduction.
    support = tiled_matmul(x_bf16, w_bf16, out_dtype=jnp.bfloat16)
    # Non-final layers emit bf16 directly (halves inter-layer HBM traffic and
    # removes the wrapper-side re-cast); final layer emits f32.
    out_dtype = jnp.bfloat16 if apply_relu else jnp.float32
    return tiled_matmul(adj_bf16, support, bias=b_f32,
                        apply_relu=apply_relu, out_dtype=out_dtype)


def _gcn_forward(features, adjacency, params):
    """GraphConvolutionalNetwork.forward (eval mode: dropout = identity)."""
    n, f_in = features.shape
    n_pad = _pad_to(n, 512)        # node dim padded to 512 -> big row / K tiles
    f_in_pad = _pad_to(f_in, 128)

    # Pad + cast ONCE (hoisted out of the layer loop).  The N x N adjacency
    # stream dominates HBM traffic, so it is stored as bf16 a single time.
    x = jnp.pad(features.astype(jnp.float32),
                ((0, n_pad - n), (0, f_in_pad - f_in))).astype(jnp.bfloat16)
    adj = jnp.pad(adjacency.astype(jnp.float32),
                  ((0, n_pad - n), (0, n_pad - n))).astype(jnp.bfloat16)

    n_layers = len(params)
    for i, (w, b) in enumerate(params):
        fi, fo = w.shape
        fi_pad, fo_pad = _pad_to(fi, 128), _pad_to(fo, 128)
        w_pad = jnp.pad(w, ((0, fi_pad - fi), (0, fo_pad - fo))).astype(jnp.bfloat16)
        b_pad = jnp.pad(b.reshape(1, fo), ((0, 0), (0, fo_pad - fo)))
        x = gcn_layer(x, adj, w_pad, b_pad, apply_relu=(i < n_layers - 1))
        # TODO(synk): F.dropout(training=True) not reproduced; eval-mode identity.

    fo_final = params[-1][0].shape[1]
    return x[:n, :fo_final]


# jit fuses pad/cast plumbing, removes host launch gaps between the per-layer calls.
gcn_forward = jax.jit(_gcn_forward)


def init_gcn_params(key, input_size, output_size, units, n_layers):
    """Matches GraphConvolution.reset_parameters:
    weight, bias ~ U(-1/sqrt(out_features), 1/sqrt(out_features))."""
    layer_in = [input_size] + [units] * (n_layers - 1)
    layer_out = [units] * (n_layers - 1) + [output_size]
    params = []
    for i in range(n_layers):
        key, kw, kb = jax.random.split(key, 3)
        stdv = 1.0 / math.sqrt(layer_out[i])
        w = jax.random.uniform(kw, (layer_in[i], layer_out[i]),
                               dtype=jnp.float32, minval=-stdv, maxval=stdv)
        b = jax.random.uniform(kb, (layer_out[i],),
                               dtype=jnp.float32, minval=-stdv, maxval=stdv)
        params.append((w, b))
    return params


# ---------------------------------------------------------------------------
# References (plain JAX)
# ---------------------------------------------------------------------------

def gcn_reference(features, adjacency, params, compute_dtype=None):
    x = features
    n_layers = len(params)
    for i, (w, b) in enumerate(params):
        if compute_dtype is not None:
            support = jnp.dot(x.astype(compute_dtype), w.astype(compute_dtype),
                              preferred_element_type=jnp.float32)
            x = jnp.dot(adjacency.astype(compute_dtype),
                        support.astype(compute_dtype),
                        preferred_element_type=jnp.float32) + b
        else:
            x = adjacency @ (x @ w) + b
        if i < n_layers - 1:
            x = jnp.maximum(x, 0.0)
    return x


if __name__ == "__main__":
    # Small shapes implied by the module: N nodes, input_size features.
    N = 8
    input_size = 16
    units = 32
    output_size = 8
    n_layers = 2
    dropout = 0.5  # unused at inference

    key = jax.random.PRNGKey(0)
    k_feat, k_adj, k_params = jax.random.split(key, 3)

    features = jax.random.normal(k_feat, (N, input_size), dtype=jnp.float32)

    # Symmetric row-normalized dense adjacency (stand-in for the sparse adj).
    a_raw = (jax.random.uniform(k_adj, (N, N)) > 0.6).astype(jnp.float32)
    adj = a_raw + a_raw.T + jnp.eye(N, dtype=jnp.float32)
    deg = jnp.sum(adj, axis=1, keepdims=True)
    adj = adj / deg

    params = init_gcn_params(k_params, input_size, output_size, units, n_layers)

    out = jax.block_until_ready(gcn_forward(features, adj, params))
    assert out.shape == (N, output_size)

    # Primary check: JAX reference using the same bf16-operand / f32-accum matmuls.
    ref_bf16 = gcn_reference(features, adj, params, compute_dtype=jnp.bfloat16)
    assert jnp.allclose(out, ref_bf16, atol=2e-2, rtol=2e-2)

    # Loose sanity check against the full-f32 reference.
    ref_f32 = gcn_reference(features, adj, params, compute_dtype=None)
    assert jnp.allclose(out, ref_f32, atol=1e-1, rtol=1e-1)

    print("KERNEL_OK")
</pallas_src>

<mosaic_0001>
module attributes {stable_mosaic.version = 11 : i64} {
  func.func @_mm_kernel(%arg0: i32, %arg1: i32, %arg2: i32, %arg3: memref<512x512xbf16, #tpu.memory_space<vmem>>, %arg4: memref<512x128xbf16, #tpu.memory_space<vmem>>, %arg5: memref<1x128xf32, #tpu.memory_space<vmem>>, %arg6: memref<512x128xf32, #tpu.memory_space<vmem>>) attributes {dimension_semantics = [#tpu.dimension_semantics<parallel>, #tpu.dimension_semantics<parallel>, #tpu.dimension_semantics<arbitrary>], iteration_bounds = array<i64: 1, 1, 1>, scalar_prefetch = 0 : i64, scratch_operands = 0 : i64, tpu.core_type = #tpu.core_type<tc>, window_params = [{transform_indices = @transform_0, window_bounds = array<i64: 512, 512>}, {transform_indices = @transform_1, window_bounds = array<i64: 512, 128>}, {transform_indices = @transform_2, window_bounds = array<i64: 1, 128>}, {transform_indices = @transform_3, window_bounds = array<i64: 512, 128>}]} {
    %c0_i32 = arith.constant 0 : i32
    %0 = arith.cmpi eq, %arg2, %c0_i32 : i32
    %1 = arith.extui %0 : i1 to i32
    %c0_i32_0 = arith.constant 0 : i32
    %2 = arith.cmpi ne, %1, %c0_i32_0 : i32
    scf.if %2 {
      %cst_10 = arith.constant 0.000000e+00 : f32
      %12 = vector.broadcast %cst_10 : f32 to vector<512x128xf32>
      %c0_11 = arith.constant 0 : index
      %c0_12 = arith.constant 0 : index
      %13 = vector.load %arg6[%c0_11, %c0_12] : memref<512x128xf32, #tpu.memory_space<vmem>>, vector<512x128xf32>
      tpu.vector_store %arg6[%c0_11, %c0_12], %12 {strides = array<i32>} : memref<512x128xf32, #tpu.memory_space<vmem>>, vector<512x128xf32>,
    } else {
    }
    %c0 = arith.constant 0 : index
    %c0_1 = arith.constant 0 : index
    %3 = vector.load %arg6[%c0, %c0_1] : memref<512x128xf32, #tpu.memory_space<vmem>>, vector<512x128xf32>
    %c0_2 = arith.constant 0 : index
    %c0_3 = arith.constant 0 : index
    %4 = vector.load %arg3[%c0_2, %c0_3] : memref<512x512xbf16, #tpu.memory_space<vmem>>, vector<512x512xbf16>
    %c0_4 = arith.constant 0 : index
    %c0_5 = arith.constant 0 : index
    %5 = vector.load %arg4[%c0_4, %c0_5] : memref<512x128xbf16, #tpu.memory_space<vmem>>, vector<512x128xbf16>
    %cst = arith.constant dense<0.000000e+00> : vector<512x128xf32>
    %6 = tpu.matmul %4, %5, %cst {dimension_numbers = #tpu.dot_dimension_numbers<[1], [0], [0], [1], [0, 0, 1, 1], [], []>} : vector<512x512xbf16>, vector<512x128xbf16>, vector<512x128xf32> -> vector<512x128xf32>
    %7 = arith.addf %3, %6 : vector<512x128xf32>
    %c0_6 = arith.constant 0 : index
    %c0_7 = arith.constant 0 : index
    %8 = vector.load %arg6[%c0_6, %c0_7] : memref<512x128xf32, #tpu.memory_space<vmem>>, vector<512x128xf32>
    tpu.vector_store %arg6[%c0_6, %c0_7], %7 {strides = array<i32>} : memref<512x128xf32, #tpu.memory_space<vmem>>, vector<512x128xf32>,
    %c0_i32_8 = arith.constant 0 : i32
    %9 = arith.cmpi eq, %arg2, %c0_i32_8 : i32
    %10 = arith.extui %9 : i1 to i32
    %c0_i32_9 = arith.constant 0 : i32
    %11 = arith.cmpi ne, %10, %c0_i32_9 : i32
    scf.if %11 {
      %c0_10 = arith.constant 0 : index
      %c0_11 = arith.constant 0 : index
      %12 = vector.load %arg6[%c0_10, %c0_11] : memref<512x128xf32, #tpu.memory_space<vmem>>, vector<512x128xf32>
      %c0_12 = arith.constant 0 : index
      %c0_13 = arith.constant 0 : index
      %13 = vector.load %arg5[%c0_12, %c0_13] : memref<1x128xf32, #tpu.memory_space<vmem>>, vector<1x128xf32>
      %14 = vector.broadcast %13 : vector<1x128xf32> to vector<512x128xf32>
      %15 = arith.addf %12, %14 : vector<512x128xf32>
      %c0_14 = arith.constant 0 : index
      %c0_15 = arith.constant 0 : index
      %16 = vector.load %arg6[%c0_14, %c0_15] : memref<512x128xf32, #tpu.memory_space<vmem>>, vector<512x128xf32>
      tpu.vector_store %arg6[%c0_14, %c0_15], %15 {strides = array<i32>} : memref<512x128xf32, #tpu.memory_space<vmem>>, vector<512x128xf32>,
    } else {
    }
    return
  }
  func.func @transform_0(%arg0: i32, %arg1: i32, %arg2: i32) -> (i32, i32) {
    %c0_i32 = arith.constant 0 : i32
    return %arg0, %arg2 : i32, i32
  }
  func.func @transform_1(%arg0: i32, %arg1: i32, %arg2: i32) -> (i32, i32) {
    %c0_i32 = arith.constant 0 : i32
    return %arg2, %arg1 : i32, i32
  }
  func.func @transform_2(%arg0: i32, %arg1: i32, %arg2: i32) -> (i32, i32) {
    %c0_i32 = arith.constant 0 : i32
    %c0_i32_0 = arith.constant 0 : i32
    return %c0_i32, %arg1 : i32, i32
  }
  func.func @transform_3(%arg0: i32, %arg1: i32, %arg2: i32) -> (i32, i32) {
    %c0_i32 = arith.constant 0 : i32
    return %arg0, %arg1 : i32, i32
  }
}

module attributes {stable_mosaic.version = 11 : i64} {
  func.func @_mm_kernel(%arg0: i32, %arg1: i32, %arg2: i32, %arg3: memref<512x512xbf16, #tpu.memory_space<vmem>>, %arg4: memref<512x128xbf16, #tpu.memory_space<vmem>>, %arg5: memref<1x128xf32, #tpu.memory_space<vmem>>, %arg6: memref<512x128xbf16, #tpu.memory_space<vmem>>, %arg7: memref<512x128xf32, #tpu.memory_space<vmem>>) attributes {dimension_semantics = [#tpu.dimension_semantics<parallel>, #tpu.dimension_semantics<parallel>, #tpu.dimension_semantics<arbitrary>], iteration_bounds = array<i64: 1, 1, 1>, scalar_prefetch = 0 : i64, scratch_operands = 1 : i64, tpu.core_type = #tpu.core_type<tc>, window_params = [{transform_indices = @transform_0, window_bounds = array<i64: 512, 512>}, {transform_indices = @transform_1, window_bounds = array<i64: 512, 128>}, {transform_indices = @transform_2, window_bounds = array<i64: 1, 128>}, {transform_indices = @transform_3, window_bounds = array<i64: 512, 128>}]} {
    %c0_i32 = arith.constant 0 : i32
    %0 = arith.cmpi eq, %arg2, %c0_i32 : i32
    %1 = arith.extui %0 : i1 to i32
    %c0_i32_0 = arith.constant 0 : i32
    %2 = arith.cmpi ne, %1, %c0_i32_0 : i32
    scf.if %2 {
      %cst_10 = arith.constant 0.000000e+00 : f32
      %12 = vector.broadcast %cst_10 : f32 to vector<512x128xf32>
      %c0_11 = arith.constant 0 : index
      %c0_12 = arith.constant 0 : index
      %13 = vector.load %arg7[%c0_11, %c0_12] : memref<512x128xf32, #tpu.memory_space<vmem>>, vector<512x128xf32>
      tpu.vector_store %arg7[%c0_11, %c0_12], %12 {strides = array<i32>} : memref<512x128xf32, #tpu.memory_space<vmem>>, vector<512x128xf32>,
    } else {
    }
    %c0 = arith.constant 0 : index
    %c0_1 = arith.constant 0 : index
    %3 = vector.load %arg7[%c0, %c0_1] : memref<512x128xf32, #tpu.memory_space<vmem>>, vector<512x128xf32>
    %c0_2 = arith.constant 0 : index
    %c0_3 = arith.constant 0 : index
    %4 = vector.load %arg3[%c0_2, %c0_3] : memref<512x512xbf16, #tpu.memory_space<vmem>>, vector<512x512xbf16>
    %c0_4 = arith.constant 0 : index
    %c0_5 = arith.constant 0 : index
    %5 = vector.load %arg4[%c0_4, %c0_5] : memref<512x128xbf16, #tpu.memory_space<vmem>>, vector<512x128xbf16>
    %cst = arith.constant dense<0.000000e+00> : vector<512x128xf32>
    %6 = tpu.matmul %4, %5, %cst {dimension_numbers = #tpu.dot_dimension_numbers<[1], [0], [0], [1], [0, 0, 1, 1], [], []>} : vector<512x512xbf16>, vector<512x128xbf16>, vector<512x128xf32> -> vector<512x128xf32>
    %7 = arith.addf %3, %6 : vector<512x128xf32>
    %c0_6 = arith.constant 0 : index
    %c0_7 = arith.constant 0 : index
    %8 = vector.load %arg7[%c0_6, %c0_7] : memref<512x128xf32, #tpu.memory_space<vmem>>, vector<512x128xf32>
    tpu.vector_store %arg7[%c0_6, %c0_7], %7 {strides = array<i32>} : memref<512x128xf32, #tpu.memory_space<vmem>>, vector<512x128xf32>,
    %c0_i32_8 = arith.constant 0 : i32
    %9 = arith.cmpi eq, %arg2, %c0_i32_8 : i32
    %10 = arith.extui %9 : i1 to i32
    %c0_i32_9 = arith.constant 0 : i32
    %11 = arith.cmpi ne, %10, %c0_i32_9 : i32
    scf.if %11 {
      %c0_10 = arith.constant 0 : index
      %c0_11 = arith.constant 0 : index
      %12 = vector.load %arg7[%c0_10, %c0_11] : memref<512x128xf32, #tpu.memory_space<vmem>>, vector<512x128xf32>
      %c0_12 = arith.constant 0 : index
      %c0_13 = arith.constant 0 : index
      %13 = vector.load %arg5[%c0_12, %c0_13] : memref<1x128xf32, #tpu.memory_space<vmem>>, vector<1x128xf32>
      %14 = vector.broadcast %13 : vector<1x128xf32> to vector<512x128xf32>
      %15 = arith.addf %12, %14 : vector<512x128xf32>
      %cst_14 = arith.constant 0.000000e+00 : f32
      %16 = vector.broadcast %cst_14 : f32 to vector<512x128xf32>
      %17 = arith.maximumf %15, %16 : vector<512x128xf32>
      %18 = arith.truncf %17 : vector<512x128xf32> to vector<512x128xbf16>
      %c0_15 = arith.constant 0 : index
      %c0_16 = arith.constant 0 : index
      %19 = vector.load %arg6[%c0_15, %c0_16] : memref<512x128xbf16, #tpu.memory_space<vmem>>, vector<512x128xbf16>
      tpu.vector_store %arg6[%c0_15, %c0_16], %18 {strides = array<i32>} : memref<512x128xbf16, #tpu.memory_space<vmem>>, vector<512x128xbf16>,
    } else {
    }
    return
  }
  func.func @transform_0(%arg0: i32, %arg1: i32, %arg2: i32) -> (i32, i32) {
    %c0_i32 = arith.constant 0 : i32
    return %arg0, %arg2 : i32, i32
  }
  func.func @transform_1(%arg0: i32, %arg1: i32, %arg2: i32) -> (i32, i32) {
    %c0_i32 = arith.constant 0 : i32
    return %arg2, %arg1 : i32, i32
  }
  func.func @transform_2(%arg0: i32, %arg1: i32, %arg2: i32) -> (i32, i32) {
    %c0_i32 = arith.constant 0 : i32
    %c0_i32_0 = arith.constant 0 : i32
    return %c0_i32, %arg1 : i32, i32
  }
  func.func @transform_3(%arg0: i32, %arg1: i32, %arg2: i32) -> (i32, i32) {
    %c0_i32 = arith.constant 0 : i32
    return %arg0, %arg1 : i32, i32
  }
}

module attributes {stable_mosaic.version = 11 : i64} {
  func.func @_mm_kernel(%arg0: i32, %arg1: i32, %arg2: i32, %arg3: memref<512x128xbf16, #tpu.memory_space<vmem>>, %arg4: memref<128x128xbf16, #tpu.memory_space<vmem>>, %arg5: memref<512x128xbf16, #tpu.memory_space<vmem>>, %arg6: memref<512x128xf32, #tpu.memory_space<vmem>>) attributes {dimension_semantics = [#tpu.dimension_semantics<parallel>, #tpu.dimension_semantics<parallel>, #tpu.dimension_semantics<arbitrary>], iteration_bounds = array<i64: 1, 1, 1>, scalar_prefetch = 0 : i64, scratch_operands = 1 : i64, tpu.core_type = #tpu.core_type<tc>, window_params = [{transform_indices = @transform_0, window_bounds = array<i64: 512, 128>}, {transform_indices = @transform_1, window_bounds = array<i64: 128, 128>}, {transform_indices = @transform_2, window_bounds = array<i64: 512, 128>}]} {
    %c0_i32 = arith.constant 0 : i32
    %0 = arith.cmpi eq, %arg2, %c0_i32 : i32
    %1 = arith.extui %0 : i1 to i32
    %c0_i32_0 = arith.constant 0 : i32
    %2 = arith.cmpi ne, %1, %c0_i32_0 : i32
    scf.if %2 {
      %cst_10 = arith.constant 0.000000e+00 : f32
      %12 = vector.broadcast %cst_10 : f32 to vector<512x128xf32>
      %c0_11 = arith.constant 0 : index
      %c0_12 = arith.constant 0 : index
      %13 = vector.load %arg6[%c0_11, %c0_12] : memref<512x128xf32, #tpu.memory_space<vmem>>, vector<512x128xf32>
      tpu.vector_store %arg6[%c0_11, %c0_12], %12 {strides = array<i32>} : memref<512x128xf32, #tpu.memory_space<vmem>>, vector<512x128xf32>,
    } else {
    }
    %c0 = arith.constant 0 : index
    %c0_1 = arith.constant 0 : index
    %3 = vector.load %arg6[%c0, %c0_1] : memref<512x128xf32, #tpu.memory_space<vmem>>, vector<512x128xf32>
    %c0_2 = arith.constant 0 : index
    %c0_3 = arith.constant 0 : index
    %4 = vector.load %arg3[%c0_2, %c0_3] : memref<512x128xbf16, #tpu.memory_space<vmem>>, vector<512x128xbf16>
    %c0_4 = arith.constant 0 : index
    %c0_5 = arith.constant 0 : index
    %5 = vector.load %arg4[%c0_4, %c0_5] : memref<128x128xbf16, #tpu.memory_space<vmem>>, vector<128x128xbf16>
    %cst = arith.constant dense<0.000000e+00> : vector<512x128xf32>
    %6 = tpu.matmul %4, %5, %cst {dimension_numbers = #tpu.dot_dimension_numbers<[1], [0], [0], [1], [0, 0, 1, 1], [], []>} : vector<512x128xbf16>, vector<128x128xbf16>, vector<512x128xf32> -> vector<512x128xf32>
    %7 = arith.addf %3, %6 : vector<512x128xf32>
    %c0_6 = arith.constant 0 : index
    %c0_7 = arith.constant 0 : index
    %8 = vector.load %arg6[%c0_6, %c0_7] : memref<512x128xf32, #tpu.memory_space<vmem>>, vector<512x128xf32>
    tpu.vector_store %arg6[%c0_6, %c0_7], %7 {strides = array<i32>} : memref<512x128xf32, #tpu.memory_space<vmem>>, vector<512x128xf32>,
    %c0_i32_8 = arith.constant 0 : i32
    %9 = arith.cmpi eq, %arg2, %c0_i32_8 : i32
    %10 = arith.extui %9 : i1 to i32
    %c0_i32_9 = arith.constant 0 : i32
    %11 = arith.cmpi ne, %10, %c0_i32_9 : i32
    scf.if %11 {
      %c0_10 = arith.constant 0 : index
      %c0_11 = arith.constant 0 : index
      %12 = vector.load %arg6[%c0_10, %c0_11] : memref<512x128xf32, #tpu.memory_space<vmem>>, vector<512x128xf32>
      %13 = arith.truncf %12 : vector<512x128xf32> to vector<512x128xbf16>
      %c0_12 = arith.constant 0 : index
      %c0_13 = arith.constant 0 : index
      %14 = vector.load %arg5[%c0_12, %c0_13] : memref<512x128xbf16, #tpu.memory_space<vmem>>, vector<512x128xbf16>
      tpu.vector_store %arg5[%c0_12, %c0_13], %13 {strides = array<i32>} : memref<512x128xbf16, #tpu.memory_space<vmem>>, vector<512x128xbf16>,
    } else {
    }
    return
  }
  func.func @transform_0(%arg0: i32, %arg1: i32, %arg2: i32) -> (i32, i32) {
    %c0_i32 = arith.constant 0 : i32
    return %arg0, %arg2 : i32, i32
  }
  func.func @transform_1(%arg0: i32, %arg1: i32, %arg2: i32) -> (i32, i32) {
    %c0_i32 = arith.constant 0 : i32
    return %arg2, %arg1 : i32, i32
  }
  func.func @transform_2(%arg0: i32, %arg1: i32, %arg2: i32) -> (i32, i32) {
    %c0_i32 = arith.constant 0 : i32
    return %arg0, %arg1 : i32, i32
  }
}

</mosaic_0001>

<bundles_post_ra>
// kernel: _gcn_forward.4
= control target key start
LH: loop header
LB: loop body
LE: loop exit
PB: predicated region body
PF: predicated region fallthrough
CT: control target
= control target key end

     0   :  { %s2038_s1 = inlined_call_operand.vmem [shape: bf16[128,128], index: 1, kind: input, shape index: {}]   ;;  %s2039_s0 = inlined_call_operand.vmem [shape: bf16[512,128], index: 0, kind: input, shape index: {}]   ;;  %s2040_s2 = inlined_call_operand.vmem [shape: bf16[512,128], index: 2, kind: output, shape index: {}]  }
   0x1   :  { %v1767_v0 = vld [vmem:[%s2038_s1 + $0x38] sm:$0xff]   ;;  %v1768_v1 = vld [vmem:[%s2038_s1 + $0x30] sm:$0xff]   ;;  %v1769_v2 = vld [vmem:[%s2038_s1 + $0x28] sm:$0xff]  }
   0x2   :  { %1671 = vmatprep.subr.bf16.mxu0 %v1767_v0  ;;  %1751 = vmatprep.subr.bf16.mxu1 %v1767_v0  ;;  %v1770_v3 = vld [vmem:[%s2038_s1 + $0x20] sm:$0xff]   ;;  %v1771_v6 = vld [vmem:[%s2038_s1 + $0x18] sm:$0xff]   ;;  %v1772_v7 = vld [vmem:[%s2038_s1 + $0x10] sm:$0xff]  }
   0x3   :  { %1672 = vmatpush3.bf16.msra.mxu0 %v1767_v0  ;;  %1759 = vmatpush3.bf16.msra.mxu1 %v1767_v0  ;;  %v1775_v4 = vld [vmem:[%s2039_s0] sm:$0xff]   ;;  %v1773_v8 = vld [vmem:[%s2038_s1 + $0x8] sm:$0xff]   ;;  %v1779_v12 = vld [vmem:[%s2039_s0 + $0x10] sm:$0xff]  }
   0x4   :  { %1673 = vmatprep.subr.bf16.mxu0 %v1768_v1  ;;  %1752 = vmatprep.subr.bf16.mxu1 %v1768_v1  ;;  %v1776_v5 = vld [vmem:[%s2039_s0 + $0x80] sm:$0xff]   ;;  %v1777_v10 = vld [vmem:[%s2039_s0 + $0x8] sm:$0xff]   ;;  %v1780_v13 = vld [vmem:[%s2039_s0 + $0x90] sm:$0xff]  }
   0x5   :  { %1687 = vmatprep.mubr.bf16.mxu0 %v1775_v4  ;;  %1719 = vmatprep.mubr.bf16.mxu1 %v1776_v5  ;;  %v1774_v9 = vld [vmem:[%s2038_s1] sm:$0xff]   ;;  %v1778_v11 = vld [vmem:[%s2039_s0 + $0x88] sm:$0xff]   ;;  %v1781_v14 = vld [vmem:[%s2039_s0 + $0x18] sm:$0xff]  }
   0x6   :  { %v1782_v15 = vld [vmem:[%s2039_s0 + $0x98] sm:$0xff]   ;;  %v1783_v16 = vld [vmem:[%s2039_s0 + $0x20] sm:$0xff]   ;;  %v1785_v18 = vld [vmem:[%s2039_s0 + $0x28] sm:$0xff]  }
   0x7   :  { %1674 = vmatpush3.bf16.msra.mxu0 %v1768_v1  ;;  %1760 = vmatpush3.bf16.msra.mxu1 %v1768_v1  ;;  %v1784_v17 = vld [vmem:[%s2039_s0 + $0xa0] sm:$0xff]   ;;  %v1786_v19 = vld [vmem:[%s2039_s0 + $0xa8] sm:$0xff]   ;;  %v1787_v20 = vld [vmem:[%s2039_s0 + $0x30] sm:$0xff]  }
   0x8   :  { %1675 = vmatprep.subr.bf16.mxu0 %v1769_v2  ;;  %1753 = vmatprep.subr.bf16.mxu1 %v1769_v2  ;;  %v1788_v21 = vld [vmem:[%s2039_s0 + $0xb0] sm:$0xff]   ;;  %v1789_v22 = vld [vmem:[%s2039_s0 + $0x38] sm:$0xff]   ;;  %v1791_v24 = vld [vmem:[%s2039_s0 + $0x40] sm:$0xff]  }
   0x9   :  { %v1790_v23 = vld [vmem:[%s2039_s0 + $0xb8] sm:$0xff]   ;;  %v1792_v25 = vld [vmem:[%s2039_s0 + $0xc0] sm:$0xff]   ;;  %v1793_v26 = vld [vmem:[%s2039_s0 + $0x48] sm:$0xff]  }
   0xa   :  { %v1794_v27 = vld [vmem:[%s2039_s0 + $0xc8] sm:$0xff]   ;;  %v1795_v28 = vld [vmem:[%s2039_s0 + $0x50] sm:$0xff]   ;;  %v1797_v30 = vld [vmem:[%s2039_s0 + $0x58] sm:$0xff]  }
   0xb   :  { %1676 = vmatpush3.bf16.msra.mxu0 %v1769_v2  ;;  %1761 = vmatpush3.bf16.msra.mxu1 %v1769_v2  ;;  %v1796_v29 = vld [vmem:[%s2039_s0 + $0xd0] sm:$0xff]   ;;  %v1798_v31 = vld [vmem:[%s2039_s0 + $0xd8] sm:$0xff]   ;;  %v1799_v32 = vld [vmem:[%s2039_s0 + $0x60] sm:$0xff]  }
   0xc   :  { %1677 = vmatprep.subr.bf16.mxu0 %v1770_v3  ;;  %1754 = vmatprep.subr.bf16.mxu1 %v1770_v3  ;;  %v1800_v33 = vld [vmem:[%s2039_s0 + $0xe0] sm:$0xff]   ;;  %v1801_v34 = vld [vmem:[%s2039_s0 + $0x68] sm:$0xff]   ;;  %v1803_v36 = vld [vmem:[%s2039_s0 + $0x70] sm:$0xff]  }
   0xd   :  { %v1802_v35 = vld [vmem:[%s2039_s0 + $0xe8] sm:$0xff]   ;;  %v1804_v37 = vld [vmem:[%s2039_s0 + $0xf0] sm:$0xff]   ;;  %v1805_v38 = vld [vmem:[%s2039_s0 + $0x78] sm:$0xff]  }
   0xe   :  { %v1806_v39 = vld [vmem:[%s2039_s0 + $0xf8] sm:$0xff]  }
   0xf   :  { %1678 = vmatpush3.bf16.msra.mxu0 %v1770_v3  ;;  %1762 = vmatpush3.bf16.msra.mxu1 %v1770_v3 }
  0x10   :  { %1679 = vmatprep.subr.bf16.mxu0 %v1771_v6  ;;  %1755 = vmatprep.subr.bf16.mxu1 %v1771_v6 }
  0x13   :  { %1680 = vmatpush3.bf16.msra.mxu0 %v1771_v6  ;;  %1763 = vmatpush3.bf16.msra.mxu1 %v1771_v6 }
  0x14   :  { %1681 = vmatprep.subr.bf16.mxu0 %v1772_v7  ;;  %1756 = vmatprep.subr.bf16.mxu1 %v1772_v7 }
  0x17   :  { %1682 = vmatpush3.bf16.msra.mxu0 %v1772_v7  ;;  %1764 = vmatpush3.bf16.msra.mxu1 %v1772_v7 }
  0x18   :  { %1683 = vmatprep.subr.bf16.mxu0 %v1773_v8  ;;  %1757 = vmatprep.subr.bf16.mxu1 %v1773_v8 }
  0x1b   :  { %1684 = vmatpush3.bf16.msra.mxu0 %v1773_v8  ;;  %1765 = vmatpush3.bf16.msra.mxu1 %v1773_v8 }
  0x1c   :  { %1685 = vmatprep.subr.bf16.mxu0 %v1774_v9  ;;  %1758 = vmatprep.subr.bf16.mxu1 %v1774_v9 }
  0x1f   :  { %1686 = vmatpush3.bf16.msra.mxu0 %v1774_v9  ;;  %1766 = vmatpush3.bf16.msra.mxu1 %v1774_v9 }
  0x22   :  { %1688 = vmatmul.mubr.bf16.vlgmr.msra.gmra.mxu0 %v1777_v10  ;;  %1720 = vmatmul.mubr.bf16.vlgmr.msra.gmra.mxu1 %v1778_v11 }
  0x23   :  { %1691 = vmatprep.mubr.bf16.mxu0 %v1779_v12  ;;  %1723 = vmatprep.mubr.bf16.mxu1 %v1780_v13 }
  0x2a   :  { %1692 = vmatmul.mubr.bf16.gmra.mxu0 %v1781_v14  ;;  %1724 = vmatmul.mubr.bf16.gmra.mxu1 %v1782_v15 }
  0x2b   :  { %1695 = vmatprep.mubr.bf16.mxu0 %v1783_v16  ;;  %1727 = vmatprep.mubr.bf16.mxu1 %v1784_v17 }
  0x32   :  { %1696 = vmatmul.mubr.bf16.gmra.mxu0 %v1785_v18  ;;  %1728 = vmatmul.mubr.bf16.gmra.mxu1 %v1786_v19 }
  0x33   :  { %1699 = vmatprep.mubr.bf16.mxu0 %v1787_v20  ;;  %1731 = vmatprep.mubr.bf16.mxu1 %v1788_v21 }
  0x3a   :  { %1700 = vmatmul.mubr.bf16.gmra.mxu0 %v1789_v22  ;;  %1732 = vmatmul.mubr.bf16.gmra.mxu1 %v1790_v23 }
  0x3b   :  { %1703 = vmatprep.mubr.bf16.mxu0 %v1791_v24  ;;  %1735 = vmatprep.mubr.bf16.mxu1 %v1792_v25 }
  0x42   :  { %1704 = vmatmul.mubr.bf16.gmra.mxu0 %v1793_v26  ;;  %1736 = vmatmul.mubr.bf16.gmra.mxu1 %v1794_v27 }
  0x43   :  { %1707 = vmatprep.mubr.bf16.mxu0 %v1795_v28  ;;  %1739 = vmatprep.mubr.bf16.mxu1 %v1796_v29 }
  0x4a   :  { %1708 = vmatmul.mubr.bf16.gmra.mxu0 %v1797_v30  ;;  %1740 = vmatmul.mubr.bf16.gmra.mxu1 %v1798_v31 }
  0x4b   :  { %1711 = vmatprep.mubr.bf16.mxu0 %v1799_v32  ;;  %1743 = vmatprep.mubr.bf16.mxu1 %v1800_v33 }
  0x52   :  { %1712 = vmatmul.mubr.bf16.gmra.mxu0 %v1801_v34  ;;  %1744 = vmatmul.mubr.bf16.gmra.mxu1 %v1802_v35 }
  0x53   :  { %1715 = vmatprep.mubr.bf16.mxu0 %v1803_v36  ;;  %1747 = vmatprep.mubr.bf16.mxu1 %v1804_v37 }
  0x5a   :  { %1716 = vmatmul.mubr.bf16.gmra.mxu0 %v1805_v38  ;;  %1748 = vmatmul.mubr.bf16.gmra.mxu1 %v1806_v39 }
  0xe2   :  { %v1689_v40 = vpop.f32.mrf.mxu0  ;;  %v1721_v41 = vpop.f32.mrf.mxu1 }
  0xe4   :  { %v498_v42 = vpop.f32.mrf.mxu0  ;;  %v626_v43 = vpop.f32.mrf.mxu1 }
  0xe6   :  { %v1690_v44 = vpop.f32.mrf.mxu0  ;;  %v1722_v45 = vpop.f32.mrf.mxu1 }
  0xe7   :  { %v1448_v46 = vpack.c.bf16 %v1690_v44, %v1689_v40  ;;  %v1528_v47 = vpack.c.bf16 %v1722_v45, %v1721_v41 }
  0xe8   :  { %v501_v48 = vpop.f32.mrf.mxu0  ;;  %v629_v49 = vpop.f32.mrf.mxu1 }
  0xe9   :  { %1600 = vst [vmem:[%s2040_s2 + $0x8] sm:$0xff] %v1448_v46   ;;  %1616 = vst [vmem:[%s2040_s2 + $0x88] sm:$0xff] %v1528_v47   ;;  %v1443_v50 = vpack.c.bf16 %v501_v48, %v498_v42  ;;  %v1523_v51 = vpack.c.bf16 %v629_v49, %v626_v43 }
  0xea   :  { %v1693_v52 = vpop.f32.mrf.mxu0  ;;  %v1725_v53 = vpop.f32.mrf.mxu1 }
  0xeb   :  { %1444 = vst [vmem:[%s2040_s2] sm:$0xff] %v1443_v50   ;;  %1615 = vst [vmem:[%s2040_s2 + $0x80] sm:$0xff] %v1523_v51  }
  0xec   :  { %v514_v54 = vpop.f32.mrf.mxu0  ;;  %v642_v55 = vpop.f32.mrf.mxu1 }
  0xee   :  { %v1694_v56 = vpop.f32.mrf.mxu0  ;;  %v1726_v57 = vpop.f32.mrf.mxu1 }
  0xef   :  { %v1458_v58 = vpack.c.bf16 %v1694_v56, %v1693_v52  ;;  %v1538_v59 = vpack.c.bf16 %v1726_v57, %v1725_v53 }
  0xf0   :  { %v517_v60 = vpop.f32.mrf.mxu0  ;;  %v645_v61 = vpop.f32.mrf.mxu1 }
  0xf1   :  { %1602 = vst [vmem:[%s2040_s2 + $0x18] sm:$0xff] %v1458_v58   ;;  %1618 = vst [vmem:[%s2040_s2 + $0x98] sm:$0xff] %v1538_v59   ;;  %v1453_v62 = vpack.c.bf16 %v517_v60, %v514_v54  ;;  %v1533_v63 = vpack.c.bf16 %v645_v61, %v642_v55 }
  0xf2   :  { %v1697_v0 = vpop.f32.mrf.mxu0  ;;  %v1729_v1 = vpop.f32.mrf.mxu1 }
  0xf3   :  { %1601 = vst [vmem:[%s2040_s2 + $0x10] sm:$0xff] %v1453_v62   ;;  %1617 = vst [vmem:[%s2040_s2 + $0x90] sm:$0xff] %v1533_v63  }
  0xf4   :  { %v530_v2 = vpop.f32.mrf.mxu0  ;;  %v658_v3 = vpop.f32.mrf.mxu1 }
  0xf6   :  { %v1698_v4 = vpop.f32.mrf.mxu0  ;;  %v1730_v5 = vpop.f32.mrf.mxu1 }
  0xf7   :  { %v1468_v6 = vpack.c.bf16 %v1698_v4, %v1697_v0  ;;  %v1548_v7 = vpack.c.bf16 %v1730_v5, %v1729_v1 }
  0xf8   :  { %v533_v8 = vpop.f32.mrf.mxu0  ;;  %v661_v9 = vpop.f32.mrf.mxu1 }
  0xf9   :  { %1604 = vst [vmem:[%s2040_s2 + $0x28] sm:$0xff] %v1468_v6   ;;  %1620 = vst [vmem:[%s2040_s2 + $0xa8] sm:$0xff] %v1548_v7   ;;  %v1463_v10 = vpack.c.bf16 %v533_v8, %v530_v2  ;;  %v1543_v11 = vpack.c.bf16 %v661_v9, %v658_v3 }
  0xfa   :  { %v1701_v12 = vpop.f32.mrf.mxu0  ;;  %v1733_v13 = vpop.f32.mrf.mxu1 }
  0xfb   :  { %1603 = vst [vmem:[%s2040_s2 + $0x20] sm:$0xff] %v1463_v10   ;;  %1619 = vst [vmem:[%s2040_s2 + $0xa0] sm:$0xff] %v1543_v11  }
  0xfc   :  { %v546_v14 = vpop.f32.mrf.mxu0  ;;  %v674_v15 = vpop.f32.mrf.mxu1 }
  0xfe   :  { %v1702_v16 = vpop.f32.mrf.mxu0  ;;  %v1734_v17 = vpop.f32.mrf.mxu1 }
  0xff   :  { %v1478_v18 = vpack.c.bf16 %v1702_v16, %v1701_v12  ;;  %v1558_v19 = vpack.c.bf16 %v1734_v17, %v1733_v13 }
 0x100   :  { %v549_v20 = vpop.f32.mrf.mxu0  ;;  %v677_v21 = vpop.f32.mrf.mxu1 }
 0x101   :  { %1606 = vst [vmem:[%s2040_s2 + $0x38] sm:$0xff] %v1478_v18   ;;  %1622 = vst [vmem:[%s2040_s2 + $0xb8] sm:$0xff] %v1558_v19   ;;  %v1473_v22 = vpack.c.bf16 %v549_v20, %v546_v14  ;;  %v1553_v23 = vpack.c.bf16 %v677_v21, %v674_v15 }
 0x102   :  { %v1705_v24 = vpop.f32.mrf.mxu0  ;;  %v1737_v25 = vpop.f32.mrf.mxu1 }
 0x103   :  { %1605 = vst [vmem:[%s2040_s2 + $0x30] sm:$0xff] %v1473_v22   ;;  %1621 = vst [vmem:[%s2040_s2 + $0xb0] sm:$0xff] %v1553_v23  }
 0x104   :  { %v562_v26 = vpop.f32.mrf.mxu0  ;;  %v690_v27 = vpop.f32.mrf.mxu1 }
 0x106   :  { %v1706_v28 = vpop.f32.mrf.mxu0  ;;  %v1738_v29 = vpop.f32.mrf.mxu1 }
 0x107   :  { %v1488_v30 = vpack.c.bf16 %v1706_v28, %v1705_v24  ;;  %v1568_v31 = vpack.c.bf16 %v1738_v29, %v1737_v25 }
 0x108   :  { %v565_v32 = vpop.f32.mrf.mxu0  ;;  %v693_v33 = vpop.f32.mrf.mxu1 }
 0x109   :  { %1608 = vst [vmem:[%s2040_s2 + $0x48] sm:$0xff] %v1488_v30   ;;  %1624 = vst [vmem:[%s2040_s2 + $0xc8] sm:$0xff] %v1568_v31   ;;  %v1483_v34 = vpack.c.bf16 %v565_v32, %v562_v26  ;;  %v1563_v35 = vpack.c.bf16 %v693_v33, %v690_v27 }
 0x10a   :  { %v1709_v36 = vpop.f32.mrf.mxu0  ;;  %v1741_v37 = vpop.f32.mrf.mxu1 }
 0x10b   :  { %1607 = vst [vmem:[%s2040_s2 + $0x40] sm:$0xff] %v1483_v34   ;;  %1623 = vst [vmem:[%s2040_s2 + $0xc0] sm:$0xff] %v1563_v35  }
 0x10c   :  { %v578_v38 = vpop.f32.mrf.mxu0  ;;  %v706_v39 = vpop.f32.mrf.mxu1 }
 0x10e   :  { %v1710_v40 = vpop.f32.mrf.mxu0  ;;  %v1742_v41 = vpop.f32.mrf.mxu1 }
 0x10f   :  { %v1498_v42 = vpack.c.bf16 %v1710_v40, %v1709_v36  ;;  %v1578_v43 = vpack.c.bf16 %v1742_v41, %v1741_v37 }
 0x110   :  { %v581_v44 = vpop.f32.mrf.mxu0  ;;  %v709_v45 = vpop.f32.mrf.mxu1 }
 0x111   :  { %1610 = vst [vmem:[%s2040_s2 + $0x58] sm:$0xff] %v1498_v42   ;;  %1626 = vst [vmem:[%s2040_s2 + $0xd8] sm:$0xff] %v1578_v43   ;;  %v1493_v46 = vpack.c.bf16 %v581_v44, %v578_v38  ;;  %v1573_v47 = vpack.c.bf16 %v709_v45, %v706_v39 }
 0x112   :  { %v1713_v48 = vpop.f32.mrf.mxu0  ;;  %v1745_v49 = vpop.f32.mrf.mxu1 }
 0x113   :  { %1609 = vst [vmem:[%s2040_s2 + $0x50] sm:$0xff] %v1493_v46   ;;  %1625 = vst [vmem:[%s2040_s2 + $0xd0] sm:$0xff] %v1573_v47  }
 0x114   :  { %v594_v50 = vpop.f32.mrf.mxu0  ;;  %v722_v51 = vpop.f32.mrf.mxu1 }
 0x116   :  { %v1714_v52 = vpop.f32.mrf.mxu0  ;;  %v1746_v53 = vpop.f32.mrf.mxu1 }
 0x117   :  { %v1508_v54 = vpack.c.bf16 %v1714_v52, %v1713_v48  ;;  %v1588_v55 = vpack.c.bf16 %v1746_v53, %v1745_v49 }
 0x118   :  { %v597_v56 = vpop.f32.mrf.mxu0  ;;  %v725_v57 = vpop.f32.mrf.mxu1 }
 0x119   :  { %1612 = vst [vmem:[%s2040_s2 + $0x68] sm:$0xff] %v1508_v54   ;;  %1628 = vst [vmem:[%s2040_s2 + $0xe8] sm:$0xff] %v1588_v55   ;;  %v1503_v58 = vpack.c.bf16 %v597_v56, %v594_v50  ;;  %v1583_v59 = vpack.c.bf16 %v725_v57, %v722_v51 }
 0x11a   :  { %v1717_v60 = vpop.f32.mrf.mxu0  ;;  %v1749_v61 = vpop.f32.mrf.mxu1 }
 0x11b   :  { %1611 = vst [vmem:[%s2040_s2 + $0x60] sm:$0xff] %v1503_v58   ;;  %1627 = vst [vmem:[%s2040_s2 + $0xe0] sm:$0xff] %v1583_v59  }
 0x11c   :  { %v610_v62 = vpop.f32.mrf.mxu0  ;;  %v738_v63 = vpop.f32.mrf.mxu1 }
 0x11e   :  { %v1718_v0 = vpop.f32.mrf.mxu0  ;;  %v1750_v1 = vpop.f32.mrf.mxu1 }
 0x11f   :  { %v1518_v2 = vpack.c.bf16 %v1718_v0, %v1717_v60  ;;  %v1598_v3 = vpack.c.bf16 %v1750_v1, %v1749_v61 }
 0x120   :  { %v613_v4 = vpop.f32.mrf.mxu0  ;;  %v741_v5 = vpop.f32.mrf.mxu1 }
 0x121   :  { %1614 = vst [vmem:[%s2040_s2 + $0x78] sm:$0xff] %v1518_v2   ;;  %1630 = vst [vmem:[%s2040_s2 + $0xf8] sm:$0xff] %v1598_v3   ;;  %v1513_v6 = vpack.c.bf16 %v613_v4, %v610_v62  ;;  %v1593_v7 = vpack.c.bf16 %v741_v5, %v738_v63 }
 0x123   :  { %1613 = vst [vmem:[%s2040_s2 + $0x70] sm:$0xff] %v1513_v6   ;;  %1629 = vst [vmem:[%s2040_s2 + $0xf0] sm:$0xff] %v1593_v7  }

// kernel: _gcn_forward.7
= control target key start
LH: loop header
LB: loop body
LE: loop exit
PB: predicated region body
PF: predicated region fallthrough
CT: control target
= control target key end

     0   :  { %v2471_v0 = vmov 0   ;;  %s3261_s1 = inlined_call_operand.vmem [shape: bf16[512,128], index: 1, kind: input, shape index: {}]   ;;  %s3262_s0 = inlined_call_operand.vmem [shape: bf16[512,512], index: 0, kind: input, shape index: {}]   ;;  %s3263_s2 = inlined_call_operand.vmem [shape: f32[1,128], index: 2, kind: input, shape index: {}]   ;;  %s3264_s3 = inlined_call_operand.vmem [shape: f32[512,128], index: 3, kind: output, shape index: {}]  }
   0x1   :  { %1171 = vmatprep.subr.bf16.mxu0 %v2471_v0  ;;  %1460 = vmatprep.subr.bf16.mxu1 %v2471_v0  ;;  %v2246_v1 = vld [vmem:[%s3261_s1 + $0x38] sm:$0xff]   ;;  %v2248_v3 = vld [vmem:[%s3261_s1 + $0x30] sm:$0xff]   ;;  %v2250_v5 = vld [vmem:[%s3261_s1 + $0x28] sm:$0xff]  }
   0x2   :  { %v2247_v2 = vld [vmem:[%s3261_s1 + $0xb8] sm:$0xff]   ;;  %1172 = vmatpush1.bf16.msra.mxu0 %v2246_v1  ;;  %v2249_v4 = vld [vmem:[%s3261_s1 + $0xb0] sm:$0xff]   ;;  %v2251_v6 = vld [vmem:[%s3261_s1 + $0xa8] sm:$0xff]  }
   0x3   :  { %1461 = vmatpush1.bf16.msra.mxu1 %v2247_v2  ;;  %1173 = vmatprep.subr.bf16.mxu0 %v2471_v0  ;;  %v2252_v7 = vld [vmem:[%s3261_s1 + $0x20] sm:$0xff]   ;;  %v2254_v9 = vld [vmem:[%s3261_s1 + $0x18] sm:$0xff]   ;;  %v2256_v11 = vld [vmem:[%s3261_s1 + $0x10] sm:$0xff]  }
   0x4   :  { %1462 = vmatprep.subr.bf16.mxu1 %v2471_v0  ;;  %v2253_v8 = vld [vmem:[%s3261_s1 + $0xa0] sm:$0xff]   ;;  %v2255_v10 = vld [vmem:[%s3261_s1 + $0x98] sm:$0xff]   ;;  %v2257_v12 = vld [vmem:[%s3261_s1 + $0x90] sm:$0xff]  }
   0x5   :  { %v2258_v13 = vld [vmem:[%s3261_s1 + $0x8] sm:$0xff]   ;;  %v2260_v15 = vld [vmem:[%s3261_s1] sm:$0xff]   ;;  %v2262_v17 = vld [vmem:[%s3261_s1 + $0x78] sm:$0xff]  }
   0x6   :  { %1174 = vmatpush1.bf16.msra.mxu0 %v2248_v3  ;;  %v2259_v14 = vld [vmem:[%s3261_s1 + $0x88] sm:$0xff]   ;;  %v2261_v16 = vld [vmem:[%s3261_s1 + $0x80] sm:$0xff]   ;;  %v2263_v18 = vld [vmem:[%s3261_s1 + $0xf8] sm:$0xff]  }
   0x7   :  { %1463 = vmatpush1.bf16.msra.mxu1 %v2249_v4  ;;  %1175 = vmatprep.subr.bf16.mxu0 %v2471_v0  ;;  %v2280_v19 = vld [vmem:[%s3262_s0 + $0x4] ss:$16 sps:$4 sm:$0xff]   ;;  %v2283_v21 = vld [vmem:[%s3262_s0 + $0xc] ss:$16 sps:$4 sm:$0xff]   ;;  %v2278_v35 = vld [vmem:[%s3262_s0] ss:$16 sps:$4 sm:$0xff]  }
   0x8   :  { %1464 = vmatprep.subr.bf16.mxu1 %v2471_v0  ;;  %v2264_v20 = vld [vmem:[%s3261_s1 + $0x70] sm:$0xff]   ;;  %1203 = vmatprep.mubr.bf16.mxu0 %v2280_v19  ;;  %v2266_v23 = vld [vmem:[%s3261_s1 + $0x68] sm:$0xff]   ;;  %v2268_v25 = vld [vmem:[%s3261_s1 + $0x60] sm:$0xff]  }
   0x9   :  { %v2265_v22 = vld [vmem:[%s3261_s1 + $0xf0] sm:$0xff]   ;;  %1492 = vmatprep.mubr.bf16.mxu1 %v2283_v21  ;;  %v2267_v24 = vld [vmem:[%s3261_s1 + $0xe8] sm:$0xff]   ;;  %v2269_v26 = vld [vmem:[%s3261_s1 + $0xe0] sm:$0xff]  }
   0xa   :  { %1176 = vmatpush1.bf16.msra.mxu0 %v2250_v5  ;;  %v2270_v27 = vld [vmem:[%s3261_s1 + $0x58] sm:$0xff]   ;;  %v2272_v29 = vld [vmem:[%s3261_s1 + $0x50] sm:$0xff]   ;;  %v2274_v31 = vld [vmem:[%s3261_s1 + $0x48] sm:$0xff]  }
   0xb   :  { %1465 = vmatpush1.bf16.msra.mxu1 %v2251_v6  ;;  %1177 = vmatprep.subr.bf16.mxu0 %v2471_v0  ;;  %v2271_v28 = vld [vmem:[%s3261_s1 + $0xd8] sm:$0xff]   ;;  %v2273_v30 = vld [vmem:[%s3261_s1 + $0xd0] sm:$0xff]   ;;  %v2275_v32 = vld [vmem:[%s3261_s1 + $0xc8] sm:$0xff]  }
   0xc   :  { %1466 = vmatprep.subr.bf16.mxu1 %v2471_v0  ;;  %v2276_v33 = vld [vmem:[%s3261_s1 + $0x40] sm:$0xff]   ;;  %v2281_v36 = vld [vmem:[%s3262_s0 + $0x8] ss:$16 sps:$4 sm:$0xff]   ;;  %v2286_v38 = vld [vmem:[%s3262_s0 + $0x2c] ss:$16 sps:$4 sm:$0xff]  }
   0xd   :  { %v2277_v34 = vld [vmem:[%s3261_s1 + $0xc0] sm:$0xff]   ;;  %v2289_v40 = vld [vmem:[%s3262_s0 + $0x28] ss:$16 sps:$4 sm:$0xff]   ;;  %v2292_v42 = vld [vmem:[%s3262_s0 + $0x4c] ss:$16 sps:$4 sm:$0xff]  }
   0xe   :  { %1178 = vmatpush1.bf16.msra.mxu0 %v2252_v7  ;;  %v2284_v37 = vld [vmem:[%s3262_s0 + $0x24] ss:$16 sps:$4 sm:$0xff]   ;;  %v2288_v39 = vld [vmem:[%s3262_s0 + $0x20] ss:$16 sps:$4 sm:$0xff]   ;;  %v2295_v44 = vld [vmem:[%s3262_s0 + $0x48] ss:$16 sps:$4 sm:$0xff]  }
   0xf   :  { %1467 = vmatpush1.bf16.msra.mxu1 %v2253_v8  ;;  %1179 = vmatprep.subr.bf16.mxu0 %v2471_v0  ;;  %v2290_v41 = vld [vmem:[%s3262_s0 + $0x44] ss:$16 sps:$4 sm:$0xff]   ;;  %v2294_v43 = vld [vmem:[%s3262_s0 + $0x40] ss:$16 sps:$4 sm:$0xff]   ;;  %v2298_v46 = vld [vmem:[%s3262_s0 + $0x6c] ss:$16 sps:$4 sm:$0xff]  }
  0x10   :  { %1468 = vmatprep.subr.bf16.mxu1 %v2471_v0  ;;  %v2296_v45 = vld [vmem:[%s3262_s0 + $0x64] ss:$16 sps:$4 sm:$0xff]   ;;  %v2300_v47 = vld [vmem:[%s3262_s0 + $0x60] ss:$16 sps:$4 sm:$0xff]   ;;  %v2301_v48 = vld [vmem:[%s3262_s0 + $0x68] ss:$16 sps:$4 sm:$0xff]  }
  0x11   :  { %v2302_v49 = vld [vmem:[%s3262_s0 + $0x84] ss:$16 sps:$4 sm:$0xff]   ;;  %v2304_v50 = vld [vmem:[%s3262_s0 + $0x8c] ss:$16 sps:$4 sm:$0xff]   ;;  %v2306_v51 = vld [vmem:[%s3262_s0 + $0x80] ss:$16 sps:$4 sm:$0xff]  }
  0x12   :  { %1180 = vmatpush1.bf16.msra.mxu0 %v2254_v9  ;;  %v2307_v52 = vld [vmem:[%s3262_s0 + $0x88] ss:$16 sps:$4 sm:$0xff]   ;;  %v2308_v53 = vld [vmem:[%s3262_s0 + $0xa4] ss:$16 sps:$4 sm:$0xff]   ;;  %v2310_v54 = vld [vmem:[%s3262_s0 + $0xac] ss:$16 sps:$4 sm:$0xff]  }
  0x13   :  { %1469 = vmatpush1.bf16.msra.mxu1 %v2255_v10  ;;  %1181 = vmatprep.subr.bf16.mxu0 %v2471_v0  ;;  %v2312_v55 = vld [vmem:[%s3262_s0 + $0xa0] ss:$16 sps:$4 sm:$0xff]   ;;  %v2313_v56 = vld [vmem:[%s3262_s0 + $0xa8] ss:$16 sps:$4 sm:$0xff]   ;;  %v2314_v57 = vld [vmem:[%s3262_s0 + $0xc4] ss:$16 sps:$4 sm:$0xff]  }
  0x14   :  { %1470 = vmatprep.subr.bf16.mxu1 %v2471_v0  ;;  %v2316_v58 = vld [vmem:[%s3262_s0 + $0xcc] ss:$16 sps:$4 sm:$0xff]   ;;  %v2318_v59 = vld [vmem:[%s3262_s0 + $0xc0] ss:$16 sps:$4 sm:$0xff]   ;;  %v2319_v60 = vld [vmem:[%s3262_s0 + $0xc8] ss:$16 sps:$4 sm:$0xff]  }
  0x15   :  { %v2320_v61 = vld [vmem:[%s3262_s0 + $0xe4] ss:$16 sps:$4 sm:$0xff]   ;;  %v2322_v62 = vld [vmem:[%s3262_s0 + $0xec] ss:$16 sps:$4 sm:$0xff]   ;;  %v2324_v63 = vld [vmem:[%s3262_s0 + $0xe0] ss:$16 sps:$4 sm:$0xff]  }
  0x16   :  { %1182 = vmatpush1.bf16.msra.mxu0 %v2256_v11  ;;  %v2326_v1 = vld [vmem:[%s3262_s0 + $0x104] ss:$16 sps:$4 sm:$0xff]   ;;  %v2328_v2 = vld [vmem:[%s3262_s0 + $0x10c] ss:$16 sps:$4 sm:$0xff]   ;;  %v2330_v3 = vld [vmem:[%s3262_s0 + $0x100] ss:$16 sps:$4 sm:$0xff]  }
  0x17   :  { %1471 = vmatpush1.bf16.msra.mxu1 %v2257_v12  ;;  %1183 = vmatprep.subr.bf16.mxu0 %v2471_v0  ;;  %v2331_v4 = vld [vmem:[%s3262_s0 + $0x108] ss:$16 sps:$4 sm:$0xff]   ;;  %v2332_v5 = vld [vmem:[%s3262_s0 + $0x124] ss:$16 sps:$4 sm:$0xff]   ;;  %v2334_v6 = vld [vmem:[%s3262_s0 + $0x12c] ss:$16 sps:$4 sm:$0xff]  }
  0x18   :  { %1472 = vmatprep.subr.bf16.mxu1 %v2471_v0  ;;  %v2336_v7 = vld [vmem:[%s3262_s0 + $0x120] ss:$16 sps:$4 sm:$0xff]   ;;  %v2337_v8 = vld [vmem:[%s3262_s0 + $0x128] ss:$16 sps:$4 sm:$0xff]   ;;  %v2338_v9 = vld [vmem:[%s3262_s0 + $0x144] ss:$16 sps:$4 sm:$0xff]  }
  0x19   :  { %v2340_v10 = vld [vmem:[%s3262_s0 + $0x14c] ss:$16 sps:$4 sm:$0xff]   ;;  %v2342_v11 = vld [vmem:[%s3262_s0 + $0x140] ss:$16 sps:$4 sm:$0xff]   ;;  %v2343_v12 = vld [vmem:[%s3262_s0 + $0x148] ss:$16 sps:$4 sm:$0xff]  }
  0x1a   :  { %1184 = vmatpush1.bf16.msra.mxu0 %v2258_v13  ;;  %v2344_v13 = vld [vmem:[%s3262_s0 + $0x164] ss:$16 sps:$4 sm:$0xff]   ;;  %v2354_v19 = vld [vmem:[%s3262_s0 + $0x180] ss:$16 sps:$4 sm:$0xff]  }
  0x1b   :  { %1473 = vmatpush1.bf16.msra.mxu1 %v2259_v14  ;;  %1185 = vmatprep.subr.bf16.mxu0 %v2471_v0  ;;  %v2346_v14 = vld [vmem:[%s3262_s0 + $0x16c] ss:$16 sps:$4 sm:$0xff]   ;;  %v2356_v21 = vld [vmem:[%s3262_s0 + $0x1a4] ss:$16 sps:$4 sm:$0xff]  }
  0x1c   :  { %1474 = vmatprep.subr.bf16.mxu1 %v2471_v0 }
  0x1e   :  { %1186 = vmatpush1.bf16.msra.mxu0 %v2260_v15  ;;  %v2348_v15 = vld [vmem:[%s3262_s0 + $0x160] ss:$16 sps:$4 sm:$0xff]  }
  0x1f   :  { %1475 = vmatpush1.bf16.msra.mxu1 %v2261_v16  ;;  %1187 = vmatprep.subr.bf16.mxu0 %v2471_v0  ;;  %v2349_v16 = vld [vmem:[%s3262_s0 + $0x168] ss:$16 sps:$4 sm:$0xff]  }
  0x20   :  { %1476 = vmatprep.subr.bf16.mxu1 %v2471_v0 }
  0x22   :  { %1188 = vmatpush2.bf16.msra.mxu0 %v2262_v17  ;;  %v2350_v17 = vld [vmem:[%s3262_s0 + $0x184] ss:$16 sps:$4 sm:$0xff]  }
  0x23   :  { %1477 = vmatpush2.bf16.msra.mxu1 %v2263_v18  ;;  %1189 = vmatprep.subr.bf16.mxu0 %v2471_v0  ;;  %v2352_v18 = vld [vmem:[%s3262_s0 + $0x18c] ss:$16 sps:$4 sm:$0xff]  }
  0x24   :  { %1478 = vmatprep.subr.bf16.mxu1 %v2471_v0 }
  0x26   :  { %1190 = vmatpush2.bf16.msra.mxu0 %v2264_v20  ;;  %v2355_v20 = vld [vmem:[%s3262_s0 + $0x188] ss:$16 sps:$4 sm:$0xff]  }
  0x27   :  { %1479 = vmatpush2.bf16.msra.mxu1 %v2265_v22  ;;  %1191 = vmatprep.subr.bf16.mxu0 %v2471_v0  ;;  %v2358_v22 = vld [vmem:[%s3262_s0 + $0x1ac] ss:$16 sps:$4 sm:$0xff]  }
  0x28   :  { %1480 = vmatprep.subr.bf16.mxu1 %v2471_v0 }
  0x2a   :  { %1192 = vmatpush2.bf16.msra.mxu0 %v2266_v23  ;;  %v2360_v23 = vld [vmem:[%s3262_s0 + $0x1a0] ss:$16 sps:$4 sm:$0xff]  }
  0x2b   :  { %1481 = vmatpush2.bf16.msra.mxu1 %v2267_v24  ;;  %1193 = vmatprep.subr.bf16.mxu0 %v2471_v0  ;;  %v2361_v24 = vld [vmem:[%s3262_s0 + $0x1a8] ss:$16 sps:$4 sm:$0xff]  }
  0x2c   :  { %1482 = vmatprep.subr.bf16.mxu1 %v2471_v0 }
  0x2e   :  { %1194 = vmatpush2.bf16.msra.mxu0 %v2268_v25  ;;  %v2362_v25 = vld [vmem:[%s3262_s0 + $0x1c4] ss:$16 sps:$4 sm:$0xff]  }
  0x2f   :  { %1483 = vmatpush2.bf16.msra.mxu1 %v2269_v26  ;;  %1195 = vmatprep.subr.bf16.mxu0 %v2471_v0  ;;  %v2364_v26 = vld [vmem:[%s3262_s0 + $0x1cc] ss:$16 sps:$4 sm:$0xff]  }
  0x30   :  { %1484 = vmatprep.subr.bf16.mxu1 %v2471_v0 }
  0x32   :  { %1196 = vmatpush2.bf16.msra.mxu0 %v2270_v27  ;;  %v2366_v27 = vld [vmem:[%s3262_s0 + $0x1c0] ss:$16 sps:$4 sm:$0xff]  }
  0x33   :  { %1485 = vmatpush2.bf16.msra.mxu1 %v2271_v28  ;;  %1197 = vmatprep.subr.bf16.mxu0 %v2471_v0  ;;  %v2367_v28 = vld [vmem:[%s3262_s0 + $0x1c8] ss:$16 sps:$4 sm:$0xff]  }
  0x34   :  { %1486 = vmatprep.subr.bf16.mxu1 %v2471_v0 }
  0x36   :  { %1198 = vmatpush2.bf16.msra.mxu0 %v2272_v29  ;;  %v2368_v29 = vld [vmem:[%s3262_s0 + $0x1e4] ss:$16 sps:$4 sm:$0xff]  }
  0x37   :  { %1487 = vmatpush2.bf16.msra.mxu1 %v2273_v30  ;;  %1199 = vmatprep.subr.bf16.mxu0 %v2471_v0  ;;  %v2370_v30 = vld [vmem:[%s3262_s0 + $0x1ec] ss:$16 sps:$4 sm:$0xff]  }
  0x38   :  { %1488 = vmatprep.subr.bf16.mxu1 %v2471_v0 }
  0x3a   :  { %1200 = vmatpush2.bf16.msra.mxu0 %v2274_v31  ;;  %v2372_v31 = vld [vmem:[%s3262_s0 + $0x1e0] ss:$16 sps:$4 sm:$0xff]  }
  0x3b   :  { %1489 = vmatpush2.bf16.msra.mxu1 %v2275_v32  ;;  %1201 = vmatprep.subr.bf16.mxu0 %v2471_v0  ;;  %v2373_v32 = vld [vmem:[%s3262_s0 + $0x1e8] ss:$16 sps:$4 sm:$0xff]  }
  0x3c   :  { %1490 = vmatprep.subr.bf16.mxu1 %v2471_v0  ;;  %v2325_v0 = vld [vmem:[%s3262_s0 + $0xe8] ss:$16 sps:$4 sm:$0xff]  }
  0x3e   :  { %1202 = vmatpush2.bf16.msra.mxu0 %v2276_v33  ;;  %v2374_v33 = vld [vmem:[%s3262_s0 + $0x204] ss:$16 sps:$4 sm:$0xff]  }
  0x3f   :  { %1491 = vmatpush2.bf16.msra.mxu1 %v2277_v34  ;;  %v2376_v34 = vld [vmem:[%s3262_s0 + $0x20c] ss:$16 sps:$4 sm:$0xff]  }
  0x41   :  { %1204 = vmatmul.mubr.bf16.vlgmr.msra.gmra.mxu0 %v2278_v35  ;;  %v2378_v35 = vld [vmem:[%s3262_s0 + $0x200] ss:$16 sps:$4 sm:$0xff]  }
  0x42   :  { %1493 = vmatmul.mubr.bf16.vlgmr.msra.gmra.mxu1 %v2281_v36  ;;  %1211 = vmatprep.mubr.bf16.mxu0 %v2284_v37  ;;  %v2379_v36 = vld [vmem:[%s3262_s0 + $0x208] ss:$16 sps:$4 sm:$0xff]   ;;  %v2380_v37 = vld [vmem:[%s3262_s0 + $0x224] ss:$16 sps:$4 sm:$0xff]  }
  0x43   :  { %1500 = vmatprep.mubr.bf16.mxu1 %v2286_v38  ;;  %v2382_v38 = vld [vmem:[%s3262_s0 + $0x22c] ss:$16 sps:$4 sm:$0xff]  }
  0x49   :  { %1212 = vmatmul.mubr.bf16.gmra.mxu0 %v2288_v39  ;;  %v2384_v39 = vld [vmem:[%s3262_s0 + $0x220] ss:$16 sps:$4 sm:$0xff]  }
  0x4a   :  { %1501 = vmatmul.mubr.bf16.gmra.mxu1 %v2289_v40  ;;  %1219 = vmatprep.mubr.bf16.mxu0 %v2290_v41  ;;  %v2385_v40 = vld [vmem:[%s3262_s0 + $0x228] ss:$16 sps:$4 sm:$0xff]   ;;  %v2386_v41 = vld [vmem:[%s3262_s0 + $0x244] ss:$16 sps:$4 sm:$0xff]  }
  0x4b   :  { %1508 = vmatprep.mubr.bf16.mxu1 %v2292_v42  ;;  %v2388_v42 = vld [vmem:[%s3262_s0 + $0x24c] ss:$16 sps:$4 sm:$0xff]  }
  0x51   :  { %1220 = vmatmul.mubr.bf16.gmra.mxu0 %v2294_v43  ;;  %v2390_v43 = vld [vmem:[%s3262_s0 + $0x240] ss:$16 sps:$4 sm:$0xff]  }
  0x52   :  { %1509 = vmatmul.mubr.bf16.gmra.mxu1 %v2295_v44  ;;  %1227 = vmatprep.mubr.bf16.mxu0 %v2296_v45  ;;  %v2391_v44 = vld [vmem:[%s3262_s0 + $0x248] ss:$16 sps:$4 sm:$0xff]   ;;  %v2392_v45 = vld [vmem:[%s3262_s0 + $0x264] ss:$16 sps:$4 sm:$0xff]  }
  0x53   :  { %1516 = vmatprep.mubr.bf16.mxu1 %v2298_v46  ;;  %v2394_v46 = vld [vmem:[%s3262_s0 + $0x26c] ss:$16 sps:$4 sm:$0xff]  }
  0x59   :  { %1228 = vmatmul.mubr.bf16.gmra.mxu0 %v2300_v47  ;;  %v2396_v47 = vld [vmem:[%s3262_s0 + $0x260] ss:$16 sps:$4 sm:$0xff]  }
  0x5a   :  { %1517 = vmatmul.mubr.bf16.gmra.mxu1 %v2301_v48  ;;  %1235 = vmatprep.mubr.bf16.mxu0 %v2302_v49  ;;  %v2397_v48 = vld [vmem:[%s3262_s0 + $0x268] ss:$16 sps:$4 sm:$0xff]   ;;  %v2398_v49 = vld [vmem:[%s3262_s0 + $0x284] ss:$16 sps:$4 sm:$0xff]  }
  0x5b   :  { %1524 = vmatprep.mubr.bf16.mxu1 %v2304_v50  ;;  %v2400_v50 = vld [vmem:[%s3262_s0 + $0x28c] ss:$16 sps:$4 sm:$0xff]  }
  0x61   :  { %1236 = vmatmul.mubr.bf16.gmra.mxu0 %v2306_v51  ;;  %v2402_v51 = vld [vmem:[%s3262_s0 + $0x280] ss:$16 sps:$4 sm:$0xff]  }
  0x62   :  { %1525 = vmatmul.mubr.bf16.gmra.mxu1 %v2307_v52  ;;  %1243 = vmatprep.mubr.bf16.mxu0 %v2308_v53  ;;  %v2403_v52 = vld [vmem:[%s3262_s0 + $0x288] ss:$16 sps:$4 sm:$0xff]   ;;  %v2404_v53 = vld [vmem:[%s3262_s0 + $0x2a4] ss:$16 sps:$4 sm:$0xff]  }
  0x63   :  { %1532 = vmatprep.mubr.bf16.mxu1 %v2310_v54  ;;  %v2406_v54 = vld [vmem:[%s3262_s0 + $0x2ac] ss:$16 sps:$4 sm:$0xff]  }
  0x69   :  { %1244 = vmatmul.mubr.bf16.gmra.mxu0 %v2312_v55  ;;  %v2408_v55 = vld [vmem:[%s3262_s0 + $0x2a0] ss:$16 sps:$4 sm:$0xff]  }
  0x6a   :  { %1533 = vmatmul.mubr.bf16.gmra.mxu1 %v2313_v56  ;;  %1251 = vmatprep.mubr.bf16.mxu0 %v2314_v57  ;;  %v2409_v56 = vld [vmem:[%s3262_s0 + $0x2a8] ss:$16 sps:$4 sm:$0xff]   ;;  %v2410_v57 = vld [vmem:[%s3262_s0 + $0x2c4] ss:$16 sps:$4 sm:$0xff]  }
  0x6b   :  { %1540 = vmatprep.mubr.bf16.mxu1 %v2316_v58  ;;  %v2412_v58 = vld [vmem:[%s3262_s0 + $0x2cc] ss:$16 sps:$4 sm:$0xff]  }
  0x71   :  { %1252 = vmatmul.mubr.bf16.gmra.mxu0 %v2318_v59  ;;  %v2414_v59 = vld [vmem:[%s3262_s0 + $0x2c0] ss:$16 sps:$4 sm:$0xff]  }
  0x72   :  { %1541 = vmatmul.mubr.bf16.gmra.mxu1 %v2319_v60  ;;  %1259 = vmatprep.mubr.bf16.mxu0 %v2320_v61  ;;  %v2415_v60 = vld [vmem:[%s3262_s0 + $0x2c8] ss:$16 sps:$4 sm:$0xff]   ;;  %v2416_v61 = vld [vmem:[%s3262_s0 + $0x2e4] ss:$16 sps:$4 sm:$0xff]  }
  0x73   :  { %1548 = vmatprep.mubr.bf16.mxu1 %v2322_v62  ;;  %v2418_v62 = vld [vmem:[%s3262_s0 + $0x2ec] ss:$16 sps:$4 sm:$0xff]  }
  0x79   :  { %1260 = vmatmul.mubr.bf16.gmra.mxu0 %v2324_v63  ;;  %v2420_v63 = vld [vmem:[%s3262_s0 + $0x2e0] ss:$16 sps:$4 sm:$0xff]  }
  0x7a   :  { %1549 = vmatmul.mubr.bf16.gmra.mxu1 %v2325_v0  ;;  %1267 = vmatprep.mubr.bf16.mxu0 %v2326_v1  ;;  %v2421_v0 = vld [vmem:[%s3262_s0 + $0x2e8] ss:$16 sps:$4 sm:$0xff]   ;;  %v2422_v1 = vld [vmem:[%s3262_s0 + $0x304] ss:$16 sps:$4 sm:$0xff]  }
  0x7b   :  { %1556 = vmatprep.mubr.bf16.mxu1 %v2328_v2  ;;  %v2424_v2 = vld [vmem:[%s3262_s0 + $0x30c] ss:$16 sps:$4 sm:$0xff]  }
  0x81   :  { %1268 = vmatmul.mubr.bf16.gmra.mxu0 %v2330_v3  ;;  %v2426_v3 = vld [vmem:[%s3262_s0 + $0x300] ss:$16 sps:$4 sm:$0xff]  }
  0x82   :  { %1557 = vmatmul.mubr.bf16.gmra.mxu1 %v2331_v4  ;;  %1275 = vmatprep.mubr.bf16.mxu0 %v2332_v5  ;;  %v2427_v4 = vld [vmem:[%s3262_s0 + $0x308] ss:$16 sps:$4 sm:$0xff]   ;;  %v2428_v5 = vld [vmem:[%s3262_s0 + $0x324] ss:$16 sps:$4 sm:$0xff]  }
  0x83   :  { %1564 = vmatprep.mubr.bf16.mxu1 %v2334_v6  ;;  %v2430_v6 = vld [vmem:[%s3262_s0 + $0x32c] ss:$16 sps:$4 sm:$0xff]  }
  0x89   :  { %1276 = vmatmul.mubr.bf16.gmra.mxu0 %v2336_v7 }
  0x8a   :  { %1565 = vmatmul.mubr.bf16.gmra.mxu1 %v2337_v8  ;;  %1283 = vmatprep.mubr.bf16.mxu0 %v2338_v9 }
  0x8b   :  { %1572 = vmatprep.mubr.bf16.mxu1 %v2340_v10 }
  0x91   :  { %1284 = vmatmul.mubr.bf16.gmra.mxu0 %v2342_v11  ;;  %v2929_v11 = vld [vmem:[%s3263_s2] ss:$0 sm:$0xff] }
  0x92   :  { %1573 = vmatmul.mubr.bf16.gmra.mxu1 %v2343_v12  ;;  %1291 = vmatprep.mubr.bf16.mxu0 %v2344_v13 }
  0x93   :  { %1580 = vmatprep.mubr.bf16.mxu1 %v2346_v14  ;;  %v2432_v14 = vld [vmem:[%s3262_s0 + $0x320] ss:$16 sps:$4 sm:$0xff]  }
  0x99   :  { %1292 = vmatmul.mubr.bf16.gmra.mxu0 %v2348_v15 }
  0x9a   :  { %1581 = vmatmul.mubr.bf16.gmra.mxu1 %v2349_v16  ;;  %1299 = vmatprep.mubr.bf16.mxu0 %v2350_v17  ;;  %v2433_v16 = vld [vmem:[%s3262_s0 + $0x328] ss:$16 sps:$4 sm:$0xff]   ;;  %v2434_v17 = vld [vmem:[%s3262_s0 + $0x344] ss:$16 sps:$4 sm:$0xff]  }
  0x9b   :  { %1588 = vmatprep.mubr.bf16.mxu1 %v2352_v18 }
  0xa1   :  { %1300 = vmatmul.mubr.bf16.gmra.mxu0 %v2354_v19 }
  0xa2   :  { %1589 = vmatmul.mubr.bf16.gmra.mxu1 %v2355_v20  ;;  %1307 = vmatprep.mubr.bf16.mxu0 %v2356_v21  ;;  %v2436_v21 = vld [vmem:[%s3262_s0 + $0x34c] ss:$16 sps:$4 sm:$0xff]  }
  0xa3   :  { %1596 = vmatprep.mubr.bf16.mxu1 %v2358_v22 }
  0xa9   :  { %1308 = vmatmul.mubr.bf16.gmra.mxu0 %v2360_v23 }
  0xaa   :  { %1597 = vmatmul.mubr.bf16.gmra.mxu1 %v2361_v24  ;;  %1315 = vmatprep.mubr.bf16.mxu0 %v2362_v25 }
  0xab   :  { %1604 = vmatprep.mubr.bf16.mxu1 %v2364_v26 }
  0xb1   :  { %1316 = vmatmul.mubr.bf16.gmra.mxu0 %v2366_v27 }
  0xb2   :  { %1605 = vmatmul.mubr.bf16.gmra.mxu1 %v2367_v28  ;;  %1323 = vmatprep.mubr.bf16.mxu0 %v2368_v29 }
  0xb3   :  { %1612 = vmatprep.mubr.bf16.mxu1 %v2370_v30  ;;  %v2438_v30 = vld [vmem:[%s3262_s0 + $0x340] ss:$16 sps:$4 sm:$0xff]  }
  0xb9   :  { %1324 = vmatmul.mubr.bf16.gmra.mxu0 %v2372_v31 }
  0xba   :  { %1613 = vmatmul.mubr.bf16.gmra.mxu1 %v2373_v32  ;;  %1331 = vmatprep.mubr.bf16.mxu0 %v2374_v33  ;;  %v2439_v32 = vld [vmem:[%s3262_s0 + $0x348] ss:$16 sps:$4 sm:$0xff]   ;;  %v2440_v33 = vld [vmem:[%s3262_s0 + $0x364] ss:$16 sps:$4 sm:$0xff]  }
  0xbb   :  { %1620 = vmatprep.mubr.bf16.mxu1 %v2376_v34 }
  0xc1   :  { %1332 = vmatmul.mubr.bf16.gmra.mxu0 %v2378_v35 }
  0xc2   :  { %1621 = vmatmul.mubr.bf16.gmra.mxu1 %v2379_v36  ;;  %1339 = vmatprep.mubr.bf16.mxu0 %v2380_v37  ;;  %v2442_v37 = vld [vmem:[%s3262_s0 + $0x36c] ss:$16 sps:$4 sm:$0xff]  }
  0xc3   :  { %1628 = vmatprep.mubr.bf16.mxu1 %v2382_v38 }
  0xc9   :  { %1340 = vmatmul.mubr.bf16.gmra.mxu0 %v2384_v39 }
  0xca   :  { %1629 = vmatmul.mubr.bf16.gmra.mxu1 %v2385_v40  ;;  %1347 = vmatprep.mubr.bf16.mxu0 %v2386_v41 }
  0xcb   :  { %1636 = vmatprep.mubr.bf16.mxu1 %v2388_v42 }
  0xd1   :  { %1348 = vmatmul.mubr.bf16.gmra.mxu0 %v2390_v43 }
  0xd2   :  { %1637 = vmatmul.mubr.bf16.gmra.mxu1 %v2391_v44  ;;  %1355 = vmatprep.mubr.bf16.mxu0 %v2392_v45 }
  0xd3   :  { %1644 = vmatprep.mubr.bf16.mxu1 %v2394_v46  ;;  %v2444_v46 = vld [vmem:[%s3262_s0 + $0x360] ss:$16 sps:$4 sm:$0xff]  }
  0xd9   :  { %1356 = vmatmul.mubr.bf16.gmra.mxu0 %v2396_v47 }
  0xda   :  { %1645 = vmatmul.mubr.bf16.gmra.mxu1 %v2397_v48  ;;  %1363 = vmatprep.mubr.bf16.mxu0 %v2398_v49  ;;  %v2445_v48 = vld [vmem:[%s3262_s0 + $0x368] ss:$16 sps:$4 sm:$0xff]   ;;  %v2448_v49 = vld [vmem:[%s3262_s0 + $0x384] ss:$16 sps:$4 sm:$0xff]  }
  0xdb   :  { %1652 = vmatprep.mubr.bf16.mxu1 %v2400_v50 }
  0xe1   :  { %1364 = vmatmul.mubr.bf16.gmra.mxu0 %v2402_v51 }
  0xe2   :  { %1653 = vmatmul.mubr.bf16.gmra.mxu1 %v2403_v52  ;;  %1371 = vmatprep.mubr.bf16.mxu0 %v2404_v53  ;;  %v2451_v53 = vld [vmem:[%s3262_s0 + $0x38c] ss:$16 sps:$4 sm:$0xff]  }
  0xe3   :  { %1660 = vmatprep.mubr.bf16.mxu1 %v2406_v54 }
  0xe9   :  { %1372 = vmatmul.mubr.bf16.gmra.mxu0 %v2408_v55 }
  0xea   :  { %1661 = vmatmul.mubr.bf16.gmra.mxu1 %v2409_v56  ;;  %1379 = vmatprep.mubr.bf16.mxu0 %v2410_v57 }
  0xeb   :  { %1668 = vmatprep.mubr.bf16.mxu1 %v2412_v58 }
  0xf1   :  { %1380 = vmatmul.mubr.bf16.gmra.mxu0 %v2414_v59 }
  0xf2   :  { %1669 = vmatmul.mubr.bf16.gmra.mxu1 %v2415_v60  ;;  %1387 = vmatprep.mubr.bf16.mxu0 %v2416_v61 }
  0xf3   :  { %1676 = vmatprep.mubr.bf16.mxu1 %v2418_v62  ;;  %v2446_v62 = vld [vmem:[%s3262_s0 + $0x380] ss:$16 sps:$4 sm:$0xff]  }
  0xf9   :  { %1388 = vmatmul.mubr.bf16.gmra.mxu0 %v2420_v63 }
  0xfa   :  { %1677 = vmatmul.mubr.bf16.gmra.mxu1 %v2421_v0  ;;  %1395 = vmatprep.mubr.bf16.mxu0 %v2422_v1  ;;  %v2449_v0 = vld [vmem:[%s3262_s0 + $0x388] ss:$16 sps:$4 sm:$0xff]   ;;  %v2454_v1 = vld [vmem:[%s3262_s0 + $0x3a4] ss:$16 sps:$4 sm:$0xff]  }
  0xfb   :  { %1684 = vmatprep.mubr.bf16.mxu1 %v2424_v2 }
 0x101   :  { %v1205_v7 = vpop.f32.mrf.mxu0  ;;  %1396 = vmatmul.mubr.bf16.gmra.mxu0 %v2426_v3 }
 0x102   :  { %v1494_v8 = vpop.f32.mrf.mxu1  ;;  %1685 = vmatmul.mubr.bf16.gmra.mxu1 %v2427_v4  ;;  %1403 = vmatprep.mubr.bf16.mxu0 %v2428_v5  ;;  %v2457_v5 = vld [vmem:[%s3262_s0 + $0x3ac] ss:$16 sps:$4 sm:$0xff]  }
 0x103   :  { %v1495_v9 = vadd.f32 %v1494_v8, %v1205_v7  ;;  %v1207_v10 = vpop.f32.mrf.mxu0  ;;  %1692 = vmatprep.mubr.bf16.mxu1 %v2430_v6 }
 0x104   :  { %v1496_v12 = vpop.f32.mrf.mxu1 }
 0x105   :  { %v1208_v13 = vpop.f32.mrf.mxu0  ;;  %v1951_v18 = vadd.f32 %v2929_v11, %v1495_v9 }
 0x106   :  { %v1497_v15 = vpop.f32.mrf.mxu1 }
 0x107   :  { %v1498_v19 = vadd.f32 %v1497_v15, %v1208_v13  ;;  %v1210_v20 = vpop.f32.mrf.mxu0  ;;  %2015 = vst [vmem:[%s3264_s3] sm:$0xff] %v1951_v18  ;;  %v2452_v15 = vld [vmem:[%s3262_s0 + $0x3a0] ss:$16 sps:$4 sm:$0xff]   ;;  %v2460_v18 = vld [vmem:[%s3262_s0 + $0x3c4] ss:$16 sps:$4 sm:$0xff]  }
 0x108   :  { %v1499_v22 = vpop.f32.mrf.mxu1 }
 0x109   :  { %v1213_v23 = vpop.f32.mrf.mxu0  ;;  %1404 = vmatmul.mubr.bf16.gmra.mxu0 %v2432_v14  ;;  %v1952_v25 = vadd.f32 %v2929_v11, %v1498_v19  ;;  %v2463_v22 = vld [vmem:[%s3262_s0 + $0x3cc] ss:$16 sps:$4 sm:$0xff]  }
 0x10a   :  { %v1502_v24 = vpop.f32.mrf.mxu1  ;;  %1693 = vmatmul.mubr.bf16.gmra.mxu1 %v2433_v16  ;;  %1411 = vmatprep.mubr.bf16.mxu0 %v2434_v17  ;;  %v2455_v17 = vld [vmem:[%s3262_s0 + $0x3a8] ss:$16 sps:$4 sm:$0xff]  }
 0x10b   :  { %v1503_v26 = vadd.f32 %v1502_v24, %v1213_v23  ;;  %v1215_v27 = vpop.f32.mrf.mxu0  ;;  %1700 = vmatprep.mubr.bf16.mxu1 %v2436_v21  ;;  %2016 = vst [vmem:[%s3264_s3 + $0x8] sm:$0xff] %v1952_v25 }
 0x10c   :  { %v1504_v28 = vpop.f32.mrf.mxu1 }
 0x10d   :  { %v1216_v29 = vpop.f32.mrf.mxu0  ;;  %v1953_v34 = vadd.f32 %v2929_v11, %v1503_v26 }
 0x10e   :  { %v1505_v31 = vpop.f32.mrf.mxu1 }
 0x10f   :  { %v1506_v35 = vadd.f32 %v1505_v31, %v1216_v29  ;;  %v1218_v36 = vpop.f32.mrf.mxu0  ;;  %2017 = vst [vmem:[%s3264_s3 + $0x10] sm:$0xff] %v1953_v34  ;;  %v2458_v31 = vld [vmem:[%s3262_s0 + $0x3c0] ss:$16 sps:$4 sm:$0xff]   ;;  %v2466_v34 = vld [vmem:[%s3262_s0 + $0x3e4] ss:$16 sps:$4 sm:$0xff]  }
 0x110   :  { %v1507_v38 = vpop.f32.mrf.mxu1 }
 0x111   :  { %v1221_v39 = vpop.f32.mrf.mxu0  ;;  %1412 = vmatmul.mubr.bf16.gmra.mxu0 %v2438_v30  ;;  %v1954_v41 = vadd.f32 %v2929_v11, %v1506_v35  ;;  %v2469_v38 = vld [vmem:[%s3262_s0 + $0x3ec] ss:$16 sps:$4 sm:$0xff]  }
 0x112   :  { %v1510_v40 = vpop.f32.mrf.mxu1  ;;  %1701 = vmatmul.mubr.bf16.gmra.mxu1 %v2439_v32  ;;  %1419 = vmatprep.mubr.bf16.mxu0 %v2440_v33  ;;  %v2461_v33 = vld [vmem:[%s3262_s0 + $0x3c8] ss:$16 sps:$4 sm:$0xff]  }
 0x113   :  { %v1511_v42 = vadd.f32 %v1510_v40, %v1221_v39  ;;  %v1223_v43 = vpop.f32.mrf.mxu0  ;;  %1708 = vmatprep.mubr.bf16.mxu1 %v2442_v37  ;;  %2018 = vst [vmem:[%s3264_s3 + $0x18] sm:$0xff] %v1954_v41 }
 0x114   :  { %v1512_v44 = vpop.f32.mrf.mxu1 }
 0x115   :  { %v1224_v45 = vpop.f32.mrf.mxu0  ;;  %v1955_v50 = vadd.f32 %v2929_v11, %v1511_v42 }
 0x116   :  { %v1513_v47 = vpop.f32.mrf.mxu1 }
 0x117   :  { %v1514_v51 = vadd.f32 %v1513_v47, %v1224_v45  ;;  %v1226_v52 = vpop.f32.mrf.mxu0  ;;  %2019 = vst [vmem:[%s3264_s3 + $0x20] sm:$0xff] %v1955_v50  ;;  %v2464_v47 = vld [vmem:[%s3262_s0 + $0x3e0] ss:$16 sps:$4 sm:$0xff]  }
 0x118   :  { %v1515_v54 = vpop.f32.mrf.mxu1 }
 0x119   :  { %v1229_v55 = vpop.f32.mrf.mxu0  ;;  %1420 = vmatmul.mubr.bf16.gmra.mxu0 %v2444_v46  ;;  %v1956_v57 = vadd.f32 %v2929_v11, %v1514_v51 }
 0x11a   :  { %v1518_v56 = vpop.f32.mrf.mxu1  ;;  %1709 = vmatmul.mubr.bf16.gmra.mxu1 %v2445_v48  ;;  %1427 = vmatprep.mubr.bf16.mxu0 %v2448_v49  ;;  %v2467_v49 = vld [vmem:[%s3262_s0 + $0x3e8] ss:$16 sps:$4 sm:$0xff]  }
 0x11b   :  { %v1519_v58 = vadd.f32 %v1518_v56, %v1229_v55  ;;  %v1231_v59 = vpop.f32.mrf.mxu0  ;;  %1716 = vmatprep.mubr.bf16.mxu1 %v2451_v53  ;;  %2020 = vst [vmem:[%s3264_s3 + $0x28] sm:$0xff] %v1956_v57 }
 0x11c   :  { %v1520_v60 = vpop.f32.mrf.mxu1 }
 0x11d   :  { %v1232_v61 = vpop.f32.mrf.mxu0  ;;  %v1957_v2 = vadd.f32 %v2929_v11, %v1519_v58 }
 0x11e   :  { %v1521_v63 = vpop.f32.mrf.mxu1 }
 0x11f   :  { %v1522_v3 = vadd.f32 %v1521_v63, %v1232_v61  ;;  %v1234_v4 = vpop.f32.mrf.mxu0  ;;  %2021 = vst [vmem:[%s3264_s3 + $0x30] sm:$0xff] %v1957_v2 }
 0x120   :  { %v1523_v6 = vpop.f32.mrf.mxu1 }
 0x121   :  { %v1237_v7 = vpop.f32.mrf.mxu0  ;;  %1428 = vmatmul.mubr.bf16.gmra.mxu0 %v2446_v62  ;;  %v1958_v9 = vadd.f32 %v2929_v11, %v1522_v3 }
 0x122   :  { %v1526_v8 = vpop.f32.mrf.mxu1  ;;  %1717 = vmatmul.mubr.bf16.gmra.mxu1 %v2449_v0  ;;  %1435 = vmatprep.mubr.bf16.mxu0 %v2454_v1 }
 0x123   :  { %v1527_v10 = vadd.f32 %v1526_v8, %v1237_v7  ;;  %v1239_v12 = vpop.f32.mrf.mxu0  ;;  %1724 = vmatprep.mubr.bf16.mxu1 %v2457_v5  ;;  %2022 = vst [vmem:[%s3264_s3 + $0x38] sm:$0xff] %v1958_v9 }
 0x124   :  { %v1528_v13 = vpop.f32.mrf.mxu1 }
 0x125   :  { %v1240_v14 = vpop.f32.mrf.mxu0  ;;  %v1959_v19 = vadd.f32 %v2929_v11, %v1527_v10 }
 0x126   :  { %v1529_v16 = vpop.f32.mrf.mxu1 }
 0x127   :  { %v1530_v20 = vadd.f32 %v1529_v16, %v1240_v14  ;;  %v1242_v21 = vpop.f32.mrf.mxu0  ;;  %2023 = vst [vmem:[%s3264_s3 + $0x40] sm:$0xff] %v1959_v19 }
 0x128   :  { %v1531_v23 = vpop.f32.mrf.mxu1 }
 0x129   :  { %v1245_v24 = vpop.f32.mrf.mxu0  ;;  %1436 = vmatmul.mubr.bf16.gmra.mxu0 %v2452_v15  ;;  %v1960_v26 = vadd.f32 %v2929_v11, %v1530_v20 }
 0x12a   :  { %v1534_v25 = vpop.f32.mrf.mxu1  ;;  %1725 = vmatmul.mubr.bf16.gmra.mxu1 %v2455_v17  ;;  %1443 = vmatprep.mubr.bf16.mxu0 %v2460_v18 }
 0x12b   :  { %v1535_v27 = vadd.f32 %v1534_v25, %v1245_v24  ;;  %v1247_v28 = vpop.f32.mrf.mxu0  ;;  %1732 = vmatprep.mubr.bf16.mxu1 %v2463_v22  ;;  %2024 = vst [vmem:[%s3264_s3 + $0x48] sm:$0xff] %v1960_v26 }
 0x12c   :  { %v1536_v29 = vpop.f32.mrf.mxu1 }
 0x12d   :  { %v1248_v30 = vpop.f32.mrf.mxu0  ;;  %v1961_v35 = vadd.f32 %v2929_v11, %v1535_v27 }
 0x12e   :  { %v1537_v32 = vpop.f32.mrf.mxu1 }
 0x12f   :  { %v1538_v36 = vadd.f32 %v1537_v32, %v1248_v30  ;;  %v1250_v37 = vpop.f32.mrf.mxu0  ;;  %2025 = vst [vmem:[%s3264_s3 + $0x50] sm:$0xff] %v1961_v35 }
 0x130   :  { %v1539_v39 = vpop.f32.mrf.mxu1 }
 0x131   :  { %v1253_v40 = vpop.f32.mrf.mxu0  ;;  %1444 = vmatmul.mubr.bf16.gmra.mxu0 %v2458_v31  ;;  %v1962_v42 = vadd.f32 %v2929_v11, %v1538_v36 }
 0x132   :  { %v1542_v41 = vpop.f32.mrf.mxu1  ;;  %1733 = vmatmul.mubr.bf16.gmra.mxu1 %v2461_v33  ;;  %1451 = vmatprep.mubr.bf16.mxu0 %v2466_v34 }
 0x133   :  { %v1543_v43 = vadd.f32 %v1542_v41, %v1253_v40  ;;  %v1255_v44 = vpop.f32.mrf.mxu0  ;;  %1740 = vmatprep.mubr.bf16.mxu1 %v2469_v38  ;;  %2026 = vst [vmem:[%s3264_s3 + $0x58] sm:$0xff] %v1962_v42 }
 0x134   :  { %v1544_v45 = vpop.f32.mrf.mxu1 }
 0x135   :  { %v1256_v46 = vpop.f32.mrf.mxu0  ;;  %v1963_v50 = vadd.f32 %v2929_v11, %v1543_v43 }
 0x136   :  { %v1545_v48 = vpop.f32.mrf.mxu1 }
 0x137   :  { %v1546_v51 = vadd.f32 %v1545_v48, %v1256_v46  ;;  %v1258_v52 = vpop.f32.mrf.mxu0  ;;  %2027 = vst [vmem:[%s3264_s3 + $0x60] sm:$0xff] %v1963_v50 }
 0x138   :  { %v1547_v53 = vpop.f32.mrf.mxu1 }
 0x139   :  { %v1261_v54 = vpop.f32.mrf.mxu0  ;;  %1452 = vmatmul.mubr.bf16.gmra.mxu0 %v2464_v47  ;;  %v1964_v56 = vadd.f32 %v2929_v11, %v1546_v51 }
 0x13a   :  { %v1550_v55 = vpop.f32.mrf.mxu1  ;;  %1741 = vmatmul.mubr.bf16.gmra.mxu1 %v2467_v49 }
 0x13b   :  { %v1551_v57 = vadd.f32 %v1550_v55, %v1261_v54  ;;  %v1263_v58 = vpop.f32.mrf.mxu0  ;;  %2028 = vst [vmem:[%s3264_s3 + $0x68] sm:$0xff] %v1964_v56 }
 0x13c   :  { %v1552_v59 = vpop.f32.mrf.mxu1 }
 0x13d   :  { %v1264_v60 = vpop.f32.mrf.mxu0  ;;  %v1965_v62 = vadd.f32 %v2929_v11, %v1551_v57 }
 0x13e   :  { %v1553_v61 = vpop.f32.mrf.mxu1 }
 0x13f   :  { %v1554_v63 = vadd.f32 %v1553_v61, %v1264_v60  ;;  %v1266_v0 = vpop.f32.mrf.mxu0  ;;  %2029 = vst [vmem:[%s3264_s3 + $0x70] sm:$0xff] %v1965_v62 }
 0x140   :  { %v1555_v1 = vpop.f32.mrf.mxu1 }
 0x141   :  { %v1269_v2 = vpop.f32.mrf.mxu0  ;;  %v1966_v4 = vadd.f32 %v2929_v11, %v1554_v63 }
 0x142   :  { %v1558_v3 = vpop.f32.mrf.mxu1 }
 0x143   :  { %v1559_v5 = vadd.f32 %v1558_v3, %v1269_v2  ;;  %v1271_v6 = vpop.f32.mrf.mxu0  ;;  %2030 = vst [vmem:[%s3264_s3 + $0x78] sm:$0xff] %v1966_v4 }
 0x144   :  { %v1560_v7 = vpop.f32.mrf.mxu1 }
 0x145   :  { %v1272_v8 = vpop.f32.mrf.mxu0  ;;  %v1967_v10 = vadd.f32 %v2929_v11, %v1559_v5 }
 0x146   :  { %v1561_v9 = vpop.f32.mrf.mxu1 }
 0x147   :  { %v1562_v12 = vadd.f32 %v1561_v9, %v1272_v8  ;;  %v1274_v13 = vpop.f32.mrf.mxu0  ;;  %2031 = vst [vmem:[%s3264_s3 + $0x80] sm:$0xff] %v1967_v10 }
 0x148   :  { %v1563_v14 = vpop.f32.mrf.mxu1 }
 0x149   :  { %v1277_v15 = vpop.f32.mrf.mxu0  ;;  %v1968_v17 = vadd.f32 %v2929_v11, %v1562_v12 }
 0x14a   :  { %v1566_v16 = vpop.f32.mrf.mxu1 }
 0x14b   :  { %v1567_v18 = vadd.f32 %v1566_v16, %v1277_v15  ;;  %v1279_v19 = vpop.f32.mrf.mxu0  ;;  %2032 = vst [vmem:[%s3264_s3 + $0x88] sm:$0xff] %v1968_v17 }
 0x14c   :  { %v1568_v20 = vpop.f32.mrf.mxu1 }
 0x14d   :  { %v1280_v21 = vpop.f32.mrf.mxu0  ;;  %v1969_v23 = vadd.f32 %v2929_v11, %v1567_v18 }
 0x14e   :  { %v1569_v22 = vpop.f32.mrf.mxu1 }
 0x14f   :  { %v1570_v24 = vadd.f32 %v1569_v22, %v1280_v21  ;;  %v1282_v25 = vpop.f32.mrf.mxu0  ;;  %2033 = vst [vmem:[%s3264_s3 + $0x90] sm:$0xff] %v1969_v23 }
 0x150   :  { %v1571_v26 = vpop.f32.mrf.mxu1 }
 0x151   :  { %v1285_v27 = vpop.f32.mrf.mxu0  ;;  %v1970_v29 = vadd.f32 %v2929_v11, %v1570_v24 }
 0x152   :  { %v1574_v28 = vpop.f32.mrf.mxu1 }
 0x153   :  { %v1575_v30 = vadd.f32 %v1574_v28, %v1285_v27  ;;  %v1287_v31 = vpop.f32.mrf.mxu0  ;;  %2034 = vst [vmem:[%s3264_s3 + $0x98] sm:$0xff] %v1970_v29 }
 0x154   :  { %v1576_v32 = vpop.f32.mrf.mxu1 }
 0x155   :  { %v1288_v33 = vpop.f32.mrf.mxu0  ;;  %v1971_v35 = vadd.f32 %v2929_v11, %v1575_v30 }
 0x156   :  { %v1577_v34 = vpop.f32.mrf.mxu1 }
 0x157   :  { %v1578_v36 = vadd.f32 %v1577_v34, %v1288_v33  ;;  %v1290_v37 = vpop.f32.mrf.mxu0  ;;  %2035 = vst [vmem:[%s3264_s3 + $0xa0] sm:$0xff] %v1971_v35 }
 0x158   :  { %v1579_v38 = vpop.f32.mrf.mxu1 }
 0x159   :  { %v1293_v39 = vpop.f32.mrf.mxu0  ;;  %v1972_v41 = vadd.f32 %v2929_v11, %v1578_v36 }
 0x15a   :  { %v1582_v40 = vpop.f32.mrf.mxu1 }
 0x15b   :  { %v1583_v42 = vadd.f32 %v1582_v40, %v1293_v39  ;;  %v1295_v43 = vpop.f32.mrf.mxu0  ;;  %2036 = vst [vmem:[%s3264_s3 + $0xa8] sm:$0xff] %v1972_v41 }
 0x15c   :  { %v1584_v44 = vpop.f32.mrf.mxu1 }
 0x15d   :  { %v1296_v45 = vpop.f32.mrf.mxu0  ;;  %v1973_v47 = vadd.f32 %v2929_v11, %v1583_v42 }
 0x15e   :  { %v1585_v46 = vpop.f32.mrf.mxu1 }
 0x15f   :  { %v1586_v48 = vadd.f32 %v1585_v46, %v1296_v45  ;;  %v1298_v49 = vpop.f32.mrf.mxu0  ;;  %2037 = vst [vmem:[%s3264_s3 + $0xb0] sm:$0xff] %v1973_v47 }
 0x160   :  { %v1587_v50 = vpop.f32.mrf.mxu1 }
 0x161   :  { %v1301_v51 = vpop.f32.mrf.mxu0  ;;  %v1974_v53 = vadd.f32 %v2929_v11, %v1586_v48 }
 0x162   :  { %v1590_v52 = vpop.f32.mrf.mxu1 }
 0x163   :  { %v1591_v54 = vadd.f32 %v1590_v52, %v1301_v51  ;;  %v1303_v55 = vpop.f32.mrf.mxu0  ;;  %2038 = vst [vmem:[%s3264_s3 + $0xb8] sm:$0xff] %v1974_v53 }
 0x164   :  { %v1592_v56 = vpop.f32.mrf.mxu1 }
 0x165   :  { %v1304_v57 = vpop.f32.mrf.mxu0  ;;  %v1975_v59 = vadd.f32 %v2929_v11, %v1591_v54 }
 0x166   :  { %v1593_v58 = vpop.f32.mrf.mxu1 }
 0x167   :  { %v1594_v60 = vadd.f32 %v1593_v58, %v1304_v57  ;;  %v1306_v61 = vpop.f32.mrf.mxu0  ;;  %2039 = vst [vmem:[%s3264_s3 + $0xc0] sm:$0xff] %v1975_v59 }
 0x168   :  { %v1595_v62 = vpop.f32.mrf.mxu1 }
 0x169   :  { %v1309_v63 = vpop.f32.mrf.mxu0  ;;  %v1976_v1 = vadd.f32 %v2929_v11, %v1594_v60 }
 0x16a   :  { %v1598_v0 = vpop.f32.mrf.mxu1 }
 0x16b   :  { %v1599_v2 = vadd.f32 %v1598_v0, %v1309_v63  ;;  %v1311_v3 = vpop.f32.mrf.mxu0  ;;  %2040 = vst [vmem:[%s3264_s3 + $0xc8] sm:$0xff] %v1976_v1 }
 0x16c   :  { %v1600_v4 = vpop.f32.mrf.mxu1 }
 0x16d   :  { %v1312_v5 = vpop.f32.mrf.mxu0  ;;  %v1977_v7 = vadd.f32 %v2929_v11, %v1599_v2 }
 0x16e   :  { %v1601_v6 = vpop.f32.mrf.mxu1 }
 0x16f   :  { %v1602_v8 = vadd.f32 %v1601_v6, %v1312_v5  ;;  %v1314_v9 = vpop.f32.mrf.mxu0  ;;  %2041 = vst [vmem:[%s3264_s3 + $0xd0] sm:$0xff] %v1977_v7 }
 0x170   :  { %v1603_v10 = vpop.f32.mrf.mxu1 }
 0x171   :  { %v1317_v12 = vpop.f32.mrf.mxu0  ;;  %v1978_v14 = vadd.f32 %v2929_v11, %v1602_v8 }
 0x172   :  { %v1606_v13 = vpop.f32.mrf.mxu1 }
 0x173   :  { %v1607_v15 = vadd.f32 %v1606_v13, %v1317_v12  ;;  %v1319_v16 = vpop.f32.mrf.mxu0  ;;  %2042 = vst [vmem:[%s3264_s3 + $0xd8] sm:$0xff] %v1978_v14 }
 0x174   :  { %v1608_v17 = vpop.f32.mrf.mxu1 }
 0x175   :  { %v1320_v18 = vpop.f32.mrf.mxu0  ;;  %v1979_v20 = vadd.f32 %v2929_v11, %v1607_v15 }
 0x176   :  { %v1609_v19 = vpop.f32.mrf.mxu1 }
 0x177   :  { %v1610_v21 = vadd.f32 %v1609_v19, %v1320_v18  ;;  %v1322_v22 = vpop.f32.mrf.mxu0  ;;  %2043 = vst [vmem:[%s3264_s3 + $0xe0] sm:$0xff] %v1979_v20 }
 0x178   :  { %v1611_v23 = vpop.f32.mrf.mxu1 }
 0x179   :  { %v1325_v24 = vpop.f32.mrf.mxu0  ;;  %v1980_v26 = vadd.f32 %v2929_v11, %v1610_v21 }
 0x17a   :  { %v1614_v25 = vpop.f32.mrf.mxu1 }
 0x17b   :  { %v1615_v27 = vadd.f32 %v1614_v25, %v1325_v24  ;;  %v1327_v28 = vpop.f32.mrf.mxu0  ;;  %2044 = vst [vmem:[%s3264_s3 + $0xe8] sm:$0xff] %v1980_v26 }
 0x17c   :  { %v1616_v29 = vpop.f32.mrf.mxu1 }
 0x17d   :  { %v1328_v30 = vpop.f32.mrf.mxu0  ;;  %v1981_v32 = vadd.f32 %v2929_v11, %v1615_v27 }
 0x17e   :  { %v1617_v31 = vpop.f32.mrf.mxu1 }
 0x17f   :  { %v1618_v33 = vadd.f32 %v1617_v31, %v1328_v30  ;;  %v1330_v34 = vpop.f32.mrf.mxu0  ;;  %2045 = vst [vmem:[%s3264_s3 + $0xf0] sm:$0xff] %v1981_v32 }
 0x180   :  { %v1619_v35 = vpop.f32.mrf.mxu1 }
 0x181   :  { %v1333_v36 = vpop.f32.mrf.mxu0  ;;  %v1982_v38 = vadd.f32 %v2929_v11, %v1618_v33 }
 0x182   :  { %v1622_v37 = vpop.f32.mrf.mxu1 }
 0x183   :  { %v1623_v39 = vadd.f32 %v1622_v37, %v1333_v36  ;;  %v1335_v40 = vpop.f32.mrf.mxu0  ;;  %2046 = vst [vmem:[%s3264_s3 + $0xf8] sm:$0xff] %v1982_v38 }
 0x184   :  { %v1624_v41 = vpop.f32.mrf.mxu1 }
 0x185   :  { %v1336_v42 = vpop.f32.mrf.mxu0  ;;  %v1983_v44 = vadd.f32 %v2929_v11, %v1623_v39 }
 0x186   :  { %v1625_v43 = vpop.f32.mrf.mxu1 }
 0x187   :  { %v1626_v45 = vadd.f32 %v1625_v43, %v1336_v42  ;;  %v1338_v46 = vpop.f32.mrf.mxu0  ;;  %2047 = vst [vmem:[%s3264_s3 + $0x100] sm:$0xff] %v1983_v44 }
 0x188   :  { %v1627_v47 = vpop.f32.mrf.mxu1 }
 0x189   :  { %v1341_v48 = vpop.f32.mrf.mxu0  ;;  %v1984_v50 = vadd.f32 %v2929_v11, %v1626_v45 }
 0x18a   :  { %v1630_v49 = vpop.f32.mrf.mxu1 }
 0x18b   :  { %v1631_v51 = vadd.f32 %v1630_v49, %v1341_v48  ;;  %v1343_v52 = vpop.f32.mrf.mxu0  ;;  %2048 = vst [vmem:[%s3264_s3 + $0x108] sm:$0xff] %v1984_v50 }
 0x18c   :  { %v1632_v53 = vpop.f32.mrf.mxu1 }
 0x18d   :  { %v1344_v54 = vpop.f32.mrf.mxu0  ;;  %v1985_v56 = vadd.f32 %v2929_v11, %v1631_v51 }
 0x18e   :  { %v1633_v55 = vpop.f32.mrf.mxu1 }
 0x18f   :  { %v1634_v57 = vadd.f32 %v1633_v55, %v1344_v54  ;;  %v1346_v58 = vpop.f32.mrf.mxu0  ;;  %2049 = vst [vmem:[%s3264_s3 + $0x110] sm:$0xff] %v1985_v56 }
 0x190   :  { %v1635_v59 = vpop.f32.mrf.mxu1 }
 0x191   :  { %v1349_v60 = vpop.f32.mrf.mxu0  ;;  %v1986_v62 = vadd.f32 %v2929_v11, %v1634_v57 }
 0x192   :  { %v1638_v61 = vpop.f32.mrf.mxu1 }
 0x193   :  { %v1639_v63 = vadd.f32 %v1638_v61, %v1349_v60  ;;  %v1351_v0 = vpop.f32.mrf.mxu0  ;;  %2050 = vst [vmem:[%s3264_s3 + $0x118] sm:$0xff] %v1986_v62 }
 0x194   :  { %v1640_v1 = vpop.f32.mrf.mxu1 }
 0x195   :  { %v1352_v2 = vpop.f32.mrf.mxu0  ;;  %v1987_v4 = vadd.f32 %v2929_v11, %v1639_v63 }
 0x196   :  { %v1641_v3 = vpop.f32.mrf.mxu1 }
 0x197   :  { %v1642_v5 = vadd.f32 %v1641_v3, %v1352_v2  ;;  %v1354_v6 = vpop.f32.mrf.mxu0  ;;  %2051 = vst [vmem:[%s3264_s3 + $0x120] sm:$0xff] %v1987_v4 }
 0x198   :  { %v1643_v7 = vpop.f32.mrf.mxu1 }
 0x199   :  { %v1357_v8 = vpop.f32.mrf.mxu0  ;;  %v1988_v10 = vadd.f32 %v2929_v11, %v1642_v5 }
 0x19a   :  { %v1646_v9 = vpop.f32.mrf.mxu1 }
 0x19b   :  { %v1647_v12 = vadd.f32 %v1646_v9, %v1357_v8  ;;  %v1359_v13 = vpop.f32.mrf.mxu0  ;;  %2052 = vst [vmem:[%s3264_s3 + $0x128] sm:$0xff] %v1988_v10 }
 0x19c   :  { %v1648_v14 = vpop.f32.mrf.mxu1 }
 0x19d   :  { %v1360_v15 = vpop.f32.mrf.mxu0  ;;  %v1989_v17 = vadd.f32 %v2929_v11, %v1647_v12 }
 0x19e   :  { %v1649_v16 = vpop.f32.mrf.mxu1 }
 0x19f   :  { %v1650_v18 = vadd.f32 %v1649_v16, %v1360_v15  ;;  %v1362_v19 = vpop.f32.mrf.mxu0  ;;  %2053 = vst [vmem:[%s3264_s3 + $0x130] sm:$0xff] %v1989_v17 }
 0x1a0   :  { %v1651_v20 = vpop.f32.mrf.mxu1 }
 0x1a1   :  { %v1365_v21 = vpop.f32.mrf.mxu0  ;;  %v1990_v23 = vadd.f32 %v2929_v11, %v1650_v18 }
 0x1a2   :  { %v1654_v22 = vpop.f32.mrf.mxu1 }
 0x1a3   :  { %v1655_v24 = vadd.f32 %v1654_v22, %v1365_v21  ;;  %v1367_v25 = vpop.f32.mrf.mxu0  ;;  %2054 = vst [vmem:[%s3264_s3 + $0x138] sm:$0xff] %v1990_v23 }
 0x1a4   :  { %v1656_v26 = vpop.f32.mrf.mxu1 }
 0x1a5   :  { %v1368_v27 = vpop.f32.mrf.mxu0  ;;  %v1991_v29 = vadd.f32 %v2929_v11, %v1655_v24 }
 0x1a6   :  { %v1657_v28 = vpop.f32.mrf.mxu1 }
 0x1a7   :  { %v1658_v30 = vadd.f32 %v1657_v28, %v1368_v27  ;;  %v1370_v31 = vpop.f32.mrf.mxu0  ;;  %2055 = vst [vmem:[%s3264_s3 + $0x140] sm:$0xff] %v1991_v29 }
 0x1a8   :  { %v1659_v32 = vpop.f32.mrf.mxu1 }
 0x1a9   :  { %v1373_v33 = vpop.f32.mrf.mxu0  ;;  %v1992_v35 = vadd.f32 %v2929_v11, %v1658_v30 }
 0x1aa   :  { %v1662_v34 = vpop.f32.mrf.mxu1 }
 0x1ab   :  { %v1663_v36 = vadd.f32 %v1662_v34, %v1373_v33  ;;  %v1375_v37 = vpop.f32.mrf.mxu0  ;;  %2056 = vst [vmem:[%s3264_s3 + $0x148] sm:$0xff] %v1992_v35 }
 0x1ac   :  { %v1664_v38 = vpop.f32.mrf.mxu1 }
 0x1ad   :  { %v1376_v39 = vpop.f32.mrf.mxu0  ;;  %v1993_v41 = vadd.f32 %v2929_v11, %v1663_v36 }
 0x1ae   :  { %v1665_v40 = vpop.f32.mrf.mxu1 }
 0x1af   :  { %v1666_v42 = vadd.f32 %v1665_v40, %v1376_v39  ;;  %v1378_v43 = vpop.f32.mrf.mxu0  ;;  %2057 = vst [vmem:[%s3264_s3 + $0x150] sm:$0xff] %v1993_v41 }
 0x1b0   :  { %v1667_v44 = vpop.f32.mrf.mxu1 }
 0x1b1   :  { %v1381_v45 = vpop.f32.mrf.mxu0  ;;  %v1994_v47 = vadd.f32 %v2929_v11, %v1666_v42 }
 0x1b2   :  { %v1670_v46 = vpop.f32.mrf.mxu1 }
 0x1b3   :  { %v1671_v48 = vadd.f32 %v1670_v46, %v1381_v45  ;;  %v1383_v49 = vpop.f32.mrf.mxu0  ;;  %2058 = vst [vmem:[%s3264_s3 + $0x158] sm:$0xff] %v1994_v47 }
 0x1b4   :  { %v1672_v50 = vpop.f32.mrf.mxu1 }
 0x1b5   :  { %v1384_v51 = vpop.f32.mrf.mxu0  ;;  %v1995_v53 = vadd.f32 %v2929_v11, %v1671_v48 }
 0x1b6   :  { %v1673_v52 = vpop.f32.mrf.mxu1 }
 0x1b7   :  { %v1674_v54 = vadd.f32 %v1673_v52, %v1384_v51  ;;  %v1386_v55 = vpop.f32.mrf.mxu0  ;;  %2059 = vst [vmem:[%s3264_s3 + $0x160] sm:$0xff] %v1995_v53 }
 0x1b8   :  { %v1675_v56 = vpop.f32.mrf.mxu1 }
 0x1b9   :  { %v1389_v57 = vpop.f32.mrf.mxu0  ;;  %v1996_v59 = vadd.f32 %v2929_v11, %v1674_v54 }
 0x1ba   :  { %v1678_v58 = vpop.f32.mrf.mxu1 }
 0x1bb   :  { %v1679_v60 = vadd.f32 %v1678_v58, %v1389_v57  ;;  %v1391_v61 = vpop.f32.mrf.mxu0  ;;  %2060 = vst [vmem:[%s3264_s3 + $0x168] sm:$0xff] %v1996_v59 }
 0x1bc   :  { %v1680_v62 = vpop.f32.mrf.mxu1 }
 0x1bd   :  { %v1392_v63 = vpop.f32.mrf.mxu0  ;;  %v1997_v1 = vadd.f32 %v2929_v11, %v1679_v60 }
 0x1be   :  { %v1681_v0 = vpop.f32.mrf.mxu1 }
 0x1bf   :  { %v1682_v2 = vadd.f32 %v1681_v0, %v1392_v63  ;;  %v1394_v3 = vpop.f32.mrf.mxu0  ;;  %2061 = vst [vmem:[%s3264_s3 + $0x170] sm:$0xff] %v1997_v1 }
 0x1c0   :  { %v1683_v4 = vpop.f32.mrf.mxu1 }
 0x1c1   :  { %v1397_v5 = vpop.f32.mrf.mxu0  ;;  %v1998_v7 = vadd.f32 %v2929_v11, %v1682_v2  ;;  %v2470_v4 = vld [vmem:[%s3263_s2] ss:$0 sm:$0xff] }
 0x1c2   :  { %v1686_v6 = vpop.f32.mrf.mxu1 }
 0x1c3   :  { %v1687_v8 = vadd.f32 %v1686_v6, %v1397_v5  ;;  %v1399_v9 = vpop.f32.mrf.mxu0  ;;  %2062 = vst [vmem:[%s3264_s3 + $0x178] sm:$0xff] %v1998_v7 }
 0x1c4   :  { %v1688_v10 = vpop.f32.mrf.mxu1 }
 0x1c5   :  { %v1400_v12 = vpop.f32.mrf.mxu0  ;;  %v1999_v14 = vadd.f32 %v2929_v11, %v1687_v8 }
 0x1c6   :  { %v1689_v13 = vpop.f32.mrf.mxu1 }
 0x1c7   :  { %v1690_v15 = vadd.f32 %v1689_v13, %v1400_v12  ;;  %v1402_v16 = vpop.f32.mrf.mxu0  ;;  %2063 = vst [vmem:[%s3264_s3 + $0x180] sm:$0xff] %v1999_v14 }
 0x1c8   :  { %v1691_v17 = vpop.f32.mrf.mxu1 }
 0x1c9   :  { %v1405_v18 = vpop.f32.mrf.mxu0  ;;  %v2000_v20 = vadd.f32 %v2929_v11, %v1690_v15 }
 0x1ca   :  { %v1694_v19 = vpop.f32.mrf.mxu1 }
 0x1cb   :  { %v1695_v21 = vadd.f32 %v1694_v19, %v1405_v18  ;;  %v1407_v22 = vpop.f32.mrf.mxu0  ;;  %2064 = vst [vmem:[%s3264_s3 + $0x188] sm:$0xff] %v2000_v20 }
 0x1cc   :  { %v1696_v23 = vpop.f32.mrf.mxu1 }
 0x1cd   :  { %v1408_v24 = vpop.f32.mrf.mxu0  ;;  %v2001_v26 = vadd.f32 %v2929_v11, %v1695_v21 }
 0x1ce   :  { %v1697_v25 = vpop.f32.mrf.mxu1 }
 0x1cf   :  { %v1698_v27 = vadd.f32 %v1697_v25, %v1408_v24  ;;  %v1410_v28 = vpop.f32.mrf.mxu0  ;;  %2065 = vst [vmem:[%s3264_s3 + $0x190] sm:$0xff] %v2001_v26 }
 0x1d0   :  { %v1699_v29 = vpop.f32.mrf.mxu1 }
 0x1d1   :  { %v1413_v30 = vpop.f32.mrf.mxu0  ;;  %v2002_v32 = vadd.f32 %v2929_v11, %v1698_v27 }
 0x1d2   :  { %v1702_v31 = vpop.f32.mrf.mxu1 }
 0x1d3   :  { %v1703_v33 = vadd.f32 %v1702_v31, %v1413_v30  ;;  %v1415_v34 = vpop.f32.mrf.mxu0  ;;  %2066 = vst [vmem:[%s3264_s3 + $0x198] sm:$0xff] %v2002_v32 }
 0x1d4   :  { %v1704_v35 = vpop.f32.mrf.mxu1 }
 0x1d5   :  { %v1416_v36 = vpop.f32.mrf.mxu0  ;;  %v2003_v38 = vadd.f32 %v2929_v11, %v1703_v33 }
 0x1d6   :  { %v1705_v37 = vpop.f32.mrf.mxu1 }
 0x1d7   :  { %v1706_v39 = vadd.f32 %v1705_v37, %v1416_v36  ;;  %v1418_v40 = vpop.f32.mrf.mxu0  ;;  %2067 = vst [vmem:[%s3264_s3 + $0x1a0] sm:$0xff] %v2003_v38 }
 0x1d8   :  { %v1707_v41 = vpop.f32.mrf.mxu1 }
 0x1d9   :  { %v1421_v42 = vpop.f32.mrf.mxu0  ;;  %v2004_v44 = vadd.f32 %v2929_v11, %v1706_v39 }
 0x1da   :  { %v1710_v43 = vpop.f32.mrf.mxu1 }
 0x1db   :  { %v1711_v45 = vadd.f32 %v1710_v43, %v1421_v42  ;;  %v1423_v46 = vpop.f32.mrf.mxu0  ;;  %2068 = vst [vmem:[%s3264_s3 + $0x1a8] sm:$0xff] %v2004_v44 }
 0x1dc   :  { %v1712_v47 = vpop.f32.mrf.mxu1 }
 0x1dd   :  { %v1424_v48 = vpop.f32.mrf.mxu0  ;;  %v2005_v50 = vadd.f32 %v2929_v11, %v1711_v45 }
 0x1de   :  { %v1713_v49 = vpop.f32.mrf.mxu1 }
 0x1df   :  { %v1714_v51 = vadd.f32 %v1713_v49, %v1424_v48  ;;  %v1426_v52 = vpop.f32.mrf.mxu0  ;;  %2069 = vst [vmem:[%s3264_s3 + $0x1b0] sm:$0xff] %v2005_v50 }
 0x1e0   :  { %v1715_v53 = vpop.f32.mrf.mxu1 }
 0x1e1   :  { %v1429_v54 = vpop.f32.mrf.mxu0  ;;  %v2006_v56 = vadd.f32 %v2929_v11, %v1714_v51 }
 0x1e2   :  { %v1718_v55 = vpop.f32.mrf.mxu1 }
 0x1e3   :  { %v1719_v57 = vadd.f32 %v1718_v55, %v1429_v54  ;;  %v1431_v58 = vpop.f32.mrf.mxu0  ;;  %2070 = vst [vmem:[%s3264_s3 + $0x1b8] sm:$0xff] %v2006_v56 }
 0x1e4   :  { %v1720_v59 = vpop.f32.mrf.mxu1 }
 0x1e5   :  { %v1432_v60 = vpop.f32.mrf.mxu0  ;;  %v2007_v62 = vadd.f32 %v2929_v11, %v1719_v57 }
 0x1e6   :  { %v1721_v61 = vpop.f32.mrf.mxu1 }
 0x1e7   :  { %v1722_v63 = vadd.f32 %v1721_v61, %v1432_v60  ;;  %v1434_v0 = vpop.f32.mrf.mxu0  ;;  %2071 = vst [vmem:[%s3264_s3 + $0x1c0] sm:$0xff] %v2007_v62 }
 0x1e8   :  { %v1723_v1 = vpop.f32.mrf.mxu1 }
 0x1e9   :  { %v1437_v2 = vpop.f32.mrf.mxu0  ;;  %v2008_v5 = vadd.f32 %v2470_v4, %v1722_v63 }
 0x1ea   :  { %v1726_v3 = vpop.f32.mrf.mxu1 }
 0x1eb   :  { %v1727_v6 = vadd.f32 %v1726_v3, %v1437_v2  ;;  %v1439_v7 = vpop.f32.mrf.mxu0  ;;  %2072 = vst [vmem:[%s3264_s3 + $0x1c8] sm:$0xff] %v2008_v5 }
 0x1ec   :  { %v1728_v8 = vpop.f32.mrf.mxu1 }
 0x1ed   :  { %v1440_v11 = vpop.f32.mrf.mxu0  ;;  %v2009_v10 = vadd.f32 %v2470_v4, %v1727_v6 }
 0x1ee   :  { %v1729_v9 = vpop.f32.mrf.mxu1 }
 0x1ef   :  { %v1730_v12 = vadd.f32 %v1729_v9, %v1440_v11  ;;  %v1442_v13 = vpop.f32.mrf.mxu0  ;;  %2073 = vst [vmem:[%s3264_s3 + $0x1d0] sm:$0xff] %v2009_v10 }
 0x1f0   :  { %v1731_v14 = vpop.f32.mrf.mxu1 }
 0x1f1   :  { %v1445_v15 = vpop.f32.mrf.mxu0  ;;  %v2010_v17 = vadd.f32 %v2470_v4, %v1730_v12 }
 0x1f2   :  { %v1734_v16 = vpop.f32.mrf.mxu1 }
 0x1f3   :  { %v1735_v18 = vadd.f32 %v1734_v16, %v1445_v15  ;;  %v1447_v19 = vpop.f32.mrf.mxu0  ;;  %2074 = vst [vmem:[%s3264_s3 + $0x1d8] sm:$0xff] %v2010_v17 }
 0x1f4   :  { %v1736_v20 = vpop.f32.mrf.mxu1 }
 0x1f5   :  { %v1448_v21 = vpop.f32.mrf.mxu0  ;;  %v2011_v23 = vadd.f32 %v2470_v4, %v1735_v18 }
 0x1f6   :  { %v1737_v22 = vpop.f32.mrf.mxu1 }
 0x1f7   :  { %v1738_v24 = vadd.f32 %v1737_v22, %v1448_v21  ;;  %v1450_v25 = vpop.f32.mrf.mxu0  ;;  %2075 = vst [vmem:[%s3264_s3 + $0x1e0] sm:$0xff] %v2011_v23 }
 0x1f8   :  { %v1739_v26 = vpop.f32.mrf.mxu1 }
 0x1f9   :  { %v1453_v27 = vpop.f32.mrf.mxu0  ;;  %v2012_v29 = vadd.f32 %v2470_v4, %v1738_v24 }
 0x1fa   :  { %v1742_v28 = vpop.f32.mrf.mxu1 }
 0x1fb   :  { %v1743_v30 = vadd.f32 %v1742_v28, %v1453_v27  ;;  %v1455_v31 = vpop.f32.mrf.mxu0  ;;  %2076 = vst [vmem:[%s3264_s3 + $0x1e8] sm:$0xff] %v2012_v29 }
 0x1fc   :  { %v1744_v32 = vpop.f32.mrf.mxu1 }
 0x1fd   :  { %v1456_v33 = vpop.f32.mrf.mxu0  ;;  %v2013_v35 = vadd.f32 %v2470_v4, %v1743_v30 }
 0x1fe   :  { %v1745_v34 = vpop.f32.mrf.mxu1 }
 0x1ff   :  { %v1746_v36 = vadd.f32 %v1745_v34, %v1456_v33  ;;  %v1458_v37 = vpop.f32.mrf.mxu0  ;;  %2077 = vst [vmem:[%s3264_s3 + $0x1f0] sm:$0xff] %v2013_v35 }
 0x200   :  { %v1747_v38 = vpop.f32.mrf.mxu1 }
 0x201   :  { %v2014_v39 = vadd.f32 %v2470_v4, %v1746_v36 }
 0x203   :  { %2078 = vst [vmem:[%s3264_s3 + $0x1f8] sm:$0xff] %v2014_v39 }

// kernel: _gcn_forward.5
= control target key start
LH: loop header
LB: loop body
LE: loop exit
PB: predicated region body
PF: predicated region fallthrough
CT: control target
= control target key end

     0   :  { %v3109_v0 = vmov 0   ;;  %s3804_s1 = inlined_call_operand.vmem [shape: bf16[512,128], index: 1, kind: input, shape index: {}]   ;;  %s3805_s0 = inlined_call_operand.vmem [shape: bf16[512,512], index: 0, kind: input, shape index: {}]   ;;  %s3806_s2 = inlined_call_operand.vmem [shape: f32[1,128], index: 2, kind: input, shape index: {}]   ;;  %s3807_s3 = inlined_call_operand.vmem [shape: bf16[512,128], index: 3, kind: output, shape index: {}]  }
   0x1   :  { %1171 = vmatprep.subr.bf16.mxu0 %v3109_v0  ;;  %1460 = vmatprep.subr.bf16.mxu1 %v3109_v0  ;;  %v2884_v1 = vld [vmem:[%s3804_s1 + $0x38] sm:$0xff]   ;;  %v2886_v3 = vld [vmem:[%s3804_s1 + $0x30] sm:$0xff]   ;;  %v2888_v5 = vld [vmem:[%s3804_s1 + $0x28] sm:$0xff]  }
   0x2   :  { %v2885_v2 = vld [vmem:[%s3804_s1 + $0xb8] sm:$0xff]   ;;  %1172 = vmatpush1.bf16.msra.mxu0 %v2884_v1  ;;  %v2887_v4 = vld [vmem:[%s3804_s1 + $0xb0] sm:$0xff]   ;;  %v2889_v6 = vld [vmem:[%s3804_s1 + $0xa8] sm:$0xff]  }
   0x3   :  { %1461 = vmatpush1.bf16.msra.mxu1 %v2885_v2  ;;  %1173 = vmatprep.subr.bf16.mxu0 %v3109_v0  ;;  %v2890_v7 = vld [vmem:[%s3804_s1 + $0x20] sm:$0xff]   ;;  %v2892_v9 = vld [vmem:[%s3804_s1 + $0x18] sm:$0xff]   ;;  %v2894_v11 = vld [vmem:[%s3804_s1 + $0x10] sm:$0xff]  }
   0x4   :  { %1462 = vmatprep.subr.bf16.mxu1 %v3109_v0  ;;  %v2891_v8 = vld [vmem:[%s3804_s1 + $0xa0] sm:$0xff]   ;;  %v2893_v10 = vld [vmem:[%s3804_s1 + $0x98] sm:$0xff]   ;;  %v2895_v12 = vld [vmem:[%s3804_s1 + $0x90] sm:$0xff]  }
   0x5   :  { %v2896_v13 = vld [vmem:[%s3804_s1 + $0x8] sm:$0xff]   ;;  %v2898_v15 = vld [vmem:[%s3804_s1] sm:$0xff]   ;;  %v2900_v17 = vld [vmem:[%s3804_s1 + $0x78] sm:$0xff]  }
   0x6   :  { %1174 = vmatpush1.bf16.msra.mxu0 %v2886_v3  ;;  %v2897_v14 = vld [vmem:[%s3804_s1 + $0x88] sm:$0xff]   ;;  %v2899_v16 = vld [vmem:[%s3804_s1 + $0x80] sm:$0xff]   ;;  %v2901_v18 = vld [vmem:[%s3804_s1 + $0xf8] sm:$0xff]  }
   0x7   :  { %1463 = vmatpush1.bf16.msra.mxu1 %v2887_v4  ;;  %1175 = vmatprep.subr.bf16.mxu0 %v3109_v0  ;;  %v2918_v19 = vld [vmem:[%s3805_s0 + $0x4] ss:$16 sps:$4 sm:$0xff]   ;;  %v2921_v21 = vld [vmem:[%s3805_s0 + $0xc] ss:$16 sps:$4 sm:$0xff]   ;;  %v2916_v35 = vld [vmem:[%s3805_s0] ss:$16 sps:$4 sm:$0xff]  }
   0x8   :  { %1464 = vmatprep.subr.bf16.mxu1 %v3109_v0  ;;  %v2902_v20 = vld [vmem:[%s3804_s1 + $0x70] sm:$0xff]   ;;  %1203 = vmatprep.mubr.bf16.mxu0 %v2918_v19  ;;  %v2904_v23 = vld [vmem:[%s3804_s1 + $0x68] sm:$0xff]   ;;  %v2906_v25 = vld [vmem:[%s3804_s1 + $0x60] sm:$0xff]  }
   0x9   :  { %v2903_v22 = vld [vmem:[%s3804_s1 + $0xf0] sm:$0xff]   ;;  %1492 = vmatprep.mubr.bf16.mxu1 %v2921_v21  ;;  %v2905_v24 = vld [vmem:[%s3804_s1 + $0xe8] sm:$0xff]   ;;  %v2907_v26 = vld [vmem:[%s3804_s1 + $0xe0] sm:$0xff]  }
   0xa   :  { %1176 = vmatpush1.bf16.msra.mxu0 %v2888_v5  ;;  %v2908_v27 = vld [vmem:[%s3804_s1 + $0x58] sm:$0xff]   ;;  %v2910_v29 = vld [vmem:[%s3804_s1 + $0x50] sm:$0xff]   ;;  %v2912_v31 = vld [vmem:[%s3804_s1 + $0x48] sm:$0xff]  }
   0xb   :  { %1465 = vmatpush1.bf16.msra.mxu1 %v2889_v6  ;;  %1177 = vmatprep.subr.bf16.mxu0 %v3109_v0  ;;  %v2909_v28 = vld [vmem:[%s3804_s1 + $0xd8] sm:$0xff]   ;;  %v2911_v30 = vld [vmem:[%s3804_s1 + $0xd0] sm:$0xff]   ;;  %v2913_v32 = vld [vmem:[%s3804_s1 + $0xc8] sm:$0xff]  }
   0xc   :  { %1466 = vmatprep.subr.bf16.mxu1 %v3109_v0  ;;  %v2914_v33 = vld [vmem:[%s3804_s1 + $0x40] sm:$0xff]   ;;  %v2919_v36 = vld [vmem:[%s3805_s0 + $0x8] ss:$16 sps:$4 sm:$0xff]   ;;  %v2924_v38 = vld [vmem:[%s3805_s0 + $0x2c] ss:$16 sps:$4 sm:$0xff]  }
   0xd   :  { %v2915_v34 = vld [vmem:[%s3804_s1 + $0xc0] sm:$0xff]   ;;  %v2927_v40 = vld [vmem:[%s3805_s0 + $0x28] ss:$16 sps:$4 sm:$0xff]   ;;  %v2930_v42 = vld [vmem:[%s3805_s0 + $0x4c] ss:$16 sps:$4 sm:$0xff]  }
   0xe   :  { %1178 = vmatpush1.bf16.msra.mxu0 %v2890_v7  ;;  %v2922_v37 = vld [vmem:[%s3805_s0 + $0x24] ss:$16 sps:$4 sm:$0xff]   ;;  %v2926_v39 = vld [vmem:[%s3805_s0 + $0x20] ss:$16 sps:$4 sm:$0xff]   ;;  %v2933_v44 = vld [vmem:[%s3805_s0 + $0x48] ss:$16 sps:$4 sm:$0xff]  }
   0xf   :  { %1467 = vmatpush1.bf16.msra.mxu1 %v2891_v8  ;;  %1179 = vmatprep.subr.bf16.mxu0 %v3109_v0  ;;  %v2928_v41 = vld [vmem:[%s3805_s0 + $0x44] ss:$16 sps:$4 sm:$0xff]   ;;  %v2932_v43 = vld [vmem:[%s3805_s0 + $0x40] ss:$16 sps:$4 sm:$0xff]   ;;  %v2936_v46 = vld [vmem:[%s3805_s0 + $0x6c] ss:$16 sps:$4 sm:$0xff]  }
  0x10   :  { %1468 = vmatprep.subr.bf16.mxu1 %v3109_v0  ;;  %v2934_v45 = vld [vmem:[%s3805_s0 + $0x64] ss:$16 sps:$4 sm:$0xff]   ;;  %v2938_v47 = vld [vmem:[%s3805_s0 + $0x60] ss:$16 sps:$4 sm:$0xff]   ;;  %v2939_v48 = vld [vmem:[%s3805_s0 + $0x68] ss:$16 sps:$4 sm:$0xff]  }
  0x11   :  { %v2940_v49 = vld [vmem:[%s3805_s0 + $0x84] ss:$16 sps:$4 sm:$0xff]   ;;  %v2942_v50 = vld [vmem:[%s3805_s0 + $0x8c] ss:$16 sps:$4 sm:$0xff]   ;;  %v2944_v51 = vld [vmem:[%s3805_s0 + $0x80] ss:$16 sps:$4 sm:$0xff]  }
  0x12   :  { %1180 = vmatpush1.bf16.msra.mxu0 %v2892_v9  ;;  %v2945_v52 = vld [vmem:[%s3805_s0 + $0x88] ss:$16 sps:$4 sm:$0xff]   ;;  %v2946_v53 = vld [vmem:[%s3805_s0 + $0xa4] ss:$16 sps:$4 sm:$0xff]   ;;  %v2948_v54 = vld [vmem:[%s3805_s0 + $0xac] ss:$16 sps:$4 sm:$0xff]  }
  0x13   :  { %1469 = vmatpush1.bf16.msra.mxu1 %v2893_v10  ;;  %1181 = vmatprep.subr.bf16.mxu0 %v3109_v0  ;;  %v2950_v55 = vld [vmem:[%s3805_s0 + $0xa0] ss:$16 sps:$4 sm:$0xff]   ;;  %v2951_v56 = vld [vmem:[%s3805_s0 + $0xa8] ss:$16 sps:$4 sm:$0xff]   ;;  %v2952_v57 = vld [vmem:[%s3805_s0 + $0xc4] ss:$16 sps:$4 sm:$0xff]  }
  0x14   :  { %1470 = vmatprep.subr.bf16.mxu1 %v3109_v0  ;;  %v2954_v58 = vld [vmem:[%s3805_s0 + $0xcc] ss:$16 sps:$4 sm:$0xff]   ;;  %v2956_v59 = vld [vmem:[%s3805_s0 + $0xc0] ss:$16 sps:$4 sm:$0xff]   ;;  %v2957_v60 = vld [vmem:[%s3805_s0 + $0xc8] ss:$16 sps:$4 sm:$0xff]  }
  0x15   :  { %v2958_v61 = vld [vmem:[%s3805_s0 + $0xe4] ss:$16 sps:$4 sm:$0xff]   ;;  %v2960_v62 = vld [vmem:[%s3805_s0 + $0xec] ss:$16 sps:$4 sm:$0xff]   ;;  %v2962_v63 = vld [vmem:[%s3805_s0 + $0xe0] ss:$16 sps:$4 sm:$0xff]  }
  0x16   :  { %1182 = vmatpush1.bf16.msra.mxu0 %v2894_v11  ;;  %v2964_v1 = vld [vmem:[%s3805_s0 + $0x104] ss:$16 sps:$4 sm:$0xff]   ;;  %v2966_v2 = vld [vmem:[%s3805_s0 + $0x10c] ss:$16 sps:$4 sm:$0xff]   ;;  %v2968_v3 = vld [vmem:[%s3805_s0 + $0x100] ss:$16 sps:$4 sm:$0xff]  }
  0x17   :  { %1471 = vmatpush1.bf16.msra.mxu1 %v2895_v12  ;;  %1183 = vmatprep.subr.bf16.mxu0 %v3109_v0  ;;  %v2969_v4 = vld [vmem:[%s3805_s0 + $0x108] ss:$16 sps:$4 sm:$0xff]   ;;  %v2970_v5 = vld [vmem:[%s3805_s0 + $0x124] ss:$16 sps:$4 sm:$0xff]   ;;  %v2972_v6 = vld [vmem:[%s3805_s0 + $0x12c] ss:$16 sps:$4 sm:$0xff]  }
  0x18   :  { %1472 = vmatprep.subr.bf16.mxu1 %v3109_v0  ;;  %v2974_v7 = vld [vmem:[%s3805_s0 + $0x120] ss:$16 sps:$4 sm:$0xff]   ;;  %v2975_v8 = vld [vmem:[%s3805_s0 + $0x128] ss:$16 sps:$4 sm:$0xff]   ;;  %v2976_v9 = vld [vmem:[%s3805_s0 + $0x144] ss:$16 sps:$4 sm:$0xff]  }
  0x19   :  { %v2978_v10 = vld [vmem:[%s3805_s0 + $0x14c] ss:$16 sps:$4 sm:$0xff]   ;;  %v2980_v11 = vld [vmem:[%s3805_s0 + $0x140] ss:$16 sps:$4 sm:$0xff]   ;;  %v2981_v12 = vld [vmem:[%s3805_s0 + $0x148] ss:$16 sps:$4 sm:$0xff]  }
  0x1a   :  { %1184 = vmatpush1.bf16.msra.mxu0 %v2896_v13  ;;  %v2982_v13 = vld [vmem:[%s3805_s0 + $0x164] ss:$16 sps:$4 sm:$0xff]   ;;  %v2992_v19 = vld [vmem:[%s3805_s0 + $0x180] ss:$16 sps:$4 sm:$0xff]  }
  0x1b   :  { %1473 = vmatpush1.bf16.msra.mxu1 %v2897_v14  ;;  %1185 = vmatprep.subr.bf16.mxu0 %v3109_v0  ;;  %v2984_v14 = vld [vmem:[%s3805_s0 + $0x16c] ss:$16 sps:$4 sm:$0xff]   ;;  %v2994_v21 = vld [vmem:[%s3805_s0 + $0x1a4] ss:$16 sps:$4 sm:$0xff]  }
  0x1c   :  { %1474 = vmatprep.subr.bf16.mxu1 %v3109_v0 }
  0x1e   :  { %1186 = vmatpush1.bf16.msra.mxu0 %v2898_v15  ;;  %v2986_v15 = vld [vmem:[%s3805_s0 + $0x160] ss:$16 sps:$4 sm:$0xff]  }
  0x1f   :  { %1475 = vmatpush1.bf16.msra.mxu1 %v2899_v16  ;;  %1187 = vmatprep.subr.bf16.mxu0 %v3109_v0  ;;  %v2987_v16 = vld [vmem:[%s3805_s0 + $0x168] ss:$16 sps:$4 sm:$0xff]  }
  0x20   :  { %1476 = vmatprep.subr.bf16.mxu1 %v3109_v0 }
  0x22   :  { %1188 = vmatpush2.bf16.msra.mxu0 %v2900_v17  ;;  %v2988_v17 = vld [vmem:[%s3805_s0 + $0x184] ss:$16 sps:$4 sm:$0xff]  }
  0x23   :  { %1477 = vmatpush2.bf16.msra.mxu1 %v2901_v18  ;;  %1189 = vmatprep.subr.bf16.mxu0 %v3109_v0  ;;  %v2990_v18 = vld [vmem:[%s3805_s0 + $0x18c] ss:$16 sps:$4 sm:$0xff]  }
  0x24   :  { %1478 = vmatprep.subr.bf16.mxu1 %v3109_v0 }
  0x26   :  { %1190 = vmatpush2.bf16.msra.mxu0 %v2902_v20  ;;  %v2993_v20 = vld [vmem:[%s3805_s0 + $0x188] ss:$16 sps:$4 sm:$0xff]  }
  0x27   :  { %1479 = vmatpush2.bf16.msra.mxu1 %v2903_v22  ;;  %1191 = vmatprep.subr.bf16.mxu0 %v3109_v0  ;;  %v2996_v22 = vld [vmem:[%s3805_s0 + $0x1ac] ss:$16 sps:$4 sm:$0xff]  }
  0x28   :  { %1480 = vmatprep.subr.bf16.mxu1 %v3109_v0 }
  0x2a   :  { %1192 = vmatpush2.bf16.msra.mxu0 %v2904_v23  ;;  %v2998_v23 = vld [vmem:[%s3805_s0 + $0x1a0] ss:$16 sps:$4 sm:$0xff]  }
  0x2b   :  { %1481 = vmatpush2.bf16.msra.mxu1 %v2905_v24  ;;  %1193 = vmatprep.subr.bf16.mxu0 %v3109_v0  ;;  %v2999_v24 = vld [vmem:[%s3805_s0 + $0x1a8] ss:$16 sps:$4 sm:$0xff]  }
  0x2c   :  { %1482 = vmatprep.subr.bf16.mxu1 %v3109_v0 }
  0x2e   :  { %1194 = vmatpush2.bf16.msra.mxu0 %v2906_v25  ;;  %v3000_v25 = vld [vmem:[%s3805_s0 + $0x1c4] ss:$16 sps:$4 sm:$0xff]  }
  0x2f   :  { %1483 = vmatpush2.bf16.msra.mxu1 %v2907_v26  ;;  %1195 = vmatprep.subr.bf16.mxu0 %v3109_v0  ;;  %v3002_v26 = vld [vmem:[%s3805_s0 + $0x1cc] ss:$16 sps:$4 sm:$0xff]  }
  0x30   :  { %1484 = vmatprep.subr.bf16.mxu1 %v3109_v0 }
  0x32   :  { %1196 = vmatpush2.bf16.msra.mxu0 %v2908_v27  ;;  %v3004_v27 = vld [vmem:[%s3805_s0 + $0x1c0] ss:$16 sps:$4 sm:$0xff]  }
  0x33   :  { %1485 = vmatpush2.bf16.msra.mxu1 %v2909_v28  ;;  %1197 = vmatprep.subr.bf16.mxu0 %v3109_v0  ;;  %v3005_v28 = vld [vmem:[%s3805_s0 + $0x1c8] ss:$16 sps:$4 sm:$0xff]  }
  0x34   :  { %1486 = vmatprep.subr.bf16.mxu1 %v3109_v0 }
  0x36   :  { %1198 = vmatpush2.bf16.msra.mxu0 %v2910_v29  ;;  %v3006_v29 = vld [vmem:[%s3805_s0 + $0x1e4] ss:$16 sps:$4 sm:$0xff]  }
  0x37   :  { %1487 = vmatpush2.bf16.msra.mxu1 %v2911_v30  ;;  %1199 = vmatprep.subr.bf16.mxu0 %v3109_v0  ;;  %v3008_v30 = vld [vmem:[%s3805_s0 + $0x1ec] ss:$16 sps:$4 sm:$0xff]  }
  0x38   :  { %1488 = vmatprep.subr.bf16.mxu1 %v3109_v0 }
  0x3a   :  { %1200 = vmatpush2.bf16.msra.mxu0 %v2912_v31  ;;  %v3010_v31 = vld [vmem:[%s3805_s0 + $0x1e0] ss:$16 sps:$4 sm:$0xff]  }
  0x3b   :  { %1489 = vmatpush2.bf16.msra.mxu1 %v2913_v32  ;;  %1201 = vmatprep.subr.bf16.mxu0 %v3109_v0  ;;  %v3011_v32 = vld [vmem:[%s3805_s0 + $0x1e8] ss:$16 sps:$4 sm:$0xff]  }
  0x3c   :  { %1490 = vmatprep.subr.bf16.mxu1 %v3109_v0  ;;  %v2963_v0 = vld [vmem:[%s3805_s0 + $0xe8] ss:$16 sps:$4 sm:$0xff]  }
  0x3e   :  { %1202 = vmatpush2.bf16.msra.mxu0 %v2914_v33  ;;  %v3012_v33 = vld [vmem:[%s3805_s0 + $0x204] ss:$16 sps:$4 sm:$0xff]  }
  0x3f   :  { %1491 = vmatpush2.bf16.msra.mxu1 %v2915_v34  ;;  %v3014_v34 = vld [vmem:[%s3805_s0 + $0x20c] ss:$16 sps:$4 sm:$0xff]  }
  0x41   :  { %1204 = vmatmul.mubr.bf16.vlgmr.msra.gmra.mxu0 %v2916_v35  ;;  %v3016_v35 = vld [vmem:[%s3805_s0 + $0x200] ss:$16 sps:$4 sm:$0xff]  }
  0x42   :  { %1493 = vmatmul.mubr.bf16.vlgmr.msra.gmra.mxu1 %v2919_v36  ;;  %1211 = vmatprep.mubr.bf16.mxu0 %v2922_v37  ;;  %v3017_v36 = vld [vmem:[%s3805_s0 + $0x208] ss:$16 sps:$4 sm:$0xff]   ;;  %v3018_v37 = vld [vmem:[%s3805_s0 + $0x224] ss:$16 sps:$4 sm:$0xff]  }
  0x43   :  { %1500 = vmatprep.mubr.bf16.mxu1 %v2924_v38  ;;  %v3020_v38 = vld [vmem:[%s3805_s0 + $0x22c] ss:$16 sps:$4 sm:$0xff]  }
  0x49   :  { %1212 = vmatmul.mubr.bf16.gmra.mxu0 %v2926_v39  ;;  %v3022_v39 = vld [vmem:[%s3805_s0 + $0x220] ss:$16 sps:$4 sm:$0xff]  }
  0x4a   :  { %1501 = vmatmul.mubr.bf16.gmra.mxu1 %v2927_v40  ;;  %1219 = vmatprep.mubr.bf16.mxu0 %v2928_v41  ;;  %v3023_v40 = vld [vmem:[%s3805_s0 + $0x228] ss:$16 sps:$4 sm:$0xff]   ;;  %v3024_v41 = vld [vmem:[%s3805_s0 + $0x244] ss:$16 sps:$4 sm:$0xff]  }
  0x4b   :  { %1508 = vmatprep.mubr.bf16.mxu1 %v2930_v42  ;;  %v3026_v42 = vld [vmem:[%s3805_s0 + $0x24c] ss:$16 sps:$4 sm:$0xff]  }
  0x51   :  { %1220 = vmatmul.mubr.bf16.gmra.mxu0 %v2932_v43  ;;  %v3028_v43 = vld [vmem:[%s3805_s0 + $0x240] ss:$16 sps:$4 sm:$0xff]  }
  0x52   :  { %1509 = vmatmul.mubr.bf16.gmra.mxu1 %v2933_v44  ;;  %1227 = vmatprep.mubr.bf16.mxu0 %v2934_v45  ;;  %v3029_v44 = vld [vmem:[%s3805_s0 + $0x248] ss:$16 sps:$4 sm:$0xff]   ;;  %v3030_v45 = vld [vmem:[%s3805_s0 + $0x264] ss:$16 sps:$4 sm:$0xff]  }
  0x53   :  { %1516 = vmatprep.mubr.bf16.mxu1 %v2936_v46  ;;  %v3032_v46 = vld [vmem:[%s3805_s0 + $0x26c] ss:$16 sps:$4 sm:$0xff]  }
  0x59   :  { %1228 = vmatmul.mubr.bf16.gmra.mxu0 %v2938_v47  ;;  %v3034_v47 = vld [vmem:[%s3805_s0 + $0x260] ss:$16 sps:$4 sm:$0xff]  }
  0x5a   :  { %1517 = vmatmul.mubr.bf16.gmra.mxu1 %v2939_v48  ;;  %1235 = vmatprep.mubr.bf16.mxu0 %v2940_v49  ;;  %v3035_v48 = vld [vmem:[%s3805_s0 + $0x268] ss:$16 sps:$4 sm:$0xff]   ;;  %v3036_v49 = vld [vmem:[%s3805_s0 + $0x284] ss:$16 sps:$4 sm:$0xff]  }
  0x5b   :  { %1524 = vmatprep.mubr.bf16.mxu1 %v2942_v50  ;;  %v3038_v50 = vld [vmem:[%s3805_s0 + $0x28c] ss:$16 sps:$4 sm:$0xff]  }
  0x61   :  { %1236 = vmatmul.mubr.bf16.gmra.mxu0 %v2944_v51  ;;  %v3040_v51 = vld [vmem:[%s3805_s0 + $0x280] ss:$16 sps:$4 sm:$0xff]  }
  0x62   :  { %1525 = vmatmul.mubr.bf16.gmra.mxu1 %v2945_v52  ;;  %1243 = vmatprep.mubr.bf16.mxu0 %v2946_v53  ;;  %v3041_v52 = vld [vmem:[%s3805_s0 + $0x288] ss:$16 sps:$4 sm:$0xff]   ;;  %v3042_v53 = vld [vmem:[%s3805_s0 + $0x2a4] ss:$16 sps:$4 sm:$0xff]  }
  0x63   :  { %1532 = vmatprep.mubr.bf16.mxu1 %v2948_v54  ;;  %v3044_v54 = vld [vmem:[%s3805_s0 + $0x2ac] ss:$16 sps:$4 sm:$0xff]  }
  0x69   :  { %1244 = vmatmul.mubr.bf16.gmra.mxu0 %v2950_v55  ;;  %v3046_v55 = vld [vmem:[%s3805_s0 + $0x2a0] ss:$16 sps:$4 sm:$0xff]  }
  0x6a   :  { %1533 = vmatmul.mubr.bf16.gmra.mxu1 %v2951_v56  ;;  %1251 = vmatprep.mubr.bf16.mxu0 %v2952_v57  ;;  %v3047_v56 = vld [vmem:[%s3805_s0 + $0x2a8] ss:$16 sps:$4 sm:$0xff]   ;;  %v3048_v57 = vld [vmem:[%s3805_s0 + $0x2c4] ss:$16 sps:$4 sm:$0xff]  }
  0x6b   :  { %1540 = vmatprep.mubr.bf16.mxu1 %v2954_v58  ;;  %v3050_v58 = vld [vmem:[%s3805_s0 + $0x2cc] ss:$16 sps:$4 sm:$0xff]  }
  0x71   :  { %1252 = vmatmul.mubr.bf16.gmra.mxu0 %v2956_v59  ;;  %v3052_v59 = vld [vmem:[%s3805_s0 + $0x2c0] ss:$16 sps:$4 sm:$0xff]  }
  0x72   :  { %1541 = vmatmul.mubr.bf16.gmra.mxu1 %v2957_v60  ;;  %1259 = vmatprep.mubr.bf16.mxu0 %v2958_v61  ;;  %v3053_v60 = vld [vmem:[%s3805_s0 + $0x2c8] ss:$16 sps:$4 sm:$0xff]   ;;  %v3054_v61 = vld [vmem:[%s3805_s0 + $0x2e4] ss:$16 sps:$4 sm:$0xff]  }
  0x73   :  { %1548 = vmatprep.mubr.bf16.mxu1 %v2960_v62  ;;  %v3056_v62 = vld [vmem:[%s3805_s0 + $0x2ec] ss:$16 sps:$4 sm:$0xff]  }
  0x79   :  { %1260 = vmatmul.mubr.bf16.gmra.mxu0 %v2962_v63  ;;  %v3058_v63 = vld [vmem:[%s3805_s0 + $0x2e0] ss:$16 sps:$4 sm:$0xff]  }
  0x7a   :  { %1549 = vmatmul.mubr.bf16.gmra.mxu1 %v2963_v0  ;;  %1267 = vmatprep.mubr.bf16.mxu0 %v2964_v1  ;;  %v3059_v0 = vld [vmem:[%s3805_s0 + $0x2e8] ss:$16 sps:$4 sm:$0xff]   ;;  %v3060_v1 = vld [vmem:[%s3805_s0 + $0x304] ss:$16 sps:$4 sm:$0xff]  }
  0x7b   :  { %1556 = vmatprep.mubr.bf16.mxu1 %v2966_v2  ;;  %v3062_v2 = vld [vmem:[%s3805_s0 + $0x30c] ss:$16 sps:$4 sm:$0xff]  }
  0x81   :  { %1268 = vmatmul.mubr.bf16.gmra.mxu0 %v2968_v3  ;;  %v3064_v3 = vld [vmem:[%s3805_s0 + $0x300] ss:$16 sps:$4 sm:$0xff]  }
  0x82   :  { %1557 = vmatmul.mubr.bf16.gmra.mxu1 %v2969_v4  ;;  %1275 = vmatprep.mubr.bf16.mxu0 %v2970_v5  ;;  %v3065_v4 = vld [vmem:[%s3805_s0 + $0x308] ss:$16 sps:$4 sm:$0xff]   ;;  %v3066_v5 = vld [vmem:[%s3805_s0 + $0x324] ss:$16 sps:$4 sm:$0xff]  }
  0x83   :  { %1564 = vmatprep.mubr.bf16.mxu1 %v2972_v6  ;;  %v3068_v6 = vld [vmem:[%s3805_s0 + $0x32c] ss:$16 sps:$4 sm:$0xff]  }
  0x89   :  { %1276 = vmatmul.mubr.bf16.gmra.mxu0 %v2974_v7 }
  0x8a   :  { %1565 = vmatmul.mubr.bf16.gmra.mxu1 %v2975_v8  ;;  %1283 = vmatprep.mubr.bf16.mxu0 %v2976_v9 }
  0x8b   :  { %1572 = vmatprep.mubr.bf16.mxu1 %v2978_v10 }
  0x91   :  { %1284 = vmatmul.mubr.bf16.gmra.mxu0 %v2980_v11  ;;  %v3567_v11 = vld [vmem:[%s3806_s2] ss:$0 sm:$0xff] }
  0x92   :  { %1573 = vmatmul.mubr.bf16.gmra.mxu1 %v2981_v12  ;;  %1291 = vmatprep.mubr.bf16.mxu0 %v2982_v13 }
  0x93   :  { %1580 = vmatprep.mubr.bf16.mxu1 %v2984_v14  ;;  %v3070_v14 = vld [vmem:[%s3805_s0 + $0x320] ss:$16 sps:$4 sm:$0xff]  }
  0x99   :  { %1292 = vmatmul.mubr.bf16.gmra.mxu0 %v2986_v15 }
  0x9a   :  { %1581 = vmatmul.mubr.bf16.gmra.mxu1 %v2987_v16  ;;  %1299 = vmatprep.mubr.bf16.mxu0 %v2988_v17  ;;  %v3071_v16 = vld [vmem:[%s3805_s0 + $0x328] ss:$16 sps:$4 sm:$0xff]   ;;  %v3072_v17 = vld [vmem:[%s3805_s0 + $0x344] ss:$16 sps:$4 sm:$0xff]  }
  0x9b   :  { %1588 = vmatprep.mubr.bf16.mxu1 %v2990_v18 }
  0xa1   :  { %1300 = vmatmul.mubr.bf16.gmra.mxu0 %v2992_v19 }
  0xa2   :  { %1589 = vmatmul.mubr.bf16.gmra.mxu1 %v2993_v20  ;;  %1307 = vmatprep.mubr.bf16.mxu0 %v2994_v21  ;;  %v3074_v21 = vld [vmem:[%s3805_s0 + $0x34c] ss:$16 sps:$4 sm:$0xff]  }
  0xa3   :  { %1596 = vmatprep.mubr.bf16.mxu1 %v2996_v22 }
  0xa9   :  { %1308 = vmatmul.mubr.bf16.gmra.mxu0 %v2998_v23 }
  0xaa   :  { %1597 = vmatmul.mubr.bf16.gmra.mxu1 %v2999_v24  ;;  %1315 = vmatprep.mubr.bf16.mxu0 %v3000_v25 }
  0xab   :  { %1604 = vmatprep.mubr.bf16.mxu1 %v3002_v26 }
  0xb1   :  { %1316 = vmatmul.mubr.bf16.gmra.mxu0 %v3004_v27 }
  0xb2   :  { %1605 = vmatmul.mubr.bf16.gmra.mxu1 %v3005_v28  ;;  %1323 = vmatprep.mubr.bf16.mxu0 %v3006_v29 }
  0xb3   :  { %1612 = vmatprep.mubr.bf16.mxu1 %v3008_v30 }
  0xb9   :  { %1324 = vmatmul.mubr.bf16.gmra.mxu0 %v3010_v31 }
  0xba   :  { %1613 = vmatmul.mubr.bf16.gmra.mxu1 %v3011_v32  ;;  %1331 = vmatprep.mubr.bf16.mxu0 %v3012_v33  ;;  %v3076_v33 = vld [vmem:[%s3805_s0 + $0x340] ss:$16 sps:$4 sm:$0xff]  }
  0xbb   :  { %1620 = vmatprep.mubr.bf16.mxu1 %v3014_v34 }
  0xc1   :  { %1332 = vmatmul.mubr.bf16.gmra.mxu0 %v3016_v35  ;;  %v3077_v35 = vld [vmem:[%s3805_s0 + $0x348] ss:$16 sps:$4 sm:$0xff]  }
  0xc2   :  { %1621 = vmatmul.mubr.bf16.gmra.mxu1 %v3017_v36  ;;  %1339 = vmatprep.mubr.bf16.mxu0 %v3018_v37  ;;  %v3078_v36 = vld [vmem:[%s3805_s0 + $0x364] ss:$16 sps:$4 sm:$0xff]  }
  0xc3   :  { %1628 = vmatprep.mubr.bf16.mxu1 %v3020_v38 }
  0xc9   :  { %1340 = vmatmul.mubr.bf16.gmra.mxu0 %v3022_v39 }
  0xca   :  { %1629 = vmatmul.mubr.bf16.gmra.mxu1 %v3023_v40  ;;  %1347 = vmatprep.mubr.bf16.mxu0 %v3024_v41  ;;  %v3080_v40 = vld [vmem:[%s3805_s0 + $0x36c] ss:$16 sps:$4 sm:$0xff]  }
  0xcb   :  { %1636 = vmatprep.mubr.bf16.mxu1 %v3026_v42 }
  0xd1   :  { %1348 = vmatmul.mubr.bf16.gmra.mxu0 %v3028_v43 }
  0xd2   :  { %1637 = vmatmul.mubr.bf16.gmra.mxu1 %v3029_v44  ;;  %1355 = vmatprep.mubr.bf16.mxu0 %v3030_v45 }
  0xd3   :  { %1644 = vmatprep.mubr.bf16.mxu1 %v3032_v46 }
  0xd9   :  { %1356 = vmatmul.mubr.bf16.gmra.mxu0 %v3034_v47 }
  0xda   :  { %1645 = vmatmul.mubr.bf16.gmra.mxu1 %v3035_v48  ;;  %1363 = vmatprep.mubr.bf16.mxu0 %v3036_v49 }
  0xdb   :  { %1652 = vmatprep.mubr.bf16.mxu1 %v3038_v50 }
  0xe1   :  { %1364 = vmatmul.mubr.bf16.gmra.mxu0 %v3040_v51 }
  0xe2   :  { %1653 = vmatmul.mubr.bf16.gmra.mxu1 %v3041_v52  ;;  %1371 = vmatprep.mubr.bf16.mxu0 %v3042_v53  ;;  %v3082_v52 = vld [vmem:[%s3805_s0 + $0x360] ss:$16 sps:$4 sm:$0xff]  }
  0xe3   :  { %1660 = vmatprep.mubr.bf16.mxu1 %v3044_v54  ;;  %v3083_v54 = vld [vmem:[%s3805_s0 + $0x368] ss:$16 sps:$4 sm:$0xff]  }
  0xe9   :  { %1372 = vmatmul.mubr.bf16.gmra.mxu0 %v3046_v55  ;;  %v3086_v55 = vld [vmem:[%s3805_s0 + $0x384] ss:$16 sps:$4 sm:$0xff]  }
  0xea   :  { %1661 = vmatmul.mubr.bf16.gmra.mxu1 %v3047_v56  ;;  %1379 = vmatprep.mubr.bf16.mxu0 %v3048_v57 }
  0xeb   :  { %1668 = vmatprep.mubr.bf16.mxu1 %v3050_v58 }
  0xf1   :  { %1380 = vmatmul.mubr.bf16.gmra.mxu0 %v3052_v59  ;;  %v3089_v59 = vld [vmem:[%s3805_s0 + $0x38c] ss:$16 sps:$4 sm:$0xff]  }
  0xf2   :  { %1669 = vmatmul.mubr.bf16.gmra.mxu1 %v3053_v60  ;;  %1387 = vmatprep.mubr.bf16.mxu0 %v3054_v61 }
  0xf3   :  { %1676 = vmatprep.mubr.bf16.mxu1 %v3056_v62 }
  0xf9   :  { %1388 = vmatmul.mubr.bf16.gmra.mxu0 %v3058_v63 }
  0xfa   :  { %1677 = vmatmul.mubr.bf16.gmra.mxu1 %v3059_v0  ;;  %1395 = vmatprep.mubr.bf16.mxu0 %v3060_v1 }
  0xfb   :  { %1684 = vmatprep.mubr.bf16.mxu1 %v3062_v2 }
 0x101   :  { %v1205_v7 = vpop.f32.mrf.mxu0  ;;  %1396 = vmatmul.mubr.bf16.gmra.mxu0 %v3064_v3 }
 0x102   :  { %v1494_v8 = vpop.f32.mrf.mxu1  ;;  %1685 = vmatmul.mubr.bf16.gmra.mxu1 %v3065_v4  ;;  %1403 = vmatprep.mubr.bf16.mxu0 %v3066_v5 }
 0x103   :  { %v1495_v9 = vadd.f32 %v1494_v8, %v1205_v7  ;;  %v1207_v10 = vpop.f32.mrf.mxu0  ;;  %1692 = vmatprep.mubr.bf16.mxu1 %v3068_v6  ;;  %v3084_v7 = vld [vmem:[%s3805_s0 + $0x380] ss:$16 sps:$4 sm:$0xff]  }
 0x104   :  { %v1496_v12 = vpop.f32.mrf.mxu1  ;;  %v3092_v10 = vld [vmem:[%s3805_s0 + $0x3a4] ss:$16 sps:$4 sm:$0xff]  }
 0x105   :  { %v1208_v13 = vpop.f32.mrf.mxu0  ;;  %v1951_v18 = vadd.f32 %v3567_v11, %v1495_v9  ;;  %v3087_v9 = vld [vmem:[%s3805_s0 + $0x388] ss:$16 sps:$4 sm:$0xff]  }
 0x106   :  { %v1497_v15 = vpop.f32.mrf.mxu1 }
 0x107   :  { %v1498_v19 = vadd.f32 %v1497_v15, %v1208_v13  ;;  %v1210_v20 = vpop.f32.mrf.mxu0  ;;  %v2015_v26 = vmax.f32 %v1951_v18, 0.0  ;;  %v3095_v15 = vld [vmem:[%s3805_s0 + $0x3ac] ss:$16 sps:$4 sm:$0xff]  }
 0x108   :  { %v1499_v22 = vpop.f32.mrf.mxu1 }
 0x109   :  { %v1952_v23 = vadd.f32 %v3567_v11, %v1498_v19  ;;  %v1213_v24 = vpop.f32.mrf.mxu0  ;;  %1404 = vmatmul.mubr.bf16.gmra.mxu0 %v3070_v14 }
 0x10a   :  { %v1502_v25 = vpop.f32.mrf.mxu1  ;;  %1693 = vmatmul.mubr.bf16.gmra.mxu1 %v3071_v16  ;;  %1411 = vmatprep.mubr.bf16.mxu0 %v3072_v17 }
 0x10b   :  { %v2016_v27 = vmax.f32 %v1952_v23, 0.0  ;;  %v1503_v28 = vadd.f32 %v1502_v25, %v1213_v24  ;;  %v1215_v29 = vpop.f32.mrf.mxu0  ;;  %1700 = vmatprep.mubr.bf16.mxu1 %v3074_v21 }
 0x10c   :  { %v1504_v30 = vpop.f32.mrf.mxu1  ;;  %v3093_v29 = vld [vmem:[%s3805_s0 + $0x3a8] ss:$16 sps:$4 sm:$0xff]  }
 0x10d   :  { %v2695_v31 = vpack.c.bf16 %v2016_v27, %v2015_v26  ;;  %v1216_v32 = vpop.f32.mrf.mxu0  ;;  %v1953_v37 = vadd.f32 %v3567_v11, %v1503_v28  ;;  %v3090_v27 = vld [vmem:[%s3805_s0 + $0x3a0] ss:$16 sps:$4 sm:$0xff]   ;;  %v3098_v30 = vld [vmem:[%s3805_s0 + $0x3c4] ss:$16 sps:$4 sm:$0xff]  }
 0x10e   :  { %v1505_v34 = vpop.f32.mrf.mxu1 }
 0x10f   :  { %2696 = vst [vmem:[%s3807_s3] sm:$0xff] %v2695_v31   ;;  %v1506_v38 = vadd.f32 %v1505_v34, %v1216_v32  ;;  %v1218_v39 = vpop.f32.mrf.mxu0  ;;  %v2017_v45 = vmax.f32 %v1953_v37, 0.0  ;;  %v3101_v34 = vld [vmem:[%s3805_s0 + $0x3cc] ss:$16 sps:$4 sm:$0xff]  }
 0x110   :  { %v1507_v41 = vpop.f32.mrf.mxu1 }
 0x111   :  { %v1954_v42 = vadd.f32 %v3567_v11, %v1506_v38  ;;  %v1221_v43 = vpop.f32.mrf.mxu0  ;;  %1412 = vmatmul.mubr.bf16.gmra.mxu0 %v3076_v33 }
 0x112   :  { %v1510_v44 = vpop.f32.mrf.mxu1  ;;  %1701 = vmatmul.mubr.bf16.gmra.mxu1 %v3077_v35  ;;  %1419 = vmatprep.mubr.bf16.mxu0 %v3078_v36 }
 0x113   :  { %v2018_v46 = vmax.f32 %v1954_v42, 0.0  ;;  %v1511_v47 = vadd.f32 %v1510_v44, %v1221_v43  ;;  %v1223_v48 = vpop.f32.mrf.mxu0  ;;  %1708 = vmatprep.mubr.bf16.mxu1 %v3080_v40 }
 0x114   :  { %v1512_v49 = vpop.f32.mrf.mxu1  ;;  %v3099_v48 = vld [vmem:[%s3805_s0 + $0x3c8] ss:$16 sps:$4 sm:$0xff]  }
 0x115   :  { %v2700_v50 = vpack.c.bf16 %v2018_v46, %v2017_v45  ;;  %v1224_v51 = vpop.f32.mrf.mxu0  ;;  %v1955_v56 = vadd.f32 %v3567_v11, %v1511_v47  ;;  %v3096_v46 = vld [vmem:[%s3805_s0 + $0x3c0] ss:$16 sps:$4 sm:$0xff]   ;;  %v3104_v49 = vld [vmem:[%s3805_s0 + $0x3e4] ss:$16 sps:$4 sm:$0xff]  }
 0x116   :  { %v1513_v53 = vpop.f32.mrf.mxu1 }
 0x117   :  { %2852 = vst [vmem:[%s3807_s3 + $0x8] sm:$0xff] %v2700_v50   ;;  %v1514_v57 = vadd.f32 %v1513_v53, %v1224_v51  ;;  %v1226_v58 = vpop.f32.mrf.mxu0  ;;  %v2019_v0 = vmax.f32 %v1955_v56, 0.0  ;;  %v3107_v53 = vld [vmem:[%s3805_s0 + $0x3ec] ss:$16 sps:$4 sm:$0xff]  }
 0x118   :  { %v1515_v60 = vpop.f32.mrf.mxu1 }
 0x119   :  { %v1956_v61 = vadd.f32 %v3567_v11, %v1514_v57  ;;  %v1229_v62 = vpop.f32.mrf.mxu0  ;;  %1420 = vmatmul.mubr.bf16.gmra.mxu0 %v3082_v52 }
 0x11a   :  { %v1518_v63 = vpop.f32.mrf.mxu1  ;;  %1709 = vmatmul.mubr.bf16.gmra.mxu1 %v3083_v54  ;;  %1427 = vmatprep.mubr.bf16.mxu0 %v3086_v55 }
 0x11b   :  { %v2020_v1 = vmax.f32 %v1956_v61, 0.0  ;;  %v1519_v2 = vadd.f32 %v1518_v63, %v1229_v62  ;;  %v1231_v3 = vpop.f32.mrf.mxu0  ;;  %1716 = vmatprep.mubr.bf16.mxu1 %v3089_v59 }
 0x11c   :  { %v1520_v4 = vpop.f32.mrf.mxu1  ;;  %v3105_v3 = vld [vmem:[%s3805_s0 + $0x3e8] ss:$16 sps:$4 sm:$0xff]  }
 0x11d   :  { %v2705_v5 = vpack.c.bf16 %v2020_v1, %v2019_v0  ;;  %v1232_v6 = vpop.f32.mrf.mxu0  ;;  %v1957_v12 = vadd.f32 %v3567_v11, %v1519_v2  ;;  %v3102_v1 = vld [vmem:[%s3805_s0 + $0x3e0] ss:$16 sps:$4 sm:$0xff]  }
 0x11e   :  { %v1521_v8 = vpop.f32.mrf.mxu1 }
 0x11f   :  { %2853 = vst [vmem:[%s3807_s3 + $0x10] sm:$0xff] %v2705_v5   ;;  %v1522_v13 = vadd.f32 %v1521_v8, %v1232_v6  ;;  %v1234_v14 = vpop.f32.mrf.mxu0  ;;  %v2021_v20 = vmax.f32 %v1957_v12, 0.0 }
 0x120   :  { %v1523_v16 = vpop.f32.mrf.mxu1 }
 0x121   :  { %v1958_v17 = vadd.f32 %v3567_v11, %v1522_v13  ;;  %v1237_v18 = vpop.f32.mrf.mxu0  ;;  %1428 = vmatmul.mubr.bf16.gmra.mxu0 %v3084_v7 }
 0x122   :  { %v1526_v19 = vpop.f32.mrf.mxu1  ;;  %1717 = vmatmul.mubr.bf16.gmra.mxu1 %v3087_v9  ;;  %1435 = vmatprep.mubr.bf16.mxu0 %v3092_v10 }
 0x123   :  { %v2022_v21 = vmax.f32 %v1958_v17, 0.0  ;;  %v1527_v22 = vadd.f32 %v1526_v19, %v1237_v18  ;;  %v1239_v23 = vpop.f32.mrf.mxu0  ;;  %1724 = vmatprep.mubr.bf16.mxu1 %v3095_v15 }
 0x124   :  { %v1528_v24 = vpop.f32.mrf.mxu1 }
 0x125   :  { %v2710_v25 = vpack.c.bf16 %v2022_v21, %v2021_v20  ;;  %v1240_v26 = vpop.f32.mrf.mxu0  ;;  %v1959_v31 = vadd.f32 %v3567_v11, %v1527_v22 }
 0x126   :  { %v1529_v28 = vpop.f32.mrf.mxu1 }
 0x127   :  { %2854 = vst [vmem:[%s3807_s3 + $0x18] sm:$0xff] %v2710_v25   ;;  %v1530_v32 = vadd.f32 %v1529_v28, %v1240_v26  ;;  %v1242_v33 = vpop.f32.mrf.mxu0  ;;  %v2023_v39 = vmax.f32 %v1959_v31, 0.0 }
 0x128   :  { %v1531_v35 = vpop.f32.mrf.mxu1 }
 0x129   :  { %v1960_v36 = vadd.f32 %v3567_v11, %v1530_v32  ;;  %v1245_v37 = vpop.f32.mrf.mxu0  ;;  %1436 = vmatmul.mubr.bf16.gmra.mxu0 %v3090_v27 }
 0x12a   :  { %v1534_v38 = vpop.f32.mrf.mxu1  ;;  %1725 = vmatmul.mubr.bf16.gmra.mxu1 %v3093_v29  ;;  %1443 = vmatprep.mubr.bf16.mxu0 %v3098_v30 }
 0x12b   :  { %v2024_v40 = vmax.f32 %v1960_v36, 0.0  ;;  %v1535_v41 = vadd.f32 %v1534_v38, %v1245_v37  ;;  %v1247_v42 = vpop.f32.mrf.mxu0  ;;  %1732 = vmatprep.mubr.bf16.mxu1 %v3101_v34 }
 0x12c   :  { %v1536_v43 = vpop.f32.mrf.mxu1 }
 0x12d   :  { %v2715_v44 = vpack.c.bf16 %v2024_v40, %v2023_v39  ;;  %v1248_v45 = vpop.f32.mrf.mxu0  ;;  %v1961_v50 = vadd.f32 %v3567_v11, %v1535_v41 }
 0x12e   :  { %v1537_v47 = vpop.f32.mrf.mxu1 }
 0x12f   :  { %2855 = vst [vmem:[%s3807_s3 + $0x20] sm:$0xff] %v2715_v44   ;;  %v1538_v51 = vadd.f32 %v1537_v47, %v1248_v45  ;;  %v1250_v52 = vpop.f32.mrf.mxu0  ;;  %v2025_v58 = vmax.f32 %v1961_v50, 0.0 }
 0x130   :  { %v1539_v54 = vpop.f32.mrf.mxu1 }
 0x131   :  { %v1962_v55 = vadd.f32 %v3567_v11, %v1538_v51  ;;  %v1253_v56 = vpop.f32.mrf.mxu0  ;;  %1444 = vmatmul.mubr.bf16.gmra.mxu0 %v3096_v46 }
 0x132   :  { %v1542_v57 = vpop.f32.mrf.mxu1  ;;  %1733 = vmatmul.mubr.bf16.gmra.mxu1 %v3099_v48  ;;  %1451 = vmatprep.mubr.bf16.mxu0 %v3104_v49 }
 0x133   :  { %v2026_v59 = vmax.f32 %v1962_v55, 0.0  ;;  %v1543_v60 = vadd.f32 %v1542_v57, %v1253_v56  ;;  %v1255_v61 = vpop.f32.mrf.mxu0  ;;  %1740 = vmatprep.mubr.bf16.mxu1 %v3107_v53 }
 0x134   :  { %v1544_v62 = vpop.f32.mrf.mxu1 }
 0x135   :  { %v2720_v63 = vpack.c.bf16 %v2026_v59, %v2025_v58  ;;  %v1256_v0 = vpop.f32.mrf.mxu0  ;;  %v1963_v4 = vadd.f32 %v3567_v11, %v1543_v60 }
 0x136   :  { %v1545_v2 = vpop.f32.mrf.mxu1 }
 0x137   :  { %2856 = vst [vmem:[%s3807_s3 + $0x28] sm:$0xff] %v2720_v63   ;;  %v1546_v5 = vadd.f32 %v1545_v2, %v1256_v0  ;;  %v1258_v6 = vpop.f32.mrf.mxu0  ;;  %v2027_v12 = vmax.f32 %v1963_v4, 0.0 }
 0x138   :  { %v1547_v7 = vpop.f32.mrf.mxu1 }
 0x139   :  { %v1964_v8 = vadd.f32 %v3567_v11, %v1546_v5  ;;  %v1261_v9 = vpop.f32.mrf.mxu0  ;;  %1452 = vmatmul.mubr.bf16.gmra.mxu0 %v3102_v1 }
 0x13a   :  { %v1550_v10 = vpop.f32.mrf.mxu1  ;;  %1741 = vmatmul.mubr.bf16.gmra.mxu1 %v3105_v3 }
 0x13b   :  { %v2028_v13 = vmax.f32 %v1964_v8, 0.0  ;;  %v1551_v14 = vadd.f32 %v1550_v10, %v1261_v9  ;;  %v1263_v15 = vpop.f32.mrf.mxu0 }
 0x13c   :  { %v1552_v16 = vpop.f32.mrf.mxu1 }
 0x13d   :  { %v2725_v17 = vpack.c.bf16 %v2028_v13, %v2027_v12  ;;  %v1264_v18 = vpop.f32.mrf.mxu0  ;;  %v1965_v20 = vadd.f32 %v3567_v11, %v1551_v14 }
 0x13e   :  { %v1553_v19 = vpop.f32.mrf.mxu1 }
 0x13f   :  { %2857 = vst [vmem:[%s3807_s3 + $0x30] sm:$0xff] %v2725_v17   ;;  %v1554_v21 = vadd.f32 %v1553_v19, %v1264_v18  ;;  %v1266_v22 = vpop.f32.mrf.mxu0  ;;  %v2029_v27 = vmax.f32 %v1965_v20, 0.0 }
 0x140   :  { %v1555_v23 = vpop.f32.mrf.mxu1 }
 0x141   :  { %v1966_v24 = vadd.f32 %v3567_v11, %v1554_v21  ;;  %v1269_v25 = vpop.f32.mrf.mxu0 }
 0x142   :  { %v1558_v26 = vpop.f32.mrf.mxu1 }
 0x143   :  { %v2030_v28 = vmax.f32 %v1966_v24, 0.0  ;;  %v1559_v29 = vadd.f32 %v1558_v26, %v1269_v25  ;;  %v1271_v30 = vpop.f32.mrf.mxu0 }
 0x144   :  { %v1560_v31 = vpop.f32.mrf.mxu1 }
 0x145   :  { %v2730_v32 = vpack.c.bf16 %v2030_v28, %v2029_v27  ;;  %v1272_v33 = vpop.f32.mrf.mxu0  ;;  %v1967_v35 = vadd.f32 %v3567_v11, %v1559_v29 }
 0x146   :  { %v1561_v34 = vpop.f32.mrf.mxu1 }
 0x147   :  { %2858 = vst [vmem:[%s3807_s3 + $0x38] sm:$0xff] %v2730_v32   ;;  %v1562_v36 = vadd.f32 %v1561_v34, %v1272_v33  ;;  %v1274_v37 = vpop.f32.mrf.mxu0  ;;  %v2031_v42 = vmax.f32 %v1967_v35, 0.0 }
 0x148   :  { %v1563_v38 = vpop.f32.mrf.mxu1 }
 0x149   :  { %v1968_v39 = vadd.f32 %v3567_v11, %v1562_v36  ;;  %v1277_v40 = vpop.f32.mrf.mxu0 }
 0x14a   :  { %v1566_v41 = vpop.f32.mrf.mxu1 }
 0x14b   :  { %v2032_v43 = vmax.f32 %v1968_v39, 0.0  ;;  %v1567_v44 = vadd.f32 %v1566_v41, %v1277_v40  ;;  %v1279_v45 = vpop.f32.mrf.mxu0 }
 0x14c   :  { %v1568_v46 = vpop.f32.mrf.mxu1 }
 0x14d   :  { %v2735_v47 = vpack.c.bf16 %v2032_v43, %v2031_v42  ;;  %v1280_v48 = vpop.f32.mrf.mxu0  ;;  %v1969_v50 = vadd.f32 %v3567_v11, %v1567_v44 }
 0x14e   :  { %v1569_v49 = vpop.f32.mrf.mxu1 }
 0x14f   :  { %2859 = vst [vmem:[%s3807_s3 + $0x40] sm:$0xff] %v2735_v47   ;;  %v1570_v51 = vadd.f32 %v1569_v49, %v1280_v48  ;;  %v1282_v52 = vpop.f32.mrf.mxu0  ;;  %v2033_v57 = vmax.f32 %v1969_v50, 0.0 }
 0x150   :  { %v1571_v53 = vpop.f32.mrf.mxu1 }
 0x151   :  { %v1970_v54 = vadd.f32 %v3567_v11, %v1570_v51  ;;  %v1285_v55 = vpop.f32.mrf.mxu0 }
 0x152   :  { %v1574_v56 = vpop.f32.mrf.mxu1 }
 0x153   :  { %v2034_v58 = vmax.f32 %v1970_v54, 0.0  ;;  %v1575_v59 = vadd.f32 %v1574_v56, %v1285_v55  ;;  %v1287_v60 = vpop.f32.mrf.mxu0 }
 0x154   :  { %v1576_v61 = vpop.f32.mrf.mxu1 }
 0x155   :  { %v2740_v62 = vpack.c.bf16 %v2034_v58, %v2033_v57  ;;  %v1288_v63 = vpop.f32.mrf.mxu0  ;;  %v1971_v1 = vadd.f32 %v3567_v11, %v1575_v59 }
 0x156   :  { %v1577_v0 = vpop.f32.mrf.mxu1 }
 0x157   :  { %2860 = vst [vmem:[%s3807_s3 + $0x48] sm:$0xff] %v2740_v62   ;;  %v1578_v2 = vadd.f32 %v1577_v0, %v1288_v63  ;;  %v1290_v3 = vpop.f32.mrf.mxu0  ;;  %v2035_v8 = vmax.f32 %v1971_v1, 0.0 }
 0x158   :  { %v1579_v4 = vpop.f32.mrf.mxu1 }
 0x159   :  { %v1972_v5 = vadd.f32 %v3567_v11, %v1578_v2  ;;  %v1293_v6 = vpop.f32.mrf.mxu0 }
 0x15a   :  { %v1582_v7 = vpop.f32.mrf.mxu1 }
 0x15b   :  { %v2036_v9 = vmax.f32 %v1972_v5, 0.0  ;;  %v1583_v10 = vadd.f32 %v1582_v7, %v1293_v6  ;;  %v1295_v12 = vpop.f32.mrf.mxu0 }
 0x15c   :  { %v1584_v13 = vpop.f32.mrf.mxu1 }
 0x15d   :  { %v2745_v14 = vpack.c.bf16 %v2036_v9, %v2035_v8  ;;  %v1296_v15 = vpop.f32.mrf.mxu0  ;;  %v1973_v17 = vadd.f32 %v3567_v11, %v1583_v10 }
 0x15e   :  { %v1585_v16 = vpop.f32.mrf.mxu1 }
 0x15f   :  { %2861 = vst [vmem:[%s3807_s3 + $0x50] sm:$0xff] %v2745_v14   ;;  %v1586_v18 = vadd.f32 %v1585_v16, %v1296_v15  ;;  %v1298_v19 = vpop.f32.mrf.mxu0  ;;  %v2037_v24 = vmax.f32 %v1973_v17, 0.0 }
 0x160   :  { %v1587_v20 = vpop.f32.mrf.mxu1 }
 0x161   :  { %v1974_v21 = vadd.f32 %v3567_v11, %v1586_v18  ;;  %v1301_v22 = vpop.f32.mrf.mxu0 }
 0x162   :  { %v1590_v23 = vpop.f32.mrf.mxu1 }
 0x163   :  { %v2038_v25 = vmax.f32 %v1974_v21, 0.0  ;;  %v1591_v26 = vadd.f32 %v1590_v23, %v1301_v22  ;;  %v1303_v27 = vpop.f32.mrf.mxu0 }
 0x164   :  { %v1592_v28 = vpop.f32.mrf.mxu1 }
 0x165   :  { %v2750_v29 = vpack.c.bf16 %v2038_v25, %v2037_v24  ;;  %v1304_v30 = vpop.f32.mrf.mxu0  ;;  %v1975_v32 = vadd.f32 %v3567_v11, %v1591_v26 }
 0x166   :  { %v1593_v31 = vpop.f32.mrf.mxu1 }
 0x167   :  { %2862 = vst [vmem:[%s3807_s3 + $0x58] sm:$0xff] %v2750_v29   ;;  %v1594_v33 = vadd.f32 %v1593_v31, %v1304_v30  ;;  %v1306_v34 = vpop.f32.mrf.mxu0  ;;  %v2039_v39 = vmax.f32 %v1975_v32, 0.0 }
 0x168   :  { %v1595_v35 = vpop.f32.mrf.mxu1 }
 0x169   :  { %v1976_v36 = vadd.f32 %v3567_v11, %v1594_v33  ;;  %v1309_v37 = vpop.f32.mrf.mxu0 }
 0x16a   :  { %v1598_v38 = vpop.f32.mrf.mxu1 }
 0x16b   :  { %v2040_v40 = vmax.f32 %v1976_v36, 0.0  ;;  %v1599_v41 = vadd.f32 %v1598_v38, %v1309_v37  ;;  %v1311_v42 = vpop.f32.mrf.mxu0 }
 0x16c   :  { %v1600_v43 = vpop.f32.mrf.mxu1 }
 0x16d   :  { %v2755_v44 = vpack.c.bf16 %v2040_v40, %v2039_v39  ;;  %v1312_v45 = vpop.f32.mrf.mxu0  ;;  %v1977_v47 = vadd.f32 %v3567_v11, %v1599_v41 }
 0x16e   :  { %v1601_v46 = vpop.f32.mrf.mxu1 }
 0x16f   :  { %2863 = vst [vmem:[%s3807_s3 + $0x60] sm:$0xff] %v2755_v44   ;;  %v1602_v48 = vadd.f32 %v1601_v46, %v1312_v45  ;;  %v1314_v49 = vpop.f32.mrf.mxu0  ;;  %v2041_v54 = vmax.f32 %v1977_v47, 0.0 }
 0x170   :  { %v1603_v50 = vpop.f32.mrf.mxu1 }
 0x171   :  { %v1978_v51 = vadd.f32 %v3567_v11, %v1602_v48  ;;  %v1317_v52 = vpop.f32.mrf.mxu0 }
 0x172   :  { %v1606_v53 = vpop.f32.mrf.mxu1 }
 0x173   :  { %v2042_v55 = vmax.f32 %v1978_v51, 0.0  ;;  %v1607_v56 = vadd.f32 %v1606_v53, %v1317_v52  ;;  %v1319_v57 = vpop.f32.mrf.mxu0 }
 0x174   :  { %v1608_v58 = vpop.f32.mrf.mxu1 }
 0x175   :  { %v2760_v59 = vpack.c.bf16 %v2042_v55, %v2041_v54  ;;  %v1320_v60 = vpop.f32.mrf.mxu0  ;;  %v1979_v62 = vadd.f32 %v3567_v11, %v1607_v56 }
 0x176   :  { %v1609_v61 = vpop.f32.mrf.mxu1 }
 0x177   :  { %2864 = vst [vmem:[%s3807_s3 + $0x68] sm:$0xff] %v2760_v59   ;;  %v1610_v63 = vadd.f32 %v1609_v61, %v1320_v60  ;;  %v1322_v0 = vpop.f32.mrf.mxu0  ;;  %v2043_v5 = vmax.f32 %v1979_v62, 0.0 }
 0x178   :  { %v1611_v1 = vpop.f32.mrf.mxu1 }
 0x179   :  { %v1980_v2 = vadd.f32 %v3567_v11, %v1610_v63  ;;  %v1325_v3 = vpop.f32.mrf.mxu0 }
 0x17a   :  { %v1614_v4 = vpop.f32.mrf.mxu1 }
 0x17b   :  { %v2044_v6 = vmax.f32 %v1980_v2, 0.0  ;;  %v1615_v7 = vadd.f32 %v1614_v4, %v1325_v3  ;;  %v1327_v8 = vpop.f32.mrf.mxu0 }
 0x17c   :  { %v1616_v9 = vpop.f32.mrf.mxu1 }
 0x17d   :  { %v2765_v10 = vpack.c.bf16 %v2044_v6, %v2043_v5  ;;  %v1328_v12 = vpop.f32.mrf.mxu0  ;;  %v1981_v14 = vadd.f32 %v3567_v11, %v1615_v7 }
 0x17e   :  { %v1617_v13 = vpop.f32.mrf.mxu1 }
 0x17f   :  { %2865 = vst [vmem:[%s3807_s3 + $0x70] sm:$0xff] %v2765_v10   ;;  %v1618_v15 = vadd.f32 %v1617_v13, %v1328_v12  ;;  %v1330_v16 = vpop.f32.mrf.mxu0  ;;  %v2045_v21 = vmax.f32 %v1981_v14, 0.0 }
 0x180   :  { %v1619_v17 = vpop.f32.mrf.mxu1 }
 0x181   :  { %v1982_v18 = vadd.f32 %v3567_v11, %v1618_v15  ;;  %v1333_v19 = vpop.f32.mrf.mxu0 }
 0x182   :  { %v1622_v20 = vpop.f32.mrf.mxu1 }
 0x183   :  { %v2046_v22 = vmax.f32 %v1982_v18, 0.0  ;;  %v1623_v23 = vadd.f32 %v1622_v20, %v1333_v19  ;;  %v1335_v24 = vpop.f32.mrf.mxu0 }
 0x184   :  { %v1624_v25 = vpop.f32.mrf.mxu1 }
 0x185   :  { %v2770_v26 = vpack.c.bf16 %v2046_v22, %v2045_v21  ;;  %v1336_v27 = vpop.f32.mrf.mxu0  ;;  %v1983_v29 = vadd.f32 %v3567_v11, %v1623_v23 }
 0x186   :  { %v1625_v28 = vpop.f32.mrf.mxu1 }
 0x187   :  { %2866 = vst [vmem:[%s3807_s3 + $0x78] sm:$0xff] %v2770_v26   ;;  %v1626_v30 = vadd.f32 %v1625_v28, %v1336_v27  ;;  %v1338_v31 = vpop.f32.mrf.mxu0  ;;  %v2047_v36 = vmax.f32 %v1983_v29, 0.0 }
 0x188   :  { %v1627_v32 = vpop.f32.mrf.mxu1 }
 0x189   :  { %v1984_v33 = vadd.f32 %v3567_v11, %v1626_v30  ;;  %v1341_v34 = vpop.f32.mrf.mxu0 }
 0x18a   :  { %v1630_v35 = vpop.f32.mrf.mxu1 }
 0x18b   :  { %v2048_v37 = vmax.f32 %v1984_v33, 0.0  ;;  %v1631_v38 = vadd.f32 %v1630_v35, %v1341_v34  ;;  %v1343_v39 = vpop.f32.mrf.mxu0 }
 0x18c   :  { %v1632_v40 = vpop.f32.mrf.mxu1 }
 0x18d   :  { %v2775_v41 = vpack.c.bf16 %v2048_v37, %v2047_v36  ;;  %v1344_v42 = vpop.f32.mrf.mxu0  ;;  %v1985_v44 = vadd.f32 %v3567_v11, %v1631_v38 }
 0x18e   :  { %v1633_v43 = vpop.f32.mrf.mxu1 }
 0x18f   :  { %2867 = vst [vmem:[%s3807_s3 + $0x80] sm:$0xff] %v2775_v41   ;;  %v1634_v45 = vadd.f32 %v1633_v43, %v1344_v42  ;;  %v1346_v46 = vpop.f32.mrf.mxu0  ;;  %v2049_v51 = vmax.f32 %v1985_v44, 0.0 }
 0x190   :  { %v1635_v47 = vpop.f32.mrf.mxu1 }
 0x191   :  { %v1986_v48 = vadd.f32 %v3567_v11, %v1634_v45  ;;  %v1349_v49 = vpop.f32.mrf.mxu0 }
 0x192   :  { %v1638_v50 = vpop.f32.mrf.mxu1 }
 0x193   :  { %v2050_v52 = vmax.f32 %v1986_v48, 0.0  ;;  %v1639_v53 = vadd.f32 %v1638_v50, %v1349_v49  ;;  %v1351_v54 = vpop.f32.mrf.mxu0 }
 0x194   :  { %v1640_v55 = vpop.f32.mrf.mxu1 }
 0x195   :  { %v2780_v56 = vpack.c.bf16 %v2050_v52, %v2049_v51  ;;  %v1352_v57 = vpop.f32.mrf.mxu0  ;;  %v1987_v59 = vadd.f32 %v3567_v11, %v1639_v53 }
 0x196   :  { %v1641_v58 = vpop.f32.mrf.mxu1 }
 0x197   :  { %2868 = vst [vmem:[%s3807_s3 + $0x88] sm:$0xff] %v2780_v56   ;;  %v1642_v60 = vadd.f32 %v1641_v58, %v1352_v57  ;;  %v1354_v61 = vpop.f32.mrf.mxu0  ;;  %v2051_v2 = vmax.f32 %v1987_v59, 0.0 }
 0x198   :  { %v1643_v62 = vpop.f32.mrf.mxu1 }
 0x199   :  { %v1988_v63 = vadd.f32 %v3567_v11, %v1642_v60  ;;  %v1357_v0 = vpop.f32.mrf.mxu0 }
 0x19a   :  { %v1646_v1 = vpop.f32.mrf.mxu1 }
 0x19b   :  { %v2052_v3 = vmax.f32 %v1988_v63, 0.0  ;;  %v1647_v4 = vadd.f32 %v1646_v1, %v1357_v0  ;;  %v1359_v5 = vpop.f32.mrf.mxu0 }
 0x19c   :  { %v1648_v6 = vpop.f32.mrf.mxu1 }
 0x19d   :  { %v2785_v7 = vpack.c.bf16 %v2052_v3, %v2051_v2  ;;  %v1360_v8 = vpop.f32.mrf.mxu0  ;;  %v1989_v10 = vadd.f32 %v3567_v11, %v1647_v4 }
 0x19e   :  { %v1649_v9 = vpop.f32.mrf.mxu1 }
 0x19f   :  { %2869 = vst [vmem:[%s3807_s3 + $0x90] sm:$0xff] %v2785_v7   ;;  %v1650_v12 = vadd.f32 %v1649_v9, %v1360_v8  ;;  %v1362_v13 = vpop.f32.mrf.mxu0  ;;  %v2053_v18 = vmax.f32 %v1989_v10, 0.0 }
 0x1a0   :  { %v1651_v14 = vpop.f32.mrf.mxu1 }
 0x1a1   :  { %v1990_v15 = vadd.f32 %v3567_v11, %v1650_v12  ;;  %v1365_v16 = vpop.f32.mrf.mxu0 }
 0x1a2   :  { %v1654_v17 = vpop.f32.mrf.mxu1 }
 0x1a3   :  { %v2054_v19 = vmax.f32 %v1990_v15, 0.0  ;;  %v1655_v20 = vadd.f32 %v1654_v17, %v1365_v16  ;;  %v1367_v21 = vpop.f32.mrf.mxu0 }
 0x1a4   :  { %v1656_v22 = vpop.f32.mrf.mxu1 }
 0x1a5   :  { %v2790_v23 = vpack.c.bf16 %v2054_v19, %v2053_v18  ;;  %v1368_v24 = vpop.f32.mrf.mxu0  ;;  %v1991_v26 = vadd.f32 %v3567_v11, %v1655_v20 }
 0x1a6   :  { %v1657_v25 = vpop.f32.mrf.mxu1 }
 0x1a7   :  { %2870 = vst [vmem:[%s3807_s3 + $0x98] sm:$0xff] %v2790_v23   ;;  %v1658_v27 = vadd.f32 %v1657_v25, %v1368_v24  ;;  %v1370_v28 = vpop.f32.mrf.mxu0  ;;  %v2055_v33 = vmax.f32 %v1991_v26, 0.0 }
 0x1a8   :  { %v1659_v29 = vpop.f32.mrf.mxu1 }
 0x1a9   :  { %v1992_v30 = vadd.f32 %v3567_v11, %v1658_v27  ;;  %v1373_v31 = vpop.f32.mrf.mxu0 }
 0x1aa   :  { %v1662_v32 = vpop.f32.mrf.mxu1 }
 0x1ab   :  { %v2056_v34 = vmax.f32 %v1992_v30, 0.0  ;;  %v1663_v35 = vadd.f32 %v1662_v32, %v1373_v31  ;;  %v1375_v36 = vpop.f32.mrf.mxu0 }
 0x1ac   :  { %v1664_v37 = vpop.f32.mrf.mxu1 }
 0x1ad   :  { %v2795_v38 = vpack.c.bf16 %v2056_v34, %v2055_v33  ;;  %v1376_v39 = vpop.f32.mrf.mxu0  ;;  %v1993_v41 = vadd.f32 %v3567_v11, %v1663_v35 }
 0x1ae   :  { %v1665_v40 = vpop.f32.mrf.mxu1 }
 0x1af   :  { %2871 = vst [vmem:[%s3807_s3 + $0xa0] sm:$0xff] %v2795_v38   ;;  %v1666_v42 = vadd.f32 %v1665_v40, %v1376_v39  ;;  %v1378_v43 = vpop.f32.mrf.mxu0  ;;  %v2057_v48 = vmax.f32 %v1993_v41, 0.0 }
 0x1b0   :  { %v1667_v44 = vpop.f32.mrf.mxu1 }
 0x1b1   :  { %v1994_v45 = vadd.f32 %v3567_v11, %v1666_v42  ;;  %v1381_v46 = vpop.f32.mrf.mxu0 }
 0x1b2   :  { %v1670_v47 = vpop.f32.mrf.mxu1 }
 0x1b3   :  { %v2058_v49 = vmax.f32 %v1994_v45, 0.0  ;;  %v1671_v50 = vadd.f32 %v1670_v47, %v1381_v46  ;;  %v1383_v51 = vpop.f32.mrf.mxu0 }
 0x1b4   :  { %v1672_v52 = vpop.f32.mrf.mxu1 }
 0x1b5   :  { %v2800_v53 = vpack.c.bf16 %v2058_v49, %v2057_v48  ;;  %v1384_v54 = vpop.f32.mrf.mxu0  ;;  %v1995_v56 = vadd.f32 %v3567_v11, %v1671_v50 }
 0x1b6   :  { %v1673_v55 = vpop.f32.mrf.mxu1 }
 0x1b7   :  { %2872 = vst [vmem:[%s3807_s3 + $0xa8] sm:$0xff] %v2800_v53   ;;  %v1674_v57 = vadd.f32 %v1673_v55, %v1384_v54  ;;  %v1386_v58 = vpop.f32.mrf.mxu0  ;;  %v2059_v63 = vmax.f32 %v1995_v56, 0.0 }
 0x1b8   :  { %v1675_v59 = vpop.f32.mrf.mxu1 }
 0x1b9   :  { %v1996_v60 = vadd.f32 %v3567_v11, %v1674_v57  ;;  %v1389_v61 = vpop.f32.mrf.mxu0 }
 0x1ba   :  { %v1678_v62 = vpop.f32.mrf.mxu1 }
 0x1bb   :  { %v2060_v0 = vmax.f32 %v1996_v60, 0.0  ;;  %v1679_v1 = vadd.f32 %v1678_v62, %v1389_v61  ;;  %v1391_v2 = vpop.f32.mrf.mxu0 }
 0x1bc   :  { %v1680_v3 = vpop.f32.mrf.mxu1 }
 0x1bd   :  { %v2805_v4 = vpack.c.bf16 %v2060_v0, %v2059_v63  ;;  %v1392_v5 = vpop.f32.mrf.mxu0  ;;  %v1997_v7 = vadd.f32 %v3567_v11, %v1679_v1 }
 0x1be   :  { %v1681_v6 = vpop.f32.mrf.mxu1 }
 0x1bf   :  { %2873 = vst [vmem:[%s3807_s3 + $0xb0] sm:$0xff] %v2805_v4   ;;  %v1682_v8 = vadd.f32 %v1681_v6, %v1392_v5  ;;  %v1394_v9 = vpop.f32.mrf.mxu0  ;;  %v2061_v15 = vmax.f32 %v1997_v7, 0.0 }
 0x1c0   :  { %v1683_v10 = vpop.f32.mrf.mxu1 }
 0x1c1   :  { %v1998_v12 = vadd.f32 %v3567_v11, %v1682_v8  ;;  %v1397_v13 = vpop.f32.mrf.mxu0 }
 0x1c2   :  { %v1686_v14 = vpop.f32.mrf.mxu1 }
 0x1c3   :  { %v2062_v16 = vmax.f32 %v1998_v12, 0.0  ;;  %v1687_v17 = vadd.f32 %v1686_v14, %v1397_v13  ;;  %v1399_v18 = vpop.f32.mrf.mxu0 }
 0x1c4   :  { %v1688_v19 = vpop.f32.mrf.mxu1 }
 0x1c5   :  { %v2810_v20 = vpack.c.bf16 %v2062_v16, %v2061_v15  ;;  %v1400_v21 = vpop.f32.mrf.mxu0  ;;  %v1999_v23 = vadd.f32 %v3567_v11, %v1687_v17 }
 0x1c6   :  { %v1689_v22 = vpop.f32.mrf.mxu1 }
 0x1c7   :  { %2874 = vst [vmem:[%s3807_s3 + $0xb8] sm:$0xff] %v2810_v20   ;;  %v1690_v24 = vadd.f32 %v1689_v22, %v1400_v21  ;;  %v1402_v25 = vpop.f32.mrf.mxu0  ;;  %v2063_v30 = vmax.f32 %v1999_v23, 0.0 }
 0x1c8   :  { %v1691_v26 = vpop.f32.mrf.mxu1 }
 0x1c9   :  { %v2000_v27 = vadd.f32 %v3567_v11, %v1690_v24  ;;  %v1405_v28 = vpop.f32.mrf.mxu0 }
 0x1ca   :  { %v1694_v29 = vpop.f32.mrf.mxu1 }
 0x1cb   :  { %v2064_v31 = vmax.f32 %v2000_v27, 0.0  ;;  %v1695_v32 = vadd.f32 %v1694_v29, %v1405_v28  ;;  %v1407_v33 = vpop.f32.mrf.mxu0 }
 0x1cc   :  { %v1696_v34 = vpop.f32.mrf.mxu1 }
 0x1cd   :  { %v2815_v35 = vpack.c.bf16 %v2064_v31, %v2063_v30  ;;  %v1408_v36 = vpop.f32.mrf.mxu0  ;;  %v2001_v38 = vadd.f32 %v3567_v11, %v1695_v32 }
 0x1ce   :  { %v1697_v37 = vpop.f32.mrf.mxu1 }
 0x1cf   :  { %2875 = vst [vmem:[%s3807_s3 + $0xc0] sm:$0xff] %v2815_v35   ;;  %v1698_v39 = vadd.f32 %v1697_v37, %v1408_v36  ;;  %v1410_v40 = vpop.f32.mrf.mxu0  ;;  %v2065_v45 = vmax.f32 %v2001_v38, 0.0  ;;  %v3108_v35 = vld [vmem:[%s3806_s2] ss:$0 sm:$0xff] }
 0x1d0   :  { %v1699_v41 = vpop.f32.mrf.mxu1 }
 0x1d1   :  { %v2002_v42 = vadd.f32 %v3567_v11, %v1698_v39  ;;  %v1413_v43 = vpop.f32.mrf.mxu0 }
 0x1d2   :  { %v1702_v44 = vpop.f32.mrf.mxu1 }
 0x1d3   :  { %v2066_v46 = vmax.f32 %v2002_v42, 0.0  ;;  %v1703_v47 = vadd.f32 %v1702_v44, %v1413_v43  ;;  %v1415_v48 = vpop.f32.mrf.mxu0 }
 0x1d4   :  { %v1704_v49 = vpop.f32.mrf.mxu1 }
 0x1d5   :  { %v2820_v50 = vpack.c.bf16 %v2066_v46, %v2065_v45  ;;  %v1416_v51 = vpop.f32.mrf.mxu0  ;;  %v2003_v53 = vadd.f32 %v3567_v11, %v1703_v47 }
 0x1d6   :  { %v1705_v52 = vpop.f32.mrf.mxu1 }
 0x1d7   :  { %2876 = vst [vmem:[%s3807_s3 + $0xc8] sm:$0xff] %v2820_v50   ;;  %v1706_v54 = vadd.f32 %v1705_v52, %v1416_v51  ;;  %v1418_v55 = vpop.f32.mrf.mxu0  ;;  %v2067_v60 = vmax.f32 %v2003_v53, 0.0 }
 0x1d8   :  { %v1707_v56 = vpop.f32.mrf.mxu1 }
 0x1d9   :  { %v2004_v57 = vadd.f32 %v3567_v11, %v1706_v54  ;;  %v1421_v58 = vpop.f32.mrf.mxu0 }
 0x1da   :  { %v1710_v59 = vpop.f32.mrf.mxu1 }
 0x1db   :  { %v2068_v61 = vmax.f32 %v2004_v57, 0.0  ;;  %v1711_v62 = vadd.f32 %v1710_v59, %v1421_v58  ;;  %v1423_v63 = vpop.f32.mrf.mxu0 }
 0x1dc   :  { %v1712_v0 = vpop.f32.mrf.mxu1 }
 0x1dd   :  { %v2825_v1 = vpack.c.bf16 %v2068_v61, %v2067_v60  ;;  %v1424_v2 = vpop.f32.mrf.mxu0  ;;  %v2005_v4 = vadd.f32 %v3567_v11, %v1711_v62 }
 0x1de   :  { %v1713_v3 = vpop.f32.mrf.mxu1 }
 0x1df   :  { %2877 = vst [vmem:[%s3807_s3 + $0xd0] sm:$0xff] %v2825_v1   ;;  %v1714_v5 = vadd.f32 %v1713_v3, %v1424_v2  ;;  %v1426_v6 = vpop.f32.mrf.mxu0  ;;  %v2069_v12 = vmax.f32 %v2005_v4, 0.0 }
 0x1e0   :  { %v1715_v7 = vpop.f32.mrf.mxu1 }
 0x1e1   :  { %v2006_v8 = vadd.f32 %v3567_v11, %v1714_v5  ;;  %v1429_v9 = vpop.f32.mrf.mxu0 }
 0x1e2   :  { %v1718_v10 = vpop.f32.mrf.mxu1 }
 0x1e3   :  { %v2070_v13 = vmax.f32 %v2006_v8, 0.0  ;;  %v1719_v14 = vadd.f32 %v1718_v10, %v1429_v9  ;;  %v1431_v15 = vpop.f32.mrf.mxu0 }
 0x1e4   :  { %v1720_v16 = vpop.f32.mrf.mxu1 }
 0x1e5   :  { %v2830_v17 = vpack.c.bf16 %v2070_v13, %v2069_v12  ;;  %v1432_v18 = vpop.f32.mrf.mxu0  ;;  %v2007_v20 = vadd.f32 %v3567_v11, %v1719_v14 }
 0x1e6   :  { %v1721_v19 = vpop.f32.mrf.mxu1 }
 0x1e7   :  { %2878 = vst [vmem:[%s3807_s3 + $0xd8] sm:$0xff] %v2830_v17   ;;  %v1722_v21 = vadd.f32 %v1721_v19, %v1432_v18  ;;  %v1434_v22 = vpop.f32.mrf.mxu0  ;;  %v2071_v27 = vmax.f32 %v2007_v20, 0.0 }
 0x1e8   :  { %v1723_v23 = vpop.f32.mrf.mxu1 }
 0x1e9   :  { %v2008_v24 = vadd.f32 %v3567_v11, %v1722_v21  ;;  %v1437_v25 = vpop.f32.mrf.mxu0 }
 0x1ea   :  { %v1726_v26 = vpop.f32.mrf.mxu1 }
 0x1eb   :  { %v2072_v28 = vmax.f32 %v2008_v24, 0.0  ;;  %v1727_v29 = vadd.f32 %v1726_v26, %v1437_v25  ;;  %v1439_v30 = vpop.f32.mrf.mxu0 }
 0x1ec   :  { %v1728_v31 = vpop.f32.mrf.mxu1 }
 0x1ed   :  { %v2835_v32 = vpack.c.bf16 %v2072_v28, %v2071_v27  ;;  %v1440_v33 = vpop.f32.mrf.mxu0  ;;  %v2009_v36 = vadd.f32 %v3108_v35, %v1727_v29 }
 0x1ee   :  { %v1729_v34 = vpop.f32.mrf.mxu1 }
 0x1ef   :  { %2879 = vst [vmem:[%s3807_s3 + $0xe0] sm:$0xff] %v2835_v32   ;;  %v1730_v11 = vadd.f32 %v1729_v34, %v1440_v33  ;;  %v1442_v37 = vpop.f32.mrf.mxu0  ;;  %v2073_v42 = vmax.f32 %v2009_v36, 0.0 }
 0x1f0   :  { %v1731_v38 = vpop.f32.mrf.mxu1 }
 0x1f1   :  { %v2010_v39 = vadd.f32 %v3108_v35, %v1730_v11  ;;  %v1445_v40 = vpop.f32.mrf.mxu0 }
 0x1f2   :  { %v1734_v41 = vpop.f32.mrf.mxu1 }
 0x1f3   :  { %v2074_v43 = vmax.f32 %v2010_v39, 0.0  ;;  %v1735_v44 = vadd.f32 %v1734_v41, %v1445_v40  ;;  %v1447_v45 = vpop.f32.mrf.mxu0 }
 0x1f4   :  { %v1736_v46 = vpop.f32.mrf.mxu1 }
 0x1f5   :  { %v2840_v47 = vpack.c.bf16 %v2074_v43, %v2073_v42  ;;  %v1448_v48 = vpop.f32.mrf.mxu0  ;;  %v2011_v50 = vadd.f32 %v3108_v35, %v1735_v44 }
 0x1f6   :  { %v1737_v49 = vpop.f32.mrf.mxu1 }
 0x1f7   :  { %2880 = vst [vmem:[%s3807_s3 + $0xe8] sm:$0xff] %v2840_v47   ;;  %v1738_v51 = vadd.f32 %v1737_v49, %v1448_v48  ;;  %v1450_v52 = vpop.f32.mrf.mxu0  ;;  %v2075_v57 = vmax.f32 %v2011_v50, 0.0 }
 0x1f8   :  { %v1739_v53 = vpop.f32.mrf.mxu1 }
 0x1f9   :  { %v2012_v54 = vadd.f32 %v3108_v35, %v1738_v51  ;;  %v1453_v55 = vpop.f32.mrf.mxu0 }
 0x1fa   :  { %v1742_v56 = vpop.f32.mrf.mxu1 }
 0x1fb   :  { %v2076_v58 = vmax.f32 %v2012_v54, 0.0  ;;  %v1743_v59 = vadd.f32 %v1742_v56, %v1453_v55  ;;  %v1455_v60 = vpop.f32.mrf.mxu0 }
 0x1fc   :  { %v1744_v61 = vpop.f32.mrf.mxu1 }
 0x1fd   :  { %v2845_v62 = vpack.c.bf16 %v2076_v58, %v2075_v57  ;;  %v1456_v63 = vpop.f32.mrf.mxu0  ;;  %v2013_v1 = vadd.f32 %v3108_v35, %v1743_v59 }
 0x1fe   :  { %v1745_v0 = vpop.f32.mrf.mxu1 }
 0x1ff   :  { %2881 = vst [vmem:[%s3807_s3 + $0xf0] sm:$0xff] %v2845_v62   ;;  %v1746_v2 = vadd.f32 %v1745_v0, %v1456_v63  ;;  %v1458_v3 = vpop.f32.mrf.mxu0  ;;  %v2077_v6 = vmax.f32 %v2013_v1, 0.0 }
 0x200   :  { %v1747_v4 = vpop.f32.mrf.mxu1 }
 0x201   :  { %v2014_v5 = vadd.f32 %v3108_v35, %v1746_v2 }
 0x203   :  { %v2078_v7 = vmax.f32 %v2014_v5, 0.0 }
 0x205   :  { %v2850_v8 = vpack.c.bf16 %v2078_v7, %v2077_v6 }
 0x207   :  { %2882 = vst [vmem:[%s3807_s3 + $0xf8] sm:$0xff] %v2850_v8  }

</bundles_post_ra>
